<compile_context>
chip_gen: v6e
topology: v6e:2x2x1
jax: 0.10.0
libtpu: 0.0.40
codegen_flags: <defaults>
</compile_context>

<pallas_src>
import jax
import jax.numpy as jnp
import numpy as np
from jax import lax
from jax.experimental import pallas as pl
from jax.experimental.pallas import tpu as pltpu

NEG = -1e30          # effectively -inf for padded vocab columns (keeps all f32 math finite)
GATHER_WINDOW = 8    # in-flight row DMAs for the embedding gather


def _round_up(x, m):
    return (x + m - 1) // m * m


def word_embedding_forward(ids, emb_table, w, b, *, tile_b=128, tile_v=512,
                           vmem_limit_bytes=32 * 1024 * 1024):
    """log_softmax(embedding(ids) @ w.T + b, axis=-1) as a single Pallas TPU kernel."""
    V, D = emb_table.shape
    (B,) = ids.shape

    d_pad = _round_up(D, 128)         # lane-align the contraction dim (200 -> 256)
    v_pad = _round_up(V, tile_v)      # vocab padded to a whole number of tiles
    b_pad = _round_up(B, tile_b)
    nb = b_pad // tile_b
    nv = v_pad // tile_v
    window = min(GATHER_WINDOW, tile_b)

    # ---- wrapper-side layout prep (padding / transpose / dtype) ----
    emb_p = jnp.pad(emb_table.astype(jnp.float32), ((0, 0), (0, d_pad - D)))   # (V, Dp) f32, HBM
    w_t = jnp.pad(w.astype(jnp.float32),
                  ((0, v_pad - V), (0, d_pad - D))).T.astype(jnp.bfloat16)     # (Dp, Vp) bf16, streamed
    bias = jnp.pad(b.astype(jnp.float32), (0, v_pad - V),
                   constant_values=NEG).reshape(1, v_pad)                      # (1, Vp) f32
    ids_p = jnp.pad(ids.astype(jnp.int32), (0, b_pad - B))                     # (Bp,) int32 (SMEM prefetch)

    def kernel(ids_ref, emb_hbm, w_ref, b_ref, out_ref,
               erow_f32, erow_bf16, m_sc, l_sc, lse_sc, sems):
        i = pl.program_id(0)     # batch tile
        kk = pl.program_id(1)    # 0..nv-1: reduce phase, nv..2nv-1: write phase

        # ---- once per batch tile: init accumulators + gather TILE_B embedding rows ----
        @pl.when(kk == 0)
        def _setup():
            m_sc[...] = jnp.full(m_sc.shape, NEG, m_sc.dtype)
            l_sc[...] = jnp.zeros(l_sc.shape, l_sc.dtype)

            base = i * tile_b

            def row_copy(r, slot):
                idx = ids_ref[base + r]
                return pltpu.make_async_copy(
                    emb_hbm.at[pl.ds(idx, 1), :],
                    erow_f32.at[pl.ds(r, 1), :],
                    sems.at[slot],
                )

            # Windowed gather: keep `window` row DMAs in flight; each wait reconstructs the
            # exact (src, dst, sem) descriptor that was started.
            for r in range(window):                      # prologue (static)
                row_copy(r, r % window).start()

            def body(r, carry):
                row_copy(r, r % window).wait()
                row_copy(r + window, (r + window) % window).start()
                return carry

            lax.fori_loop(0, tile_b - window, body, 0)

            for r in range(tile_b - window, tile_b):     # epilogue (static)
                row_copy(r, r % window).wait()

            # One cast for the whole batch tile; the MXU consumes bf16.
            erow_bf16[...] = erow_f32[...].astype(jnp.bfloat16)

        # ---- logits for this vocab tile (needed by both phases): bf16 MXU, f32 accumulate ----
        logits = jnp.dot(erow_bf16[...], w_ref[...],
                         preferred_element_type=jnp.float32) + b_ref[...]

        # ---- phase 0: online log-sum-exp reduction over the vocab axis ----
        @pl.when(kk < nv)
        def _reduce():
            m_new = jnp.maximum(m_sc[...], jnp.max(logits, axis=-1, keepdims=True))
            alpha = jnp.exp(m_sc[...] - m_new)
            l_sc[...] = alpha * l_sc[...] + jnp.sum(jnp.exp(logits - m_new),
                                                    axis=-1, keepdims=True)
            m_sc[...] = m_new

        # finalize lse exactly once, at the last reduction step
        @pl.when(kk == nv - 1)
        def _finalize():
            lse_sc[...] = m_sc[...] + jnp.log(l_sc[...])

        # ---- phase 1: write log-probabilities for this vocab tile ----
        @pl.when(kk >= nv)
        def _write():
            out_ref[...] = (logits - lse_sc[...]).astype(out_ref.dtype)

    grid_spec = pltpu.PrefetchScalarGridSpec(
        num_scalar_prefetch=1,
        grid=(nb, 2 * nv),
        in_specs=[
            pl.BlockSpec(memory_space=pl.ANY),                                 # embedding table (HBM)
            pl.BlockSpec((d_pad, tile_v), lambda i, kk, ids: (0, kk % nv)),    # W_t vocab tile (bf16)
            pl.BlockSpec((1, tile_v), lambda i, kk, ids: (0, kk % nv)),        # bias vocab tile
        ],
        out_specs=pl.BlockSpec((tile_b, tile_v),
                               lambda i, kk, ids: (i, jnp.maximum(kk - nv, 0))),
        scratch_shapes=[
            pltpu.VMEM((tile_b, d_pad), jnp.float32),    # gathered embedding rows (f32 staging)
            pltpu.VMEM((tile_b, d_pad), jnp.bfloat16),   # bf16 copy fed to the MXU
            pltpu.VMEM((tile_b, 1), jnp.float32),        # running max  m
            pltpu.VMEM((tile_b, 1), jnp.float32),        # running sum-exp  l
            pltpu.VMEM((tile_b, 1), jnp.float32),        # lse = m + log(l)
            pltpu.SemaphoreType.DMA((window,)),
        ],
    )

    out = pl.pallas_call(
        kernel,
        out_shape=jax.ShapeDtypeStruct((b_pad, v_pad), jnp.float32),
        grid_spec=grid_spec,
        compiler_params=pltpu.CompilerParams(
            dimension_semantics=("parallel", "arbitrary"),
            vmem_limit_bytes=vmem_limit_bytes,
        ),
    )(ids_p, emb_p, w_t, bias)

    return out[:B, :V]


if __name__ == "__main__":
    VOCAB, EMBED, BATCH = 1000, 200, 128   # small demo shapes (real module: 500000 / 200)

    key = jax.random.PRNGKey(0)
    k_ids, k_emb, k_w, k_b = jax.random.split(key, 4)

    emb_table = jax.random.normal(k_emb, (VOCAB, EMBED), dtype=jnp.float32)   # nn.Embedding: N(0,1)
    bound = 1.0 / np.sqrt(EMBED)
    w = jax.random.uniform(k_w, (VOCAB, EMBED), jnp.float32, -bound, bound)   # nn.Linear weight (V, D)
    b = jax.random.uniform(k_b, (VOCAB,), jnp.float32, -bound, bound)         # nn.Linear bias (V,)
    ids = jax.random.randint(k_ids, (BATCH,), 0, VOCAB, dtype=jnp.int32)

    out = word_embedding_forward(ids, emb_table, w, b, tile_b=128, tile_v=512)
    out = jax.block_until_ready(out)
    out_np = np.asarray(out)

    # Pure-JAX reference of the PyTorch forward (full f32); tolerance covers bf16 weights.
    ref = jax.nn.log_softmax(emb_table[ids] @ w.T + b, axis=1)
    np.testing.assert_allclose(out_np, np.asarray(ref), atol=5e-2, rtol=0)

    # log_softmax self-consistency: each row exponentiates to a probability distribution.
    np.testing.assert_allclose(np.exp(out_np).sum(axis=1), np.ones(BATCH), atol=1e-3, rtol=0)

    print("KERNEL_OK")
</pallas_src>

<mosaic_0001>
module attributes {stable_mosaic.version = 11 : i64} {
  func.func @kernel(%arg0: i32, %arg1: i32, %arg2: memref<128xi32, #tpu.memory_space<smem>>, %arg3: memref<1000x256xf32, #tpu.memory_space<any>>, %arg4: memref<256x512xbf16, #tpu.memory_space<vmem>>, %arg5: memref<1x512xf32, #tpu.memory_space<vmem>>, %arg6: memref<128x512xf32, #tpu.memory_space<vmem>>, %arg7: memref<128x256xf32, #tpu.memory_space<vmem>>, %arg8: memref<128x256xbf16, #tpu.memory_space<vmem>>, %arg9: memref<128x1xf32, #tpu.memory_space<vmem>>, %arg10: memref<128x1xf32, #tpu.memory_space<vmem>>, %arg11: memref<128x1xf32, #tpu.memory_space<vmem>>, %arg12: memref<8x!tpu.dma_semaphore, #tpu.memory_space<semaphore_mem>>) attributes {dimension_semantics = [#tpu.dimension_semantics<parallel>, #tpu.dimension_semantics<arbitrary>], iteration_bounds = array<i64: 1, 4>, scalar_prefetch = 1 : i64, scratch_operands = 6 : i64, tpu.core_type = #tpu.core_type<tc>, window_params = [{}, {transform_indices = @transform_1, window_bounds = array<i64: 256, 512>}, {transform_indices = @transform_2, window_bounds = array<i64: 1, 512>}, {transform_indices = @transform_3, window_bounds = array<i64: 128, 512>}]} {
    %c0_i32 = arith.constant 0 : i32
    %0 = arith.cmpi eq, %arg1, %c0_i32 : i32
    %1 = arith.extui %0 : i1 to i32
    %c0_i32_0 = arith.constant 0 : i32
    %2 = arith.cmpi ne, %1, %c0_i32_0 : i32
    scf.if %2 {
      %cst_10 = arith.constant -1.000000e+30 : f32
      %18 = vector.broadcast %cst_10 : f32 to vector<128x1xf32>
      %c0_11 = arith.constant 0 : index
      %c0_12 = arith.constant 0 : index
      %19 = vector.load %arg9[%c0_11, %c0_12] : memref<128x1xf32, #tpu.memory_space<vmem>>, vector<128x1xf32>
      tpu.vector_store %arg9[%c0_11, %c0_12], %18 {strides = array<i32>} : memref<128x1xf32, #tpu.memory_space<vmem>>, vector<128x1xf32>,
      %cst_13 = arith.constant 0.000000e+00 : f32
      %20 = vector.broadcast %cst_13 : f32 to vector<128x1xf32>
      %c0_14 = arith.constant 0 : index
      %c0_15 = arith.constant 0 : index
      %21 = vector.load %arg10[%c0_14, %c0_15] : memref<128x1xf32, #tpu.memory_space<vmem>>, vector<128x1xf32>
      tpu.vector_store %arg10[%c0_14, %c0_15], %20 {strides = array<i32>} : memref<128x1xf32, #tpu.memory_space<vmem>>, vector<128x1xf32>,
      %c128_i32 = arith.constant 128 : i32
      %22 = arith.muli %arg0, %c128_i32 : i32
      %c0_i32_16 = arith.constant 0 : i32
      %23 = arith.addi %22, %c0_i32_16 : i32
      %24 = arith.index_cast %23 : i32 to index
      %25 = memref.load %arg2[%24] : memref<128xi32, #tpu.memory_space<smem>>
      %c0_i32_17 = arith.constant 0 : i32
      %c0_i32_18 = arith.constant 0 : i32
      %26 = tpu.memref_slice %arg3[%25, %c0_i32_18] : memref<1000x256xf32, #tpu.memory_space<any>> -> memref<1x256xf32, #tpu.memory_space<any>>
      %c0_i32_19 = arith.constant 0 : i32
      %c0_i32_20 = arith.constant 0 : i32
      %27 = tpu.memref_slice %arg7[%c0_i32_19, %c0_i32_20] : memref<128x256xf32, #tpu.memory_space<vmem>> -> memref<1x256xf32, #tpu.memory_space<vmem>>
      %28 = tpu.memref_slice %arg12[%c0_i32_17] : memref<8x!tpu.dma_semaphore, #tpu.memory_space<semaphore_mem>> -> memref<1x!tpu.dma_semaphore, #tpu.memory_space<semaphore_mem>>
      %29 = tpu.memref_squeeze %28 : memref<1x!tpu.dma_semaphore, #tpu.memory_space<semaphore_mem>> -> memref<!tpu.dma_semaphore, #tpu.memory_space<semaphore_mem>>
      tpu.enqueue_dma source(%26 : memref<1x256xf32, #tpu.memory_space<any>>) target(%27 : memref<1x256xf32, #tpu.memory_space<vmem>>) target_semaphore(%29 : memref<!tpu.dma_semaphore, #tpu.memory_space<semaphore_mem>>)
      %c1_i32_21 = arith.constant 1 : i32
      %30 = arith.addi %22, %c1_i32_21 : i32
      %31 = arith.index_cast %30 : i32 to index
      %32 = memref.load %arg2[%31] : memref<128xi32, #tpu.memory_space<smem>>
      %c1_i32_22 = arith.constant 1 : i32
      %c0_i32_23 = arith.constant 0 : i32
      %33 = tpu.memref_slice %arg3[%32, %c0_i32_23] : memref<1000x256xf32, #tpu.memory_space<any>> -> memref<1x256xf32, #tpu.memory_space<any>>
      %c1_i32_24 = arith.constant 1 : i32
      %c0_i32_25 = arith.constant 0 : i32
      %34 = tpu.memref_slice %arg7[%c1_i32_24, %c0_i32_25] : memref<128x256xf32, #tpu.memory_space<vmem>> -> memref<1x256xf32, #tpu.memory_space<vmem>>
      %35 = tpu.memref_slice %arg12[%c1_i32_22] : memref<8x!tpu.dma_semaphore, #tpu.memory_space<semaphore_mem>> -> memref<1x!tpu.dma_semaphore, #tpu.memory_space<semaphore_mem>>
      %36 = tpu.memref_squeeze %35 : memref<1x!tpu.dma_semaphore, #tpu.memory_space<semaphore_mem>> -> memref<!tpu.dma_semaphore, #tpu.memory_space<semaphore_mem>>
      tpu.enqueue_dma source(%33 : memref<1x256xf32, #tpu.memory_space<any>>) target(%34 : memref<1x256xf32, #tpu.memory_space<vmem>>) target_semaphore(%36 : memref<!tpu.dma_semaphore, #tpu.memory_space<semaphore_mem>>)
      %c2_i32_26 = arith.constant 2 : i32
      %37 = arith.addi %22, %c2_i32_26 : i32
      %38 = arith.index_cast %37 : i32 to index
      %39 = memref.load %arg2[%38] : memref<128xi32, #tpu.memory_space<smem>>
      %c2_i32_27 = arith.constant 2 : i32
      %c0_i32_28 = arith.constant 0 : i32
      %40 = tpu.memref_slice %arg3[%39, %c0_i32_28] : memref<1000x256xf32, #tpu.memory_space<any>> -> memref<1x256xf32, #tpu.memory_space<any>>
      %c2_i32_29 = arith.constant 2 : i32
      %c0_i32_30 = arith.constant 0 : i32
      %41 = tpu.memref_slice %arg7[%c2_i32_29, %c0_i32_30] : memref<128x256xf32, #tpu.memory_space<vmem>> -> memref<1x256xf32, #tpu.memory_space<vmem>>
      %42 = tpu.memref_slice %arg12[%c2_i32_27] : memref<8x!tpu.dma_semaphore, #tpu.memory_space<semaphore_mem>> -> memref<1x!tpu.dma_semaphore, #tpu.memory_space<semaphore_mem>>
      %43 = tpu.memref_squeeze %42 : memref<1x!tpu.dma_semaphore, #tpu.memory_space<semaphore_mem>> -> memref<!tpu.dma_semaphore, #tpu.memory_space<semaphore_mem>>
      tpu.enqueue_dma source(%40 : memref<1x256xf32, #tpu.memory_space<any>>) target(%41 : memref<1x256xf32, #tpu.memory_space<vmem>>) target_semaphore(%43 : memref<!tpu.dma_semaphore, #tpu.memory_space<semaphore_mem>>)
      %c3_i32 = arith.constant 3 : i32
      %44 = arith.addi %22, %c3_i32 : i32
      %45 = arith.index_cast %44 : i32 to index
      %46 = memref.load %arg2[%45] : memref<128xi32, #tpu.memory_space<smem>>
      %c3_i32_31 = arith.constant 3 : i32
      %c0_i32_32 = arith.constant 0 : i32
      %47 = tpu.memref_slice %arg3[%46, %c0_i32_32] : memref<1000x256xf32, #tpu.memory_space<any>> -> memref<1x256xf32, #tpu.memory_space<any>>
      %c3_i32_33 = arith.constant 3 : i32
      %c0_i32_34 = arith.constant 0 : i32
      %48 = tpu.memref_slice %arg7[%c3_i32_33, %c0_i32_34] : memref<128x256xf32, #tpu.memory_space<vmem>> -> memref<1x256xf32, #tpu.memory_space<vmem>>
      %49 = tpu.memref_slice %arg12[%c3_i32_31] : memref<8x!tpu.dma_semaphore, #tpu.memory_space<semaphore_mem>> -> memref<1x!tpu.dma_semaphore, #tpu.memory_space<semaphore_mem>>
      %50 = tpu.memref_squeeze %49 : memref<1x!tpu.dma_semaphore, #tpu.memory_space<semaphore_mem>> -> memref<!tpu.dma_semaphore, #tpu.memory_space<semaphore_mem>>
      tpu.enqueue_dma source(%47 : memref<1x256xf32, #tpu.memory_space<any>>) target(%48 : memref<1x256xf32, #tpu.memory_space<vmem>>) target_semaphore(%50 : memref<!tpu.dma_semaphore, #tpu.memory_space<semaphore_mem>>)
      %c4_i32 = arith.constant 4 : i32
      %51 = arith.addi %22, %c4_i32 : i32
      %52 = arith.index_cast %51 : i32 to index
      %53 = memref.load %arg2[%52] : memref<128xi32, #tpu.memory_space<smem>>
      %c4_i32_35 = arith.constant 4 : i32
      %c0_i32_36 = arith.constant 0 : i32
      %54 = tpu.memref_slice %arg3[%53, %c0_i32_36] : memref<1000x256xf32, #tpu.memory_space<any>> -> memref<1x256xf32, #tpu.memory_space<any>>
      %c4_i32_37 = arith.constant 4 : i32
      %c0_i32_38 = arith.constant 0 : i32
      %55 = tpu.memref_slice %arg7[%c4_i32_37, %c0_i32_38] : memref<128x256xf32, #tpu.memory_space<vmem>> -> memref<1x256xf32, #tpu.memory_space<vmem>>
      %56 = tpu.memref_slice %arg12[%c4_i32_35] : memref<8x!tpu.dma_semaphore, #tpu.memory_space<semaphore_mem>> -> memref<1x!tpu.dma_semaphore, #tpu.memory_space<semaphore_mem>>
      %57 = tpu.memref_squeeze %56 : memref<1x!tpu.dma_semaphore, #tpu.memory_space<semaphore_mem>> -> memref<!tpu.dma_semaphore, #tpu.memory_space<semaphore_mem>>
      tpu.enqueue_dma source(%54 : memref<1x256xf32, #tpu.memory_space<any>>) target(%55 : memref<1x256xf32, #tpu.memory_space<vmem>>) target_semaphore(%57 : memref<!tpu.dma_semaphore, #tpu.memory_space<semaphore_mem>>)
      %c5_i32 = arith.constant 5 : i32
      %58 = arith.addi %22, %c5_i32 : i32
      %59 = arith.index_cast %58 : i32 to index
      %60 = memref.load %arg2[%59] : memref<128xi32, #tpu.memory_space<smem>>
      %c5_i32_39 = arith.constant 5 : i32
      %c0_i32_40 = arith.constant 0 : i32
      %61 = tpu.memref_slice %arg3[%60, %c0_i32_40] : memref<1000x256xf32, #tpu.memory_space<any>> -> memref<1x256xf32, #tpu.memory_space<any>>
      %c5_i32_41 = arith.constant 5 : i32
      %c0_i32_42 = arith.constant 0 : i32
      %62 = tpu.memref_slice %arg7[%c5_i32_41, %c0_i32_42] : memref<128x256xf32, #tpu.memory_space<vmem>> -> memref<1x256xf32, #tpu.memory_space<vmem>>
      %63 = tpu.memref_slice %arg12[%c5_i32_39] : memref<8x!tpu.dma_semaphore, #tpu.memory_space<semaphore_mem>> -> memref<1x!tpu.dma_semaphore, #tpu.memory_space<semaphore_mem>>
      %64 = tpu.memref_squeeze %63 : memref<1x!tpu.dma_semaphore, #tpu.memory_space<semaphore_mem>> -> memref<!tpu.dma_semaphore, #tpu.memory_space<semaphore_mem>>
      tpu.enqueue_dma source(%61 : memref<1x256xf32, #tpu.memory_space<any>>) target(%62 : memref<1x256xf32, #tpu.memory_space<vmem>>) target_semaphore(%64 : memref<!tpu.dma_semaphore, #tpu.memory_space<semaphore_mem>>)
      %c6_i32 = arith.constant 6 : i32
      %65 = arith.addi %22, %c6_i32 : i32
      %66 = arith.index_cast %65 : i32 to index
      %67 = memref.load %arg2[%66] : memref<128xi32, #tpu.memory_space<smem>>
      %c6_i32_43 = arith.constant 6 : i32
      %c0_i32_44 = arith.constant 0 : i32
      %68 = tpu.memref_slice %arg3[%67, %c0_i32_44] : memref<1000x256xf32, #tpu.memory_space<any>> -> memref<1x256xf32, #tpu.memory_space<any>>
      %c6_i32_45 = arith.constant 6 : i32
      %c0_i32_46 = arith.constant 0 : i32
      %69 = tpu.memref_slice %arg7[%c6_i32_45, %c0_i32_46] : memref<128x256xf32, #tpu.memory_space<vmem>> -> memref<1x256xf32, #tpu.memory_space<vmem>>
      %70 = tpu.memref_slice %arg12[%c6_i32_43] : memref<8x!tpu.dma_semaphore, #tpu.memory_space<semaphore_mem>> -> memref<1x!tpu.dma_semaphore, #tpu.memory_space<semaphore_mem>>
      %71 = tpu.memref_squeeze %70 : memref<1x!tpu.dma_semaphore, #tpu.memory_space<semaphore_mem>> -> memref<!tpu.dma_semaphore, #tpu.memory_space<semaphore_mem>>
      tpu.enqueue_dma source(%68 : memref<1x256xf32, #tpu.memory_space<any>>) target(%69 : memref<1x256xf32, #tpu.memory_space<vmem>>) target_semaphore(%71 : memref<!tpu.dma_semaphore, #tpu.memory_space<semaphore_mem>>)
      %c7_i32 = arith.constant 7 : i32
      %72 = arith.addi %22, %c7_i32 : i32
      %73 = arith.index_cast %72 : i32 to index
      %74 = memref.load %arg2[%73] : memref<128xi32, #tpu.memory_space<smem>>
      %c7_i32_47 = arith.constant 7 : i32
      %c0_i32_48 = arith.constant 0 : i32
      %75 = tpu.memref_slice %arg3[%74, %c0_i32_48] : memref<1000x256xf32, #tpu.memory_space<any>> -> memref<1x256xf32, #tpu.memory_space<any>>
      %c7_i32_49 = arith.constant 7 : i32
      %c0_i32_50 = arith.constant 0 : i32
      %76 = tpu.memref_slice %arg7[%c7_i32_49, %c0_i32_50] : memref<128x256xf32, #tpu.memory_space<vmem>> -> memref<1x256xf32, #tpu.memory_space<vmem>>
      %77 = tpu.memref_slice %arg12[%c7_i32_47] : memref<8x!tpu.dma_semaphore, #tpu.memory_space<semaphore_mem>> -> memref<1x!tpu.dma_semaphore, #tpu.memory_space<semaphore_mem>>
      %78 = tpu.memref_squeeze %77 : memref<1x!tpu.dma_semaphore, #tpu.memory_space<semaphore_mem>> -> memref<!tpu.dma_semaphore, #tpu.memory_space<semaphore_mem>>
      tpu.enqueue_dma source(%75 : memref<1x256xf32, #tpu.memory_space<any>>) target(%76 : memref<1x256xf32, #tpu.memory_space<vmem>>) target_semaphore(%78 : memref<!tpu.dma_semaphore, #tpu.memory_space<semaphore_mem>>)
      %c0_i32_51 = arith.constant 0 : i32
      %c120_i32 = arith.constant 120 : i32
      %79 = arith.addi %c0_i32_51, %c120_i32 : i32
      %c1_i32_52 = arith.constant 1 : i32
      scf.for %arg13 = %c0_i32_51 to %79 step %c1_i32_52  : i32 {
        %c8_i32 = arith.constant 8 : i32
        %c0_i32_91 = arith.constant 0 : i32
        %139 = arith.cmpi eq, %c8_i32, %c0_i32_91 : i32
        %c1_i32_92 = arith.constant 1 : i32
        %140 = arith.select %139, %c1_i32_92, %c8_i32 : i32
        %141 = arith.remsi %arg13, %140 : i32
        %c0_i32_93 = arith.constant 0 : i32
        %142 = arith.cmpi ne, %141, %c0_i32_93 : i32
        %c0_i32_94 = arith.constant 0 : i32
        %143 = arith.cmpi slt, %141, %c0_i32_94 : i32
        %c0_i32_95 = arith.constant 0 : i32
        %144 = arith.cmpi slt, %140, %c0_i32_95 : i32
        %145 = arith.xori %143, %144 : i1
        %146 = arith.andi %145, %142 : i1
        %147 = arith.addi %141, %140 : i32
        %148 = arith.select %146, %147, %141 : i32
        %149 = arith.addi %22, %arg13 : i32
        %150 = arith.index_cast %149 : i32 to index
        %151 = memref.load %arg2[%150] : memref<128xi32, #tpu.memory_space<smem>>
        %c0_i32_96 = arith.constant 0 : i32
        %152 = tpu.memref_slice %arg3[%151, %c0_i32_96] : memref<1000x256xf32, #tpu.memory_space<any>> -> memref<1x256xf32, #tpu.memory_space<any>>
        %c0_i32_97 = arith.constant 0 : i32
        %153 = tpu.memref_slice %arg7[%arg13, %c0_i32_97] : memref<128x256xf32, #tpu.memory_space<vmem>> -> memref<1x256xf32, #tpu.memory_space<vmem>>
        %154 = tpu.memref_slice %arg12[%148] : memref<8x!tpu.dma_semaphore, #tpu.memory_space<semaphore_mem>> -> memref<1x!tpu.dma_semaphore, #tpu.memory_space<semaphore_mem>>
        %155 = tpu.memref_squeeze %154 : memref<1x!tpu.dma_semaphore, #tpu.memory_space<semaphore_mem>> -> memref<!tpu.dma_semaphore, #tpu.memory_space<semaphore_mem>>
        tpu.wait_dma2 semaphore(%155 : memref<!tpu.dma_semaphore, #tpu.memory_space<semaphore_mem>>) src(%152 : memref<1x256xf32, #tpu.memory_space<any>>) dst(%153 : memref<1x256xf32, #tpu.memory_space<vmem>>)
        %c8_i32_98 = arith.constant 8 : i32
        %156 = arith.addi %arg13, %c8_i32_98 : i32
        %c8_i32_99 = arith.constant 8 : i32
        %157 = arith.addi %arg13, %c8_i32_99 : i32
        %c8_i32_100 = arith.constant 8 : i32
        %c0_i32_101 = arith.constant 0 : i32
        %158 = arith.cmpi eq, %c8_i32_100, %c0_i32_101 : i32
        %c1_i32_102 = arith.constant 1 : i32
        %159 = arith.select %158, %c1_i32_102, %c8_i32_100 : i32
        %160 = arith.remsi %157, %159 : i32
        %c0_i32_103 = arith.constant 0 : i32
        %161 = arith.cmpi ne, %160, %c0_i32_103 : i32
        %c0_i32_104 = arith.constant 0 : i32
        %162 = arith.cmpi slt, %160, %c0_i32_104 : i32
        %c0_i32_105 = arith.constant 0 : i32
        %163 = arith.cmpi slt, %159, %c0_i32_105 : i32
        %164 = arith.xori %162, %163 : i1
        %165 = arith.andi %164, %161 : i1
        %166 = arith.addi %160, %159 : i32
        %167 = arith.select %165, %166, %160 : i32
        %168 = arith.addi %22, %156 : i32
        %169 = arith.index_cast %168 : i32 to index
        %170 = memref.load %arg2[%169] : memref<128xi32, #tpu.memory_space<smem>>
        %c0_i32_106 = arith.constant 0 : i32
        %171 = tpu.memref_slice %arg3[%170, %c0_i32_106] : memref<1000x256xf32, #tpu.memory_space<any>> -> memref<1x256xf32, #tpu.memory_space<any>>
        %c0_i32_107 = arith.constant 0 : i32
        %172 = tpu.memref_slice %arg7[%156, %c0_i32_107] : memref<128x256xf32, #tpu.memory_space<vmem>> -> memref<1x256xf32, #tpu.memory_space<vmem>>
        %173 = tpu.memref_slice %arg12[%167] : memref<8x!tpu.dma_semaphore, #tpu.memory_space<semaphore_mem>> -> memref<1x!tpu.dma_semaphore, #tpu.memory_space<semaphore_mem>>
        %174 = tpu.memref_squeeze %173 : memref<1x!tpu.dma_semaphore, #tpu.memory_space<semaphore_mem>> -> memref<!tpu.dma_semaphore, #tpu.memory_space<semaphore_mem>>
        tpu.enqueue_dma source(%171 : memref<1x256xf32, #tpu.memory_space<any>>) target(%172 : memref<1x256xf32, #tpu.memory_space<vmem>>) target_semaphore(%174 : memref<!tpu.dma_semaphore, #tpu.memory_space<semaphore_mem>>)
      }
      %c120_i32_53 = arith.constant 120 : i32
      %c120_i32_54 = arith.constant 120 : i32
      %80 = arith.addi %22, %c120_i32_54 : i32
      %81 = arith.index_cast %80 : i32 to index
      %82 = memref.load %arg2[%81] : memref<128xi32, #tpu.memory_space<smem>>
      %c0_i32_55 = arith.constant 0 : i32
      %c0_i32_56 = arith.constant 0 : i32
      %83 = tpu.memref_slice %arg3[%82, %c0_i32_56] : memref<1000x256xf32, #tpu.memory_space<any>> -> memref<1x256xf32, #tpu.memory_space<any>>
      %c120_i32_57 = arith.constant 120 : i32
      %c0_i32_58 = arith.constant 0 : i32
      %84 = tpu.memref_slice %arg7[%c120_i32_57, %c0_i32_58] : memref<128x256xf32, #tpu.memory_space<vmem>> -> memref<1x256xf32, #tpu.memory_space<vmem>>
      %85 = tpu.memref_slice %arg12[%c0_i32_55] : memref<8x!tpu.dma_semaphore, #tpu.memory_space<semaphore_mem>> -> memref<1x!tpu.dma_semaphore, #tpu.memory_space<semaphore_mem>>
      %86 = tpu.memref_squeeze %85 : memref<1x!tpu.dma_semaphore, #tpu.memory_space<semaphore_mem>> -> memref<!tpu.dma_semaphore, #tpu.memory_space<semaphore_mem>>
      tpu.wait_dma2 semaphore(%86 : memref<!tpu.dma_semaphore, #tpu.memory_space<semaphore_mem>>) src(%83 : memref<1x256xf32, #tpu.memory_space<any>>) dst(%84 : memref<1x256xf32, #tpu.memory_space<vmem>>)
      %c121_i32 = arith.constant 121 : i32
      %87 = arith.addi %22, %c121_i32 : i32
      %88 = arith.index_cast %87 : i32 to index
      %89 = memref.load %arg2[%88] : memref<128xi32, #tpu.memory_space<smem>>
      %c1_i32_59 = arith.constant 1 : i32
      %c0_i32_60 = arith.constant 0 : i32
      %90 = tpu.memref_slice %arg3[%89, %c0_i32_60] : memref<1000x256xf32, #tpu.memory_space<any>> -> memref<1x256xf32, #tpu.memory_space<any>>
      %c121_i32_61 = arith.constant 121 : i32
      %c0_i32_62 = arith.constant 0 : i32
      %91 = tpu.memref_slice %arg7[%c121_i32_61, %c0_i32_62] : memref<128x256xf32, #tpu.memory_space<vmem>> -> memref<1x256xf32, #tpu.memory_space<vmem>>
      %92 = tpu.memref_slice %arg12[%c1_i32_59] : memref<8x!tpu.dma_semaphore, #tpu.memory_space<semaphore_mem>> -> memref<1x!tpu.dma_semaphore, #tpu.memory_space<semaphore_mem>>
      %93 = tpu.memref_squeeze %92 : memref<1x!tpu.dma_semaphore, #tpu.memory_space<semaphore_mem>> -> memref<!tpu.dma_semaphore, #tpu.memory_space<semaphore_mem>>
      tpu.wait_dma2 semaphore(%93 : memref<!tpu.dma_semaphore, #tpu.memory_space<semaphore_mem>>) src(%90 : memref<1x256xf32, #tpu.memory_space<any>>) dst(%91 : memref<1x256xf32, #tpu.memory_space<vmem>>)
      %c122_i32 = arith.constant 122 : i32
      %94 = arith.addi %22, %c122_i32 : i32
      %95 = arith.index_cast %94 : i32 to index
      %96 = memref.load %arg2[%95] : memref<128xi32, #tpu.memory_space<smem>>
      %c2_i32_63 = arith.constant 2 : i32
      %c0_i32_64 = arith.constant 0 : i32
      %97 = tpu.memref_slice %arg3[%96, %c0_i32_64] : memref<1000x256xf32, #tpu.memory_space<any>> -> memref<1x256xf32, #tpu.memory_space<any>>
      %c122_i32_65 = arith.constant 122 : i32
      %c0_i32_66 = arith.constant 0 : i32
      %98 = tpu.memref_slice %arg7[%c122_i32_65, %c0_i32_66] : memref<128x256xf32, #tpu.memory_space<vmem>> -> memref<1x256xf32, #tpu.memory_space<vmem>>
      %99 = tpu.memref_slice %arg12[%c2_i32_63] : memref<8x!tpu.dma_semaphore, #tpu.memory_space<semaphore_mem>> -> memref<1x!tpu.dma_semaphore, #tpu.memory_space<semaphore_mem>>
      %100 = tpu.memref_squeeze %99 : memref<1x!tpu.dma_semaphore, #tpu.memory_space<semaphore_mem>> -> memref<!tpu.dma_semaphore, #tpu.memory_space<semaphore_mem>>
      tpu.wait_dma2 semaphore(%100 : memref<!tpu.dma_semaphore, #tpu.memory_space<semaphore_mem>>) src(%97 : memref<1x256xf32, #tpu.memory_space<any>>) dst(%98 : memref<1x256xf32, #tpu.memory_space<vmem>>)
      %c123_i32 = arith.constant 123 : i32
      %101 = arith.addi %22, %c123_i32 : i32
      %102 = arith.index_cast %101 : i32 to index
      %103 = memref.load %arg2[%102] : memref<128xi32, #tpu.memory_space<smem>>
      %c3_i32_67 = arith.constant 3 : i32
      %c0_i32_68 = arith.constant 0 : i32
      %104 = tpu.memref_slice %arg3[%103, %c0_i32_68] : memref<1000x256xf32, #tpu.memory_space<any>> -> memref<1x256xf32, #tpu.memory_space<any>>
      %c123_i32_69 = arith.constant 123 : i32
      %c0_i32_70 = arith.constant 0 : i32
      %105 = tpu.memref_slice %arg7[%c123_i32_69, %c0_i32_70] : memref<128x256xf32, #tpu.memory_space<vmem>> -> memref<1x256xf32, #tpu.memory_space<vmem>>
      %106 = tpu.memref_slice %arg12[%c3_i32_67] : memref<8x!tpu.dma_semaphore, #tpu.memory_space<semaphore_mem>> -> memref<1x!tpu.dma_semaphore, #tpu.memory_space<semaphore_mem>>
      %107 = tpu.memref_squeeze %106 : memref<1x!tpu.dma_semaphore, #tpu.memory_space<semaphore_mem>> -> memref<!tpu.dma_semaphore, #tpu.memory_space<semaphore_mem>>
      tpu.wait_dma2 semaphore(%107 : memref<!tpu.dma_semaphore, #tpu.memory_space<semaphore_mem>>) src(%104 : memref<1x256xf32, #tpu.memory_space<any>>) dst(%105 : memref<1x256xf32, #tpu.memory_space<vmem>>)
      %c124_i32 = arith.constant 124 : i32
      %108 = arith.addi %22, %c124_i32 : i32
      %109 = arith.index_cast %108 : i32 to index
      %110 = memref.load %arg2[%109] : memref<128xi32, #tpu.memory_space<smem>>
      %c4_i32_71 = arith.constant 4 : i32
      %c0_i32_72 = arith.constant 0 : i32
      %111 = tpu.memref_slice %arg3[%110, %c0_i32_72] : memref<1000x256xf32, #tpu.memory_space<any>> -> memref<1x256xf32, #tpu.memory_space<any>>
      %c124_i32_73 = arith.constant 124 : i32
      %c0_i32_74 = arith.constant 0 : i32
      %112 = tpu.memref_slice %arg7[%c124_i32_73, %c0_i32_74] : memref<128x256xf32, #tpu.memory_space<vmem>> -> memref<1x256xf32, #tpu.memory_space<vmem>>
      %113 = tpu.memref_slice %arg12[%c4_i32_71] : memref<8x!tpu.dma_semaphore, #tpu.memory_space<semaphore_mem>> -> memref<1x!tpu.dma_semaphore, #tpu.memory_space<semaphore_mem>>
      %114 = tpu.memref_squeeze %113 : memref<1x!tpu.dma_semaphore, #tpu.memory_space<semaphore_mem>> -> memref<!tpu.dma_semaphore, #tpu.memory_space<semaphore_mem>>
      tpu.wait_dma2 semaphore(%114 : memref<!tpu.dma_semaphore, #tpu.memory_space<semaphore_mem>>) src(%111 : memref<1x256xf32, #tpu.memory_space<any>>) dst(%112 : memref<1x256xf32, #tpu.memory_space<vmem>>)
      %c125_i32 = arith.constant 125 : i32
      %115 = arith.addi %22, %c125_i32 : i32
      %116 = arith.index_cast %115 : i32 to index
      %117 = memref.load %arg2[%116] : memref<128xi32, #tpu.memory_space<smem>>
      %c5_i32_75 = arith.constant 5 : i32
      %c0_i32_76 = arith.constant 0 : i32
      %118 = tpu.memref_slice %arg3[%117, %c0_i32_76] : memref<1000x256xf32, #tpu.memory_space<any>> -> memref<1x256xf32, #tpu.memory_space<any>>
      %c125_i32_77 = arith.constant 125 : i32
      %c0_i32_78 = arith.constant 0 : i32
      %119 = tpu.memref_slice %arg7[%c125_i32_77, %c0_i32_78] : memref<128x256xf32, #tpu.memory_space<vmem>> -> memref<1x256xf32, #tpu.memory_space<vmem>>
      %120 = tpu.memref_slice %arg12[%c5_i32_75] : memref<8x!tpu.dma_semaphore, #tpu.memory_space<semaphore_mem>> -> memref<1x!tpu.dma_semaphore, #tpu.memory_space<semaphore_mem>>
      %121 = tpu.memref_squeeze %120 : memref<1x!tpu.dma_semaphore, #tpu.memory_space<semaphore_mem>> -> memref<!tpu.dma_semaphore, #tpu.memory_space<semaphore_mem>>
      tpu.wait_dma2 semaphore(%121 : memref<!tpu.dma_semaphore, #tpu.memory_space<semaphore_mem>>) src(%118 : memref<1x256xf32, #tpu.memory_space<any>>) dst(%119 : memref<1x256xf32, #tpu.memory_space<vmem>>)
      %c126_i32 = arith.constant 126 : i32
      %122 = arith.addi %22, %c126_i32 : i32
      %123 = arith.index_cast %122 : i32 to index
      %124 = memref.load %arg2[%123] : memref<128xi32, #tpu.memory_space<smem>>
      %c6_i32_79 = arith.constant 6 : i32
      %c0_i32_80 = arith.constant 0 : i32
      %125 = tpu.memref_slice %arg3[%124, %c0_i32_80] : memref<1000x256xf32, #tpu.memory_space<any>> -> memref<1x256xf32, #tpu.memory_space<any>>
      %c126_i32_81 = arith.constant 126 : i32
      %c0_i32_82 = arith.constant 0 : i32
      %126 = tpu.memref_slice %arg7[%c126_i32_81, %c0_i32_82] : memref<128x256xf32, #tpu.memory_space<vmem>> -> memref<1x256xf32, #tpu.memory_space<vmem>>
      %127 = tpu.memref_slice %arg12[%c6_i32_79] : memref<8x!tpu.dma_semaphore, #tpu.memory_space<semaphore_mem>> -> memref<1x!tpu.dma_semaphore, #tpu.memory_space<semaphore_mem>>
      %128 = tpu.memref_squeeze %127 : memref<1x!tpu.dma_semaphore, #tpu.memory_space<semaphore_mem>> -> memref<!tpu.dma_semaphore, #tpu.memory_space<semaphore_mem>>
      tpu.wait_dma2 semaphore(%128 : memref<!tpu.dma_semaphore, #tpu.memory_space<semaphore_mem>>) src(%125 : memref<1x256xf32, #tpu.memory_space<any>>) dst(%126 : memref<1x256xf32, #tpu.memory_space<vmem>>)
      %c127_i32 = arith.constant 127 : i32
      %129 = arith.addi %22, %c127_i32 : i32
      %130 = arith.index_cast %129 : i32 to index
      %131 = memref.load %arg2[%130] : memref<128xi32, #tpu.memory_space<smem>>
      %c7_i32_83 = arith.constant 7 : i32
      %c0_i32_84 = arith.constant 0 : i32
      %132 = tpu.memref_slice %arg3[%131, %c0_i32_84] : memref<1000x256xf32, #tpu.memory_space<any>> -> memref<1x256xf32, #tpu.memory_space<any>>
      %c127_i32_85 = arith.constant 127 : i32
      %c0_i32_86 = arith.constant 0 : i32
      %133 = tpu.memref_slice %arg7[%c127_i32_85, %c0_i32_86] : memref<128x256xf32, #tpu.memory_space<vmem>> -> memref<1x256xf32, #tpu.memory_space<vmem>>
      %134 = tpu.memref_slice %arg12[%c7_i32_83] : memref<8x!tpu.dma_semaphore, #tpu.memory_space<semaphore_mem>> -> memref<1x!tpu.dma_semaphore, #tpu.memory_space<semaphore_mem>>
      %135 = tpu.memref_squeeze %134 : memref<1x!tpu.dma_semaphore, #tpu.memory_space<semaphore_mem>> -> memref<!tpu.dma_semaphore, #tpu.memory_space<semaphore_mem>>
      tpu.wait_dma2 semaphore(%135 : memref<!tpu.dma_semaphore, #tpu.memory_space<semaphore_mem>>) src(%132 : memref<1x256xf32, #tpu.memory_space<any>>) dst(%133 : memref<1x256xf32, #tpu.memory_space<vmem>>)
      %c0_87 = arith.constant 0 : index
      %c0_88 = arith.constant 0 : index
      %136 = vector.load %arg7[%c0_87, %c0_88] : memref<128x256xf32, #tpu.memory_space<vmem>>, vector<128x256xf32>
      %137 = arith.truncf %136 : vector<128x256xf32> to vector<128x256xbf16>
      %c0_89 = arith.constant 0 : index
      %c0_90 = arith.constant 0 : index
      %138 = vector.load %arg8[%c0_89, %c0_90] : memref<128x256xbf16, #tpu.memory_space<vmem>>, vector<128x256xbf16>
      tpu.vector_store %arg8[%c0_89, %c0_90], %137 {strides = array<i32>} : memref<128x256xbf16, #tpu.memory_space<vmem>>, vector<128x256xbf16>,
    } else {
    }
    %c0 = arith.constant 0 : index
    %c0_1 = arith.constant 0 : index
    %3 = vector.load %arg8[%c0, %c0_1] : memref<128x256xbf16, #tpu.memory_space<vmem>>, vector<128x256xbf16>
    %c0_2 = arith.constant 0 : index
    %c0_3 = arith.constant 0 : index
    %4 = vector.load %arg4[%c0_2, %c0_3] : memref<256x512xbf16, #tpu.memory_space<vmem>>, vector<256x512xbf16>
    %cst = arith.constant dense<0.000000e+00> : vector<128x512xf32>
    %5 = tpu.matmul %3, %4, %cst {dimension_numbers = #tpu.dot_dimension_numbers<[1], [0], [0], [1], [0, 0, 1, 1], [], []>} : vector<128x256xbf16>, vector<256x512xbf16>, vector<128x512xf32> -> vector<128x512xf32>
    %c0_4 = arith.constant 0 : index
    %c0_5 = arith.constant 0 : index
    %6 = vector.load %arg5[%c0_4, %c0_5] : memref<1x512xf32, #tpu.memory_space<vmem>>, vector<1x512xf32>
    %7 = vector.broadcast %6 : vector<1x512xf32> to vector<128x512xf32>
    %8 = arith.addf %5, %7 : vector<128x512xf32>
    %c2_i32 = arith.constant 2 : i32
    %9 = arith.cmpi slt, %arg1, %c2_i32 : i32
    %10 = arith.extui %9 : i1 to i32
    %c0_i32_6 = arith.constant 0 : i32
    %11 = arith.cmpi ne, %10, %c0_i32_6 : i32
    scf.if %11 {
      %c0_10 = arith.constant 0 : index
      %c0_11 = arith.constant 0 : index
      %18 = vector.load %arg9[%c0_10, %c0_11] : memref<128x1xf32, #tpu.memory_space<vmem>>, vector<128x1xf32>
      %cst_12 = arith.constant dense<0xFF800000> : vector<128xf32>
      %19 = vector.multi_reduction <maximumf>, %8, %cst_12 [1] : vector<128x512xf32> to vector<128xf32>
      %20 = vector.shape_cast %19 : vector<128xf32> to vector<128x1xf32>
      %21 = arith.maximumf %18, %20 : vector<128x1xf32>
      %c0_13 = arith.constant 0 : index
      %c0_14 = arith.constant 0 : index
      %22 = vector.load %arg9[%c0_13, %c0_14] : memref<128x1xf32, #tpu.memory_space<vmem>>, vector<128x1xf32>
      %23 = arith.subf %22, %21 : vector<128x1xf32>
      %24 = math.exp %23 : vector<128x1xf32>
      %c0_15 = arith.constant 0 : index
      %c0_16 = arith.constant 0 : index
      %25 = vector.load %arg10[%c0_15, %c0_16] : memref<128x1xf32, #tpu.memory_space<vmem>>, vector<128x1xf32>
      %26 = arith.mulf %24, %25 : vector<128x1xf32>
      %27 = vector.broadcast %21 : vector<128x1xf32> to vector<128x512xf32>
      %28 = arith.subf %8, %27 : vector<128x512xf32>
      %29 = math.exp %28 : vector<128x512xf32>
      %cst_17 = arith.constant dense<0.000000e+00> : vector<128xf32>
      %30 = vector.multi_reduction <add>, %29, %cst_17 [1] : vector<128x512xf32> to vector<128xf32>
      %31 = vector.shape_cast %30 : vector<128xf32> to vector<128x1xf32>
      %32 = arith.addf %26, %31 : vector<128x1xf32>
      %c0_18 = arith.constant 0 : index
      %c0_19 = arith.constant 0 : index
      %33 = vector.load %arg10[%c0_18, %c0_19] : memref<128x1xf32, #tpu.memory_space<vmem>>, vector<128x1xf32>
      tpu.vector_store %arg10[%c0_18, %c0_19], %32 {strides = array<i32>} : memref<128x1xf32, #tpu.memory_space<vmem>>, vector<128x1xf32>,
      %c0_20 = arith.constant 0 : index
      %c0_21 = arith.constant 0 : index
      %34 = vector.load %arg9[%c0_20, %c0_21] : memref<128x1xf32, #tpu.memory_space<vmem>>, vector<128x1xf32>
      tpu.vector_store %arg9[%c0_20, %c0_21], %21 {strides = array<i32>} : memref<128x1xf32, #tpu.memory_space<vmem>>, vector<128x1xf32>,
    } else {
    }
    %c1_i32 = arith.constant 1 : i32
    %12 = arith.cmpi eq, %arg1, %c1_i32 : i32
    %13 = arith.extui %12 : i1 to i32
    %c0_i32_7 = arith.constant 0 : i32
    %14 = arith.cmpi ne, %13, %c0_i32_7 : i32
    scf.if %14 {
      %c0_10 = arith.constant 0 : index
      %c0_11 = arith.constant 0 : index
      %18 = vector.load %arg9[%c0_10, %c0_11] : memref<128x1xf32, #tpu.memory_space<vmem>>, vector<128x1xf32>
      %c0_12 = arith.constant 0 : index
      %c0_13 = arith.constant 0 : index
      %19 = vector.load %arg10[%c0_12, %c0_13] : memref<128x1xf32, #tpu.memory_space<vmem>>, vector<128x1xf32>
      %20 = math.log %19 : vector<128x1xf32>
      %21 = arith.addf %18, %20 : vector<128x1xf32>
      %c0_14 = arith.constant 0 : index
      %c0_15 = arith.constant 0 : index
      %22 = vector.load %arg11[%c0_14, %c0_15] : memref<128x1xf32, #tpu.memory_space<vmem>>, vector<128x1xf32>
      tpu.vector_store %arg11[%c0_14, %c0_15], %21 {strides = array<i32>} : memref<128x1xf32, #tpu.memory_space<vmem>>, vector<128x1xf32>,
    } else {
    }
    %c2_i32_8 = arith.constant 2 : i32
    %15 = arith.cmpi sge, %arg1, %c2_i32_8 : i32
    %16 = arith.extui %15 : i1 to i32
    %c0_i32_9 = arith.constant 0 : i32
    %17 = arith.cmpi ne, %16, %c0_i32_9 : i32
    scf.if %17 {
      %c0_10 = arith.constant 0 : index
      %c0_11 = arith.constant 0 : index
      %18 = vector.load %arg11[%c0_10, %c0_11] : memref<128x1xf32, #tpu.memory_space<vmem>>, vector<128x1xf32>
      %19 = vector.broadcast %18 : vector<128x1xf32> to vector<128x512xf32>
      %20 = arith.subf %8, %19 : vector<128x512xf32>
      %c0_12 = arith.constant 0 : index
      %c0_13 = arith.constant 0 : index
      %21 = vector.load %arg6[%c0_12, %c0_13] : memref<128x512xf32, #tpu.memory_space<vmem>>, vector<128x512xf32>
      tpu.vector_store %arg6[%c0_12, %c0_13], %20 {strides = array<i32>} : memref<128x512xf32, #tpu.memory_space<vmem>>, vector<128x512xf32>,
    } else {
    }
    return
  }
  func.func @transform_1(%arg0: i32, %arg1: i32, %arg2: memref<128xi32, #tpu.memory_space<smem>>) -> (i32, i32) {
    %c2_i32 = arith.constant 2 : i32
    %c0_i32 = arith.constant 0 : i32
    %0 = arith.cmpi eq, %c2_i32, %c0_i32 : i32
    %c1_i32 = arith.constant 1 : i32
    %1 = arith.select %0, %c1_i32, %c2_i32 : i32
    %2 = arith.remsi %arg1, %1 : i32
    %c0_i32_0 = arith.constant 0 : i32
    %3 = arith.cmpi ne, %2, %c0_i32_0 : i32
    %c0_i32_1 = arith.constant 0 : i32
    %4 = arith.cmpi slt, %2, %c0_i32_1 : i32
    %c0_i32_2 = arith.constant 0 : i32
    %5 = arith.cmpi slt, %1, %c0_i32_2 : i32
    %6 = arith.xori %4, %5 : i1
    %7 = arith.andi %6, %3 : i1
    %8 = arith.addi %2, %1 : i32
    %9 = arith.select %7, %8, %2 : i32
    %c0_i32_3 = arith.constant 0 : i32
    %c0_i32_4 = arith.constant 0 : i32
    return %c0_i32_3, %9 : i32, i32
  }
  func.func @transform_2(%arg0: i32, %arg1: i32, %arg2: memref<128xi32, #tpu.memory_space<smem>>) -> (i32, i32) {
    %c2_i32 = arith.constant 2 : i32
    %c0_i32 = arith.constant 0 : i32
    %0 = arith.cmpi eq, %c2_i32, %c0_i32 : i32
    %c1_i32 = arith.constant 1 : i32
    %1 = arith.select %0, %c1_i32, %c2_i32 : i32
    %2 = arith.remsi %arg1, %1 : i32
    %c0_i32_0 = arith.constant 0 : i32
    %3 = arith.cmpi ne, %2, %c0_i32_0 : i32
    %c0_i32_1 = arith.constant 0 : i32
    %4 = arith.cmpi slt, %2, %c0_i32_1 : i32
    %c0_i32_2 = arith.constant 0 : i32
    %5 = arith.cmpi slt, %1, %c0_i32_2 : i32
    %6 = arith.xori %4, %5 : i1
    %7 = arith.andi %6, %3 : i1
    %8 = arith.addi %2, %1 : i32
    %9 = arith.select %7, %8, %2 : i32
    %c0_i32_3 = arith.constant 0 : i32
    %c0_i32_4 = arith.constant 0 : i32
    return %c0_i32_3, %9 : i32, i32
  }
  func.func @transform_3(%arg0: i32, %arg1: i32, %arg2: memref<128xi32, #tpu.memory_space<smem>>) -> (i32, i32) {
    %c2_i32 = arith.constant 2 : i32
    %0 = arith.subi %arg1, %c2_i32 : i32
    %c0_i32 = arith.constant 0 : i32
    %1 = arith.maxsi %0, %c0_i32 : i32
    %c0_i32_0 = arith.constant 0 : i32
    return %arg0, %1 : i32, i32
  }
}

</mosaic_0001>

<bundles_post_ra>
// kernel: tpu_custom_call.1
= control target key start
LH: loop header
LB: loop body
LE: loop exit
PB: predicated region body
PF: predicated region fallthrough
CT: control target
= control target key end

     0   :  { %s3627_s15 = smov [#allocation9]   ;;  %s5031_s0 = inlined_call_operand.hbm [shape: s32[128], index: 0, kind: input, shape index: {}]   ;;  %s5032_s1 = inlined_call_operand.hbm [shape: f32[1000,256], index: 1, kind: input, shape index: {}]   ;;  %s5033_s2 = inlined_call_operand.hbm [shape: bf16[256,1024], index: 2, kind: input, shape index: {}]   ;;  %s5034_s3 = inlined_call_operand.hbm [shape: f32[1,1024], index: 3, kind: input, shape index: {}]   ;;  %s5035_s4 = inlined_call_operand.hbm [shape: f32[128,1024], index: 4, kind: output, shape index: {}]  }
   0x1   :  { %5127 = sst [smem:[#allocation126_spill]] %s5033_s2 }
   0x2   :  { %5128 = sst [smem:[#allocation127_spill]] %s5034_s3 }
   0x3   :  { %5129 = sst [smem:[#allocation128_spill]] %s5035_s4 }
   0x4   :  { %10 = dma.hbm_to_smem %s5031_s0, 16, %s3627_s15, [#allocation8] }
   0x5   :  { %3555 = dma.done.wait [#allocation8], 16 }
   0x6   :  { %3556 = vsyncadd [#allocation8], 4294967280 }
   0x7   :  { %12 = sfence }
   0x8   :  { %13 = vsyncpa [#allocation11], 0 }
   0x9   :  { %15 = vsyncpa [#allocation11 + $0x1], 0 }
   0xa   :  { %16 = vsyncpa [#allocation14], 0 }
   0xb   :  { %18 = vsyncpa [#allocation14 + $0x1], 0 }
   0xc   :  { %19 = vsyncpa [#allocation12], 0 }
   0xd   :  { %21 = vsyncpa [#allocation12 + $0x1], 0  ;;  %s3681_s18 = smov 0   ;;  %s3683_s19 = smov 0  }
   0xe   :  { %s3685_s20 = smov 0   ;;  %s3687_s21 = smov 0  }
   0xf   :  { %s3689_s22 = smov 0   ;;  %s3691_s0 = smov 0  }
  0x10   :  { %s3693_s23 = smov 0   ;;  %s3695_s24 = smov 0  }
  0x11   :  { %s3697_s25 = smov 0  }
  0x12 LB: > { %5130 = sst [smem:[#allocation38_spill]] %s3589_s18  ;;  %s2599_s26 = sadd.s32 4294967295, %s3621_s25   ;;  %s3621_s25 = sphi %s3697_s25, %s27_s25   ;;  %s3617_s24 = sphi %s3695_s24, %s5362_s24   ;;  %s3613_s23 = sphi %s3693_s23, %s5361_s23   ;;  %s3609_s0 = sphi %s3691_s0, %s5360_s0   ;;  %s3605_s22 = sphi %s3689_s22, %s5359_s22   ;;  %s3601_s21 = sphi %s3687_s21, %s5358_s21   ;;  %s3597_s20 = sphi %s3685_s20, %s5357_s20   ;;  %s3593_s19 = sphi %s3683_s19, %s5364_s19   ;;  %s3589_s18 = sphi %s3681_s18, %s5363_s18  }
  0x13   : > { %5131 = sst [smem:[#allocation39_spill]] %s3597_s20  ;;  %s2600_s27 = sadd.s32 4294967294, %s3621_s25  }
  0x14   : > { %5132 = sst [smem:[#allocation40_spill]] %s3605_s22  ;;  %s36_s28 = sadd.s32 1, %s3617_s24 }
  0x15   : > { %5133 = sst [smem:[#allocation41_spill]] %s3609_s0  ;;  %p37_p0 = scmp.ge.s32.totalorder %s36_s28, 4 }
  0x16   : > { %5134 = sst [smem:[#allocation42_spill]] %s3617_s24  ;;  %s44_s29 = ssub.s32 0, %s3617_s24 }
  0x17   : > { %5135 = sst [smem:[#allocation43_spill]] %s3621_s25  ;;  %s2601_s30 = smin.u32 %s3617_s24, %s44_s29 }
  0x18   : > { %s70_s5 = sadd.s32 1, %s3609_s0  ;;  %s5366_s28 = smov (%p37_p0, %s36_s28), 0 }
  0x19   : > { %5136 = sst [smem:[#allocation44_spill]] %s5366_s28  ;;  %s46_s6 = sand.u32 1, %s2601_s30  }
  0x1a   : > { %p77_p1 = scmp.ne.s32.totalorder %s3609_s0, %s3605_s22  ;;  %s56_s7 = ssub.s32 0, %s5366_s28 }
  0x1b   : > { %p78_p2 = scmp.eq.s32.totalorder %s3621_s25, 0  ;;  %p2603_p3 = scmp.lt.s32.totalorder %s46_s6, 0 }
  0x1c   : > { %s53_s8 = sadd.s32 2, %s46_s6  ;;  %s2604_s9 = smin.u32 %s56_s7, %s5366_s28 }
  0x1d   : > { %p3737_p4 = por %p78_p2, %p77_p1  ;;  %s5368_s8 = smov (!%p2603_p3, %s53_s8), %s46_s6 }
  0x1e   : > { %s58_s11 = sand.u32 1, %s2604_s9   ;;  %p83_p5 = scmp.ne.s32.totalorder %s3605_s22, %s3601_s21 }
  0x1f   : > { %p84_p6 = scmp.eq.s32.totalorder %s2599_s26, 0  ;;  %s2613_s13 = sadd.s32 4294967294, %s3617_s24 }
  0x20   : > { %p2606_p8 = scmp.lt.s32.totalorder %s58_s11, 0  ;;  %s65_s14 = sadd.s32 2, %s58_s11 }
  0x21   : > { %p3746_p7 = por %p84_p6, %p83_p5  ;;  %p144_p9 = scmp.gt.s32.totalorder %s2613_s13, 0 }
  0x22   : > { %s2614_s15 = sadd.s32 4294967294, %s5366_s28  ;;  %s5370_s14 = smov (!%p2606_p8, %s65_s14), %s58_s11 }
  0x23   : > { %s5138_s12 = scalar_select %p3746_p7, 1, 0 }
  0x24   : > { %s5372_s13 = smov (!%p144_p9, %s2613_s13), 0  ;;  %s67_s16 = ssub.s32 %s5368_s8, %s5370_s14 }
  0x25   : > { %p147_p10 = scmp.gt.s32.totalorder %s2614_s15, 0  ;;  %p68_p11 = scmp.eq.s32.totalorder %s67_s16, 0 }
  0x26   : > { %s154_s17 = sadd.s32 1, %s3597_s20  ;;  %p164_p12 = scmp.ne.s32.totalorder %s3597_s20, %s3593_s19 }
  0x27   : > { %s5374_s15 = smov (!%p147_p10, %s2614_s15), 0  ;;  %p165_p0 = scmp.eq.s32.totalorder %s2599_s26, 3 }
  0x28   : > { %s3755_s21 = scalar_select %p68_p11, %s3609_s0, %s70_s5  }
  0x29   : > { %s150_s29 = ssub.s32 %s5372_s13, %s5374_s15  ;;  %p170_p1 = scmp.ne.s32.totalorder %s3593_s19, %s3589_s18 }
  0x2a   : > { %5139 = sst [smem:[#allocation45_spill]] %s3755_s21  ;;  %p152_p13 = scmp.eq.s32.totalorder %s150_s29, 0 }
  0x2b   : > { %p171_p2 = scmp.eq.s32.totalorder %s2600_s27, 3  ;;  %p3768_p3 = por %p165_p0, %p164_p12 }
  0x2c   : > { %s3766_s30 = scalar_select %p152_p13, %s3597_s20, %s154_s17  }
  0x2d   : > { %s5141_s6 = scalar_select %p3768_p3, 1, 0 }
  0x2e   : > { %5140 = sst [smem:[#allocation46_spill]] %s3766_s30  ;;  %p3772_p5 = por %p171_p2, %p170_p1 }
  0x2f   : > { %p2815_p6 = scmp.lt.s32.totalorder %s3621_s25, 4  ;;  %s3778_s5 = sand.u32 1, %s3609_s0  }
  0x30   : > { %s5142_s7 = scalar_select %p3772_p5, 1, 0 }
  0x31   : > { %s2779_s9 = sshll.u32 %s5368_s8, 8  ;;  %s2617_s26 = sshll.u32 %s3778_s5, 9 }
  0x32   : > { %5143 = sst [smem:[#allocation47_spill]] %s5142_s7  ;;  %s195_s14 = scalar_lea.vmem [#allocation10], %s2617_s26 }
  0x33   : > { %s5144_s2 = sld [smem:[#allocation126_spill]]  ;;  %s214_s15 = sshll.u32 %s195_s14, 4  ;;  %s3793_s15 = int_to_ptr.vmem [resolvable:$true] %s214_s15 }
  0x34   : > { %p3789_p8 = pnand %p2815_p6, %p3737_p4  ;;  %s192_s17 = scalar_lea.sflag [#allocation11], %s3778_s5 }
  0x36   : > { %p3237_p11 = pneg %p3789_p8 }
  0x39   : > { %s3785_s27 = scalar_lea.hbm %s5144_s2, %s2779_s9 }
  0x3a   : > { %s3235_s29 = scalar_lea.hbm %s3785_s27, 8192  ;;  %p3241_p4 = scmp.lt.s32.totalorder %s3785_s27, %s5144_s2 }
  0x3b   : > { %p3236_p10 = scmp.ne.s32.totalorder %s3785_s27, %s3235_s29 }
  0x3d   : > { %p3238_p12 = pnand %p3237_p11, %p3236_p10 }
  0x3f   : > { %p3239_p13 = pneg %p3238_p12 }
  0x41   : > { %p3244_p0 = pnand %p3241_p4, %p3239_p13 }
  0x43   : > { %3247 = shalt.err (!%p3244_p0)
}
  0x44   : > { %s3248_s26 = scalar_lea.vmem %s3793_s15, 8192  ;;  %s3628_s11 = smov [#allocation10]  }
  0x45   : > { %p3249_p1 = scmp.ne.s32.totalorder %s3793_s15, %s3248_s26  ;;  %s3253_s13 = sshll.u32 %s3628_s11, 4  ;;  %s3254_s13 = int_to_ptr.vmem [resolvable:$false] %s3253_s13 }
  0x46   : > { %s3255_s14 = scalar_lea.vmem %s3254_s13, 16384  ;;  %p3256_p10 = scmp.lt.s32.totalorder %s3793_s15, %s3254_s13 }
  0x47   : > { %p3251_p2 = pnand %p3249_p1, %p3237_p11  ;;  %p3257_p12 = scmp.lt.s32.totalorder %s3255_s14, %s3248_s26 }
  0x49   : > { %p3252_p6 = pneg %p3251_p2  ;;  %p3258_p9 = por %p3257_p12, %p3256_p10 }
  0x4b   : > { %p3259_p5 = pnand %p3258_p9, %p3252_p6 }
  0x4d   : > { %3262 = shalt.err (!%p3259_p5)
}
  0x4e   : > { %s3629_s29 = smov 512   ;;  %s3630_s9 = smov 256  }
  0x4f   : > { %s3631_s10 = smov 16   ;;  %p253_p13 = scmp.lt.s32.totalorder %s3621_s25, 5 }
  0x50   : > { %2807 = dma.hbm_to_vmem [thread:$0]  (!%p3789_p8), %s3785_s27, 8192, %s3793_s15, %s192_s17, %s3629_s29, %s3630_s9, %s3631_s10  }
  0x51   : > { %s2623_s26 = sshll.u32 %s3778_s5, 2  ;;  %s2780_s11 = sshll.u32 %s5368_s8, 6 }
  0x52   : > { %p5146_p5 = scmp.ge.s32.totalorder %s3621_s25, 1  ;;  %s5148_s3 = sld [smem:[#allocation127_spill]] }
  0x53   : > { %s228_s24 = scalar_lea.vmem [#allocation13], %s2623_s26  ;;  %s225_s27 = scalar_lea.sflag [#allocation14], %s3778_s5 }
  0x54   : > { %p3825_p9 = pnand %p5146_p5, %p253_p13  ;;  %s248_s21 = sshll.u32 %s228_s24, 4  ;;  %s249_s21 = int_to_ptr.vmem [resolvable:$true] %s248_s21 }
  0x56   : > { %s5147_s13 = scalar_select %p3825_p9, 1, 0 }
  0x58   : > { %s3832_s28 = scalar_lea.hbm %s5148_s3, %s2780_s11  ;;  %s3268_s29 = scalar_lea.hbm %s5148_s3, 128 }
  0x59   : > { %s3263_s15 = scalar_lea.hbm %s3832_s28, 64  ;;  %p3269_p2 = scmp.lt.s32.totalorder %s3832_s28, %s5148_s3 }
  0x5a   : > { %p3264_p4 = scmp.ne.s32.totalorder %s3832_s28, %s3263_s15  ;;  %p3270_p6 = scmp.lt.s32.totalorder %s3268_s29, %s3263_s15 }
  0x5c   : > { %p3266_p0 = pnand %p3264_p4, %p3237_p11  ;;  %p3271_p10 = por %p3270_p6, %p3269_p2 }
  0x5e   : > { %p3267_p1 = pneg %p3266_p0 }
  0x60   : > { %p3272_p12 = pnand %p3271_p10, %p3267_p1 }
  0x62   : > { %3275 = shalt.err (!%p3272_p12)
}
  0x63   : > { %s3276_s24 = scalar_lea.vmem %s249_s21, 64  ;;  %s3632_s5 = smov [#allocation13]  }
  0x64   : > { %p3277_p13 = scmp.ne.s32.totalorder %s249_s21, %s3276_s24  ;;  %s3281_s10 = sshll.u32 %s3632_s5, 4  ;;  %s3282_s10 = int_to_ptr.vmem [resolvable:$false] %s3281_s10 }
  0x65   : > { %s3283_s26 = scalar_lea.vmem %s3282_s10, 128  ;;  %p3284_p0 = scmp.lt.s32.totalorder %s249_s21, %s3282_s10 }
  0x66   : > { %p3279_p5 = pnand %p3277_p13, %p3237_p11  ;;  %p3285_p3 = scmp.lt.s32.totalorder %s3283_s26, %s3276_s24 }
  0x68   : > { %p3280_p4 = pneg %p3279_p5  ;;  %p3286_p7 = por %p3285_p3, %p3284_p0 }
  0x6a   : > { %p3287_p9 = pnand %p3286_p7, %p3280_p4 }
  0x6c   : > { %3290 = shalt.err (!%p3287_p9)
}
  0x6d   : > { %2810 = dma.hbm_to_vmem [thread:$0]  (!%p3789_p8), %s3832_s28, 64, %s249_s21, %s225_s27  }
  0x6e   : > { %p5149_p1 = scmp.ne.s32.totalorder %s5147_s13, 0 }
  0x70   : > { %257 = sbr.rel (%p5149_p1) target bundleno = 1449 (0x5a9), region = 28 }
  0x75   : > { %s259_s11 = sand.u32 1, %s3605_s22   ;;  %p5150_p11 = scmp.ne.s32.totalorder %s5138_s12, 0 }
  0x76   : > { %s2630_s14 = sshll.u32 %s259_s11, 9  ;;  %s260_s15 = scalar_lea.sflag [#allocation11], %s259_s11 }
  0x77   : > { %s3856_s8 = scalar_lea.vmem [#allocation10], %s2630_s14 }
  0x78   : > { %3558 = dma.done.wait (%p5150_p11), %s260_s15, 8192  }
  0x79   : > { %3560 = vsyncadd (%p5150_p11), %s260_s15, 4294959104  ;;  %s2631_s17 = sshll.u32 %s259_s11, 2  ;;  %s269_s16 = scalar_lea.sflag [#allocation14], %s259_s11 }
  0x7a   : > { %s3862_s29 = scalar_lea.vmem [#allocation13], %s2631_s17 }
  0x7b   : > { %3562 = dma.done.wait (%p5150_p11), %s269_s16, 64  }
  0x7c   : > { %3564 = vsyncadd (%p5150_p11), %s269_s16, 4294967232  ;;  %s5040_s28 = sand.u32 1, %s3593_s19   ;;  %p2633_p7 = scmp.ne.s32.totalorder %s3613_s23, 0 }
  0x7d   : > { %s2632_s21 = sshll.u32 %s5040_s28, 9  ;;  %s3874_s27 = sld [smem:[#allocation9]] (!%p2633_p7) }
  0x7e   : > { %s3871_s13 = scalar_lea.vmem [#allocation15], %s2632_s21  ;;  %332 = sbr.rel (%p2633_p7) target bundleno = 392 (0x188), region = 40 }
  0x7f   : > { %s3633_s2 = smov (!%p2633_p7), [#allocation2]   ;;  %s3910_s12 = sld [smem:[#allocation9 + $0x1]] (!%p2633_p7) }
  0x80   : > { %s375_s9 = sshll.u32 (!%p2633_p7), %s3633_s2, 4  ;;  %s3636_s24 = smov (!%p2633_p7), [#allocation2 + $0x1]   ;;  %s3892_s9 = int_to_ptr.vmem [resolvable:$true] %s375_s9 }
  0x81   : > { %s390_s5 = sshll.u32 (!%p2633_p7), %s3636_s24, 4  ;;  %s3912_s10 = sld [smem:[#allocation9 + $0x2]] (!%p2633_p7)  ;;  %s3914_s5 = int_to_ptr.vmem [resolvable:$true] %s390_s5 }
  0x82   : > { %s3637_s15 = smov (!%p2633_p7), [#allocation2 + $0x2]   ;;  %s3928_s7 = scalar_lea.hbm (!%p2633_p7), %s5032_s1, 32000 }
  0x83   : > { %vm333_vm0 = vcmask 7168   ;;  %v3634_v0 = vmov -1e+30   ;;  %v3635_v1 = vmov 0.0   ;;  %s368_s26 = sshrl.u32 %s3874_s27, 3  ;;  %s369_s11 = sand.u32 7, %s3874_s27  }
  0x84   : > { %334 = vst.msk [vmem:[#allocation4] sm:$0xff] %vm333_vm0, %v3634_v0  ;;  %335 = vst.msk [vmem:[#allocation4 + $0x8] sm:$0xff] %vm333_vm0, %v3634_v0  ;;  %s2634_s14 = sshll.u32 %s368_s26, 4  ;;  %s405_s17 = sshll.u32 %s3637_s15, 4  ;;  %s3918_s17 = int_to_ptr.vmem [resolvable:$true] %s405_s17 }
  0x85   : > { %336 = vst.msk [vmem:[#allocation4 + $0x10] sm:$0xff] %vm333_vm0, %v3634_v0  ;;  %337 = vst.msk [vmem:[#allocation4 + $0x18] sm:$0xff] %vm333_vm0, %v3634_v0  ;;  %s371_s16 = sadd.s32 %s2634_s14, %s369_s11  ;;  %s381_s2 = sshrl.u32 %s3910_s12, 3 }
  0x86   : > { %338 = vst.msk [vmem:[#allocation4 + $0x20] sm:$0xff] %vm333_vm0, %v3634_v0  ;;  %339 = vst.msk [vmem:[#allocation4 + $0x28] sm:$0xff] %vm333_vm0, %v3634_v0  ;;  %s2635_s21 = sshll.u32 %s371_s16, 4  ;;  %s382_s22 = sand.u32 7, %s3910_s12  }
  0x87   : > { %340 = vst.msk [vmem:[#allocation4 + $0x30] sm:$0xff] %vm333_vm0, %v3634_v0  ;;  %341 = vst.msk [vmem:[#allocation4 + $0x38] sm:$0xff] %vm333_vm0, %v3634_v0  ;;  %s373_s0 = scalar_lea.hbm %s5032_s1, %s2635_s21 }
  0x88   : > { %342 = vst.msk [vmem:[#allocation4 + $0x40] sm:$0xff] %vm333_vm0, %v3634_v0  ;;  %343 = vst.msk [vmem:[#allocation4 + $0x48] sm:$0xff] %vm333_vm0, %v3634_v0  ;;  %s3291_s24 = scalar_lea.hbm %s373_s0, 32  ;;  %p3294_p8 = scmp.lt.s32.totalorder %s373_s0, %s5032_s1 }
  0x89   : > { %344 = vst.msk [vmem:[#allocation4 + $0x50] sm:$0xff] %vm333_vm0, %v3634_v0  ;;  %345 = vst.msk [vmem:[#allocation4 + $0x58] sm:$0xff] %vm333_vm0, %v3634_v0  ;;  %p3292_p3 = scmp.ne.s32.totalorder %s373_s0, %s3291_s24  ;;  %p3295_p9 = scmp.lt.s32.totalorder %s3928_s7, %s3291_s24 }
  0x8a   : > { %346 = vst.msk [vmem:[#allocation4 + $0x60] sm:$0xff] %vm333_vm0, %v3634_v0  ;;  %347 = vst.msk [vmem:[#allocation4 + $0x68] sm:$0xff] %vm333_vm0, %v3634_v0 }
  0x8b   : > { %348 = vst.msk [vmem:[#allocation4 + $0x70] sm:$0xff] %vm333_vm0, %v3634_v0  ;;  %349 = vst.msk [vmem:[#allocation4 + $0x78] sm:$0xff] %vm333_vm0, %v3634_v0  ;;  %p3296_p2 = por %p3295_p9, %p3294_p8 }
  0x8c   : > { %350 = vst.msk [vmem:[#allocation5] sm:$0xff] %vm333_vm0, %v3635_v1  ;;  %351 = vst.msk [vmem:[#allocation5 + $0x8] sm:$0xff] %vm333_vm0, %v3635_v1 }
  0x8d   : > { %352 = vst.msk [vmem:[#allocation5 + $0x10] sm:$0xff] %vm333_vm0, %v3635_v1  ;;  %353 = vst.msk [vmem:[#allocation5 + $0x18] sm:$0xff] %vm333_vm0, %v3635_v1  ;;  %p3297_p6 = pnand %p3296_p2, %p3292_p3 }
  0x8e   : > { %354 = vst.msk [vmem:[#allocation5 + $0x20] sm:$0xff] %vm333_vm0, %v3635_v1  ;;  %355 = vst.msk [vmem:[#allocation5 + $0x28] sm:$0xff] %vm333_vm0, %v3635_v1 }
  0x8f   : > { %356 = vst.msk [vmem:[#allocation5 + $0x30] sm:$0xff] %vm333_vm0, %v3635_v1  ;;  %357 = vst.msk [vmem:[#allocation5 + $0x38] sm:$0xff] %vm333_vm0, %v3635_v1 }
  0x90   : > { %358 = vst.msk [vmem:[#allocation5 + $0x40] sm:$0xff] %vm333_vm0, %v3635_v1  ;;  %359 = vst.msk [vmem:[#allocation5 + $0x48] sm:$0xff] %vm333_vm0, %v3635_v1 }
  0x91   : > { %360 = vst.msk [vmem:[#allocation5 + $0x50] sm:$0xff] %vm333_vm0, %v3635_v1  ;;  %361 = vst.msk [vmem:[#allocation5 + $0x58] sm:$0xff] %vm333_vm0, %v3635_v1 }
  0x92   : > { %362 = vst.msk [vmem:[#allocation5 + $0x60] sm:$0xff] %vm333_vm0, %v3635_v1  ;;  %363 = vst.msk [vmem:[#allocation5 + $0x68] sm:$0xff] %vm333_vm0, %v3635_v1 }
  0x93   : > { %364 = vst.msk [vmem:[#allocation5 + $0x70] sm:$0xff] %vm333_vm0, %v3635_v1  ;;  %365 = vst.msk [vmem:[#allocation5 + $0x78] sm:$0xff] %vm333_vm0, %v3635_v1 }
  0x94   : > { %3300 = shalt.err (!%p3297_p6)  }
  0x95   : > { %s3301_s3 = scalar_lea.vmem %s3892_s9, 32  ;;  %s3937_s28 = scalar_lea.vmem %s3892_s9, 4096 }
  0x96   : > { %p3302_p10 = scmp.ne.s32.totalorder %s3892_s9, %s3301_s3  ;;  %p3306_p12 = scmp.lt.s32.totalorder %s3892_s9, %s3892_s9 }
  0x97   : > { %p3307_p13 = scmp.lt.s32.totalorder %s3937_s28, %s3301_s3 }
  0x99   : > { %p3308_p5 = por %p3307_p13, %p3306_p12 }
  0x9b   : > { %p3309_p4 = pnand %p3308_p5, %p3302_p10 }
  0x9d   : > { %3312 = shalt.err (!%p3309_p4)  }
  0x9e   : > { %s3638_s20 = smov 128   ;;  %s3639_s30 = smov 1  }
  0x9f   : > { %378 = dma.hbm_to_vmem [thread:$0]  %s373_s0, 32, %s3892_s9, [#allocation7], %s3638_s20, %s3638_s20, %s3639_s30 }
  0xa0   : > { %s2637_s12 = sshll.u32 %s381_s2, 4  ;;  %s396_s11 = sshrl.u32 %s3912_s10, 3 }
  0xa1   : > { %s384_s14 = sadd.s32 %s2637_s12, %s382_s22  ;;  %s397_s15 = sand.u32 7, %s3912_s10  }
  0xa2   : > { %s2638_s16 = sshll.u32 %s384_s14, 4  ;;  %s2640_s21 = sshll.u32 %s396_s11, 4 }
  0xa3   : > { %s386_s26 = scalar_lea.hbm %s5032_s1, %s2638_s16  ;;  %s399_s3 = sadd.s32 %s2640_s21, %s397_s15 }
  0xa4   : > { %s3313_s18 = scalar_lea.hbm %s386_s26, 32  ;;  %p3316_p1 = scmp.lt.s32.totalorder %s386_s26, %s5032_s1 }
  0xa5   : > { %p3314_p0 = scmp.ne.s32.totalorder %s386_s26, %s3313_s18  ;;  %p3317_p11 = scmp.lt.s32.totalorder %s3928_s7, %s3313_s18 }
  0xa7   : > { %p3318_p7 = por %p3317_p11, %p3316_p1 }
  0xa9   : > { %p3319_p3 = pnand %p3318_p7, %p3314_p0 }
  0xab   : > { %3322 = shalt.err (!%p3319_p3)  }
  0xac   : > { %s3323_s22 = scalar_lea.vmem %s3914_s5, 32  ;;  %p3328_p9 = scmp.lt.s32.totalorder %s3914_s5, %s3892_s9 }
  0xad   : > { %p3324_p8 = scmp.ne.s32.totalorder %s3914_s5, %s3323_s22  ;;  %p3329_p2 = scmp.lt.s32.totalorder %s3937_s28, %s3323_s22 }
  0xaf   : > { %p3330_p6 = por %p3329_p2, %p3328_p9 }
  0xb1   : > { %p3331_p10 = pnand %p3330_p6, %p3324_p8 }
  0xb3   : > { %3334 = shalt.err (!%p3331_p10)  }
  0xb4   : > { %393 = dma.hbm_to_vmem [thread:$0]  %s386_s26, 32, %s3914_s5, [#allocation7 + $0x1], %s3638_s20, %s3638_s20, %s3639_s30 }
  0xb5   : > { %s2641_s4 = sshll.u32 %s399_s3, 4  ;;  %s3964_s18 = sld [smem:[#allocation9 + $0x3]] }
  0xb6   : > { %s401_s10 = scalar_lea.hbm %s5032_s1, %s2641_s4 }
  0xb7   : > { %s3335_s2 = scalar_lea.hbm %s401_s10, 32  ;;  %p3338_p13 = scmp.lt.s32.totalorder %s401_s10, %s5032_s1 }
  0xb8   : > { %p3336_p12 = scmp.ne.s32.totalorder %s401_s10, %s3335_s2  ;;  %p3339_p5 = scmp.lt.s32.totalorder %s3928_s7, %s3335_s2 }
  0xba   : > { %p3340_p4 = por %p3339_p5, %p3338_p13 }
  0xbc   : > { %p3341_p0 = pnand %p3340_p4, %p3336_p12 }
  0xbe   : > { %3344 = shalt.err (!%p3341_p0)  }
  0xbf   : > { %s3345_s5 = scalar_lea.vmem %s3918_s17, 32  ;;  %p3350_p11 = scmp.lt.s32.totalorder %s3918_s17, %s3892_s9 }
  0xc0   : > { %p3346_p1 = scmp.ne.s32.totalorder %s3918_s17, %s3345_s5  ;;  %p3351_p7 = scmp.lt.s32.totalorder %s3937_s28, %s3345_s5 }
  0xc2   : > { %p3352_p3 = por %p3351_p7, %p3350_p11 }
  0xc4   : > { %p3353_p8 = pnand %p3352_p3, %p3346_p1 }
  0xc6   : > { %3356 = shalt.err (!%p3353_p8)  }
  0xc7   : > { %408 = dma.hbm_to_vmem [thread:$0]  %s401_s10, 32, %s3918_s17, [#allocation7 + $0x2], %s3638_s20, %s3638_s20, %s3639_s30 }
  0xc8   : > { %s3640_s14 = smov [#allocation2 + $0x3]   ;;  %s3982_s16 = sld [smem:[#allocation9 + $0x4]] }
  0xc9   : > { %s420_s15 = sshll.u32 %s3640_s14, 4  ;;  %s3641_s21 = smov [#allocation2 + $0x4]   ;;  %s3984_s15 = int_to_ptr.vmem [resolvable:$true] %s420_s15 }
  0xca   : > { %s435_s24 = sshll.u32 %s3641_s21, 4  ;;  %s3986_s27 = sld [smem:[#allocation9 + $0x5]]  ;;  %s3990_s24 = int_to_ptr.vmem [resolvable:$true] %s435_s24 }
  0xcb   : > { %s411_s26 = sshrl.u32 %s3964_s18, 3  ;;  %s412_s3 = sand.u32 7, %s3964_s18  }
  0xcc   : > { %s2643_s22 = sshll.u32 %s411_s26, 4 }
  0xcd   : > { %s414_s4 = sadd.s32 %s2643_s22, %s412_s3 }
  0xce   : > { %s2644_s17 = sshll.u32 %s414_s4, 4  ;;  %s426_s0 = sshrl.u32 %s3982_s16, 3 }
  0xcf   : > { %s416_s2 = scalar_lea.hbm %s5032_s1, %s2644_s17  ;;  %s427_s12 = sand.u32 7, %s3982_s16  }
  0xd0   : > { %s3357_s11 = scalar_lea.hbm %s416_s2, 32  ;;  %p3360_p2 = scmp.lt.s32.totalorder %s416_s2, %s5032_s1 }
  0xd1   : > { %p3358_p9 = scmp.ne.s32.totalorder %s416_s2, %s3357_s11  ;;  %p3361_p6 = scmp.lt.s32.totalorder %s3928_s7, %s3357_s11 }
  0xd3   : > { %p3362_p10 = por %p3361_p6, %p3360_p2 }
  0xd5   : > { %p3363_p12 = pnand %p3362_p10, %p3358_p9 }
  0xd7   : > { %3366 = shalt.err (!%p3363_p12)  }
  0xd8   : > { %s3367_s18 = scalar_lea.vmem %s3984_s15, 32  ;;  %p3372_p5 = scmp.lt.s32.totalorder %s3984_s15, %s3892_s9 }
  0xd9   : > { %p3368_p13 = scmp.ne.s32.totalorder %s3984_s15, %s3367_s18  ;;  %p3373_p4 = scmp.lt.s32.totalorder %s3937_s28, %s3367_s18 }
  0xdb   : > { %p3374_p0 = por %p3373_p4, %p3372_p5 }
  0xdd   : > { %p3375_p1 = pnand %p3374_p0, %p3368_p13 }
  0xdf   : > { %3378 = shalt.err (!%p3375_p1)  }
  0xe0   : > { %423 = dma.hbm_to_vmem [thread:$0]  %s416_s2, 32, %s3984_s15, [#allocation7 + $0x3], %s3638_s20, %s3638_s20, %s3639_s30 }
  0xe1   : > { %s2646_s16 = sshll.u32 %s426_s0, 4  ;;  %s441_s21 = sshrl.u32 %s3986_s27, 3 }
  0xe2   : > { %s429_s26 = sadd.s32 %s2646_s16, %s427_s12  ;;  %s442_s3 = sand.u32 7, %s3986_s27  }
  0xe3   : > { %s2647_s22 = sshll.u32 %s429_s26, 4  ;;  %s2649_s4 = sshll.u32 %s441_s21, 4 }
  0xe4   : > { %s431_s10 = scalar_lea.hbm %s5032_s1, %s2647_s22  ;;  %s444_s11 = sadd.s32 %s2649_s4, %s442_s3 }
  0xe5   : > { %s3379_s5 = scalar_lea.hbm %s431_s10, 32  ;;  %p3382_p7 = scmp.lt.s32.totalorder %s431_s10, %s5032_s1 }
  0xe6   : > { %p3380_p11 = scmp.ne.s32.totalorder %s431_s10, %s3379_s5  ;;  %p3383_p3 = scmp.lt.s32.totalorder %s3928_s7, %s3379_s5 }
  0xe8   : > { %p3384_p8 = por %p3383_p3, %p3382_p7 }
  0xea   : > { %p3385_p9 = pnand %p3384_p8, %p3380_p11 }
  0xec   : > { %3388 = shalt.err (!%p3385_p9)  }
  0xed   : > { %s3389_s15 = scalar_lea.vmem %s3990_s24, 32  ;;  %p3394_p6 = scmp.lt.s32.totalorder %s3990_s24, %s3892_s9 }
  0xee   : > { %p3390_p2 = scmp.ne.s32.totalorder %s3990_s24, %s3389_s15  ;;  %p3395_p10 = scmp.lt.s32.totalorder %s3937_s28, %s3389_s15 }
  0xf0   : > { %p3396_p12 = por %p3395_p10, %p3394_p6 }
  0xf2   : > { %p3397_p13 = pnand %p3396_p12, %p3390_p2 }
  0xf4   : > { %3400 = shalt.err (!%p3397_p13)  }
  0xf5   : > { %438 = dma.hbm_to_vmem [thread:$0]  %s431_s10, 32, %s3990_s24, [#allocation7 + $0x4], %s3638_s20, %s3638_s20, %s3639_s30 }
  0xf6   : > { %s2650_s27 = sshll.u32 %s444_s11, 4  ;;  %s3642_s0 = smov [#allocation2 + $0x5]  }
  0xf7   : > { %s450_s2 = sshll.u32 %s3642_s0, 4  ;;  %s446_s21 = scalar_lea.hbm %s5032_s1, %s2650_s27  ;;  %s451_s2 = int_to_ptr.vmem [resolvable:$true] %s450_s2 }
  0xf8   : > { %s3401_s26 = scalar_lea.hbm %s446_s21, 32  ;;  %p3404_p4 = scmp.lt.s32.totalorder %s446_s21, %s5032_s1 }
  0xf9   : > { %p3402_p5 = scmp.ne.s32.totalorder %s446_s21, %s3401_s26  ;;  %p3405_p0 = scmp.lt.s32.totalorder %s3928_s7, %s3401_s26 }
  0xfb   : > { %p3406_p1 = por %p3405_p0, %p3404_p4 }
  0xfd   : > { %p3407_p11 = pnand %p3406_p1, %p3402_p5 }
  0xff   : > { %3410 = shalt.err (!%p3407_p11)  }
 0x100   : > { %s3411_s4 = scalar_lea.vmem %s451_s2, 32  ;;  %p3416_p3 = scmp.lt.s32.totalorder %s451_s2, %s3892_s9 }
 0x101   : > { %p3412_p7 = scmp.ne.s32.totalorder %s451_s2, %s3411_s4  ;;  %p3417_p8 = scmp.lt.s32.totalorder %s3937_s28, %s3411_s4 }
 0x103   : > { %p3418_p9 = por %p3417_p8, %p3416_p3 }
 0x105   : > { %p3419_p2 = pnand %p3418_p9, %p3412_p7 }
 0x107   : > { %3422 = shalt.err (!%p3419_p2)  }
 0x108   : > { %453 = dma.hbm_to_vmem [thread:$0]  %s446_s21, 32, %s451_s2, [#allocation7 + $0x5], %s3638_s20, %s3638_s20, %s3639_s30 }
 0x109   : > { %s2651_s24 = sld [smem:[#allocation9 + $0x6]]  ;;  %s3643_s25 = smov [#allocation2 + $0x6]  }
 0x10a   : > { %s2654_s17 = sld [smem:[#allocation9 + $0x7]]  ;;  %s465_s10 = sshll.u32 %s3643_s25, 4  ;;  %s4040_s10 = int_to_ptr.vmem [resolvable:$true] %s465_s10 }
 0x10b   : > { %s3644_s11 = smov [#allocation2 + $0x7]  }
 0x10c   : > { %s480_s5 = sshll.u32 %s3644_s11, 4  ;;  %s4042_s5 = int_to_ptr.vmem [resolvable:$true] %s480_s5 }
 0x10f   : > { %s456_s14 = sshrl.u32 %s2651_s24, 3  ;;  %s457_s18 = sand.u32 7, %s2651_s24  }
 0x110   : > { %s2652_s15 = sshll.u32 %s456_s14, 4  ;;  %s471_s27 = sshrl.u32 %s2654_s17, 3 }
 0x111   : > { %s459_s0 = sadd.s32 %s2652_s15, %s457_s18  ;;  %s472_s12 = sand.u32 7, %s2654_s17  }
 0x112   : > { %s2653_s16 = sshll.u32 %s459_s0, 4  ;;  %s2655_s26 = sshll.u32 %s471_s27, 4 }
 0x113   : > { %s461_s3 = scalar_lea.hbm %s5032_s1, %s2653_s16  ;;  %s474_s22 = sadd.s32 %s2655_s26, %s472_s12 }
 0x114   : > { %s3423_s4 = scalar_lea.hbm %s461_s3, 32  ;;  %p3426_p10 = scmp.lt.s32.totalorder %s461_s3, %s5032_s1 }
 0x115   : > { %p3424_p6 = scmp.ne.s32.totalorder %s461_s3, %s3423_s4  ;;  %p3427_p12 = scmp.lt.s32.totalorder %s3928_s7, %s3423_s4 }
 0x117   : > { %p3428_p13 = por %p3427_p12, %p3426_p10 }
 0x119   : > { %p3429_p5 = pnand %p3428_p13, %p3424_p6 }
 0x11b   : > { %3432 = shalt.err (!%p3429_p5)  }
 0x11c   : > { %s3433_s24 = scalar_lea.vmem %s4040_s10, 32  ;;  %p3438_p0 = scmp.lt.s32.totalorder %s4040_s10, %s3892_s9 }
 0x11d   : > { %p3434_p4 = scmp.ne.s32.totalorder %s4040_s10, %s3433_s24  ;;  %p3439_p1 = scmp.lt.s32.totalorder %s3937_s28, %s3433_s24 }
 0x11f   : > { %p3440_p11 = por %p3439_p1, %p3438_p0 }
 0x121   : > { %p3441_p7 = pnand %p3440_p11, %p3434_p4 }
 0x123   : > { %3444 = shalt.err (!%p3441_p7)  }
 0x124   : > { %468 = dma.hbm_to_vmem [thread:$0]  %s461_s3, 32, %s4040_s10, [#allocation7 + $0x6], %s3638_s20, %s3638_s20, %s3639_s30 }
 0x125   : > { %s2656_s17 = sshll.u32 %s474_s22, 4 }
 0x126   : > { %s476_s15 = scalar_lea.hbm %s5032_s1, %s2656_s17 }
 0x127   : > { %s3445_s27 = scalar_lea.hbm %s476_s15, 32  ;;  %p3448_p8 = scmp.lt.s32.totalorder %s476_s15, %s5032_s1 }
 0x128   : > { %p3446_p3 = scmp.ne.s32.totalorder %s476_s15, %s3445_s27  ;;  %p3449_p9 = scmp.lt.s32.totalorder %s3928_s7, %s3445_s27 }
 0x12a   : > { %p3450_p2 = por %p3449_p9, %p3448_p8 }
 0x12c   : > { %p3451_p6 = pnand %p3450_p2, %p3446_p3 }
 0x12e   : > { %3454 = shalt.err (!%p3451_p6)  }
 0x12f   : > { %s3455_s10 = scalar_lea.vmem %s4042_s5, 32  ;;  %p3460_p12 = scmp.lt.s32.totalorder %s4042_s5, %s3892_s9 }
 0x130   : > { %p3456_p10 = scmp.ne.s32.totalorder %s4042_s5, %s3455_s10  ;;  %p3461_p13 = scmp.lt.s32.totalorder %s3937_s28, %s3455_s10 }
 0x132   : > { %p3462_p5 = por %p3461_p13, %p3460_p12 }
 0x134   : > { %p3463_p4 = pnand %p3462_p5, %p3456_p10 }
 0x136   : > { %3466 = shalt.err (!%p3463_p4)  }
 0x137   : > { %483 = dma.hbm_to_vmem [thread:$0]  %s476_s15, 32, %s4042_s5, [#allocation7 + $0x7], %s3638_s20, %s3638_s20, %s3639_s30 }
 0x138   : > { %s4076_s16 = smov 0  }
 0x139 LB: >> { %p490_p0 = scmp.lt.s32.totalorder %s3625_s16, 0  ;;  %s491_s26 = ssub.s32 0, %s3625_s16  ;;  %s3625_s16 = sphi %s4076_s16, %s489_s16  }
 0x13a   : >> { %s2657_s2 = smin.u32 %s3625_s16, %s491_s26 }
 0x13b   : >> { %s493_s21 = sand.u32 7, %s2657_s2  }
 0x13c   : >> { %s494_s3 = ssub.s32 0, %s493_s21 }
 0x13d   : >> { %s5376_s3 = smov (!%p490_p0, %s494_s3), %s493_s21 }
 0x13e   : >> { %p2659_p1 = scmp.lt.s32.totalorder %s5376_s3, 0  ;;  %s500_s22 = sadd.s32 8, %s5376_s3 }
 0x140   : >> { %s5378_s22 = smov (!%p2659_p1, %s500_s22), %s5376_s3 }
 0x141   : >> { %s504_s20 = scalar_lea.sflag [#allocation7], %s5378_s22 }
 0x142   : >> { %3565 = dma.done.wait %s504_s20, 32 }
 0x143   : >> { %3566 = vsyncadd %s504_s20, 4294967264  ;;  %s508_s30 = sadd.s32 8, %s3625_s16 }
 0x144   : >> { %s522_s5 = sld [smem:[#allocation9 + %s508_s30]]  ;;  %p509_p11 = scmp.lt.s32.totalorder %s508_s30, 0 }
 0x145   : >> { %s510_s4 = ssub.s32 0, %s508_s30  ;;  %s529_s25 = sshrl.u32 %s508_s30, 3 }
 0x146   : >> { %s2660_s11 = smin.u32 %s510_s4, %s508_s30  ;;  %s530_s24 = sand.u32 7, %s508_s30  }
 0x147   : >> { %s512_s17 = sand.u32 7, %s2660_s11   ;;  %s2665_s14 = sshll.u32 %s529_s25, 4 }
 0x148   : >> { %s513_s18 = ssub.s32 0, %s512_s17  ;;  %s532_s15 = sadd.s32 %s2665_s14, %s530_s24 }
 0x149   : >> { %s5380_s18 = smov (!%p509_p11, %s513_s18), %s512_s17  ;;  %s533_s20 = scalar_lea.vmem [#allocation2], %s532_s15 }
 0x14a   : >> { %s523_s27 = sshrl.u32 %s522_s5, 3  ;;  %s524_s0 = sand.u32 7, %s522_s5  }
 0x14b   : >> { %s2663_s12 = sshll.u32 %s523_s27, 4  ;;  %p2662_p7 = scmp.lt.s32.totalorder %s5380_s18, 0 }
 0x14c   : >> { %s526_s10 = sadd.s32 %s2663_s12, %s524_s0  ;;  %s519_s26 = sadd.s32 8, %s5380_s18 }
 0x14d   : >> { %s2664_s2 = sshll.u32 %s526_s10, 4  ;;  %s536_s4 = sshll.u32 %s533_s20, 4  ;;  %s537_s4 = int_to_ptr.vmem [resolvable:$true] %s536_s4 }
 0x14e   : >> { %s528_s22 = scalar_lea.hbm %s5032_s1, %s2664_s2  ;;  %s5382_s26 = smov (!%p2662_p7, %s519_s26), %s5380_s18 }
 0x14f   : >> { %s534_s30 = scalar_lea.sflag [#allocation7], %s5382_s26  ;;  %s3467_s25 = scalar_lea.hbm %s528_s22, 32 }
 0x150   : >> { %p3468_p3 = scmp.ne.s32.totalorder %s528_s22, %s3467_s25  ;;  %p3470_p8 = scmp.lt.s32.totalorder %s528_s22, %s5032_s1 }
 0x151   : >> { %p3471_p9 = scmp.lt.s32.totalorder %s3928_s7, %s3467_s25 }
 0x153   : >> { %p3472_p2 = por %p3471_p9, %p3470_p8 }
 0x155   : >> { %p3473_p6 = pnand %p3472_p2, %p3468_p3 }
 0x157   : >> { %3476 = shalt.err (!%p3473_p6)  }
 0x158   : >> { %s3477_s5 = scalar_lea.vmem %s537_s4, 32  ;;  %p3482_p12 = scmp.lt.s32.totalorder %s537_s4, %s3892_s9 }
 0x159   : >> { %p3478_p10 = scmp.ne.s32.totalorder %s537_s4, %s3477_s5  ;;  %p3483_p13 = scmp.lt.s32.totalorder %s3937_s28, %s3477_s5 }
 0x15b   : >> { %p3484_p5 = por %p3483_p13, %p3482_p12 }
 0x15d   : >> { %p3485_p4 = pnand %p3484_p5, %p3478_p10 }
 0x15f   : >> { %3488 = shalt.err (!%p3485_p4)  }
 0x160   : >> { %s3645_s17 = smov 128   ;;  %s3646_s14 = smov 1  }
 0x161   : >> { %539 = dma.hbm_to_vmem [thread:$0]  %s528_s22, 32, %s537_s4, %s534_s30, %s3645_s17, %s3645_s17, %s3646_s14 }
 0x162   : >> { %s489_s16 = sadd.s32 1, %s3625_s16  }
 0x163   : >> { %p486_p0 = scmp.ge.s32.totalorder %s489_s16, 120  }
 0x165   : > { %488 = sbr.rel (!%p486_p0) target bundleno = 313 (0x139), region = 142 }
 0x16a   : > { %3567 = dma.done.wait [#allocation7], 32 }
 0x16b   : > { %3568 = vsyncadd [#allocation7], 4294967264 }
 0x16c   : > { %3569 = dma.done.wait [#allocation7 + $0x1], 32 }
 0x16d   : > { %3570 = vsyncadd [#allocation7 + $0x1], 4294967264 }
 0x16e   : > { %3571 = dma.done.wait [#allocation7 + $0x2], 32 }
 0x16f   : > { %3572 = vsyncadd [#allocation7 + $0x2], 4294967264 }
 0x170   : > { %3573 = dma.done.wait [#allocation7 + $0x3], 32 }
 0x171   : > { %3574 = vsyncadd [#allocation7 + $0x3], 4294967264 }
 0x172   : > { %3575 = dma.done.wait [#allocation7 + $0x4], 32 }
 0x173   : > { %3576 = vsyncadd [#allocation7 + $0x4], 4294967264 }
 0x174   : > { %3577 = dma.done.wait [#allocation7 + $0x5], 32 }
 0x175   : > { %3578 = vsyncadd [#allocation7 + $0x5], 4294967264 }
 0x176   : > { %3579 = dma.done.wait [#allocation7 + $0x6], 32 }
 0x177   : > { %3580 = vsyncadd [#allocation7 + $0x6], 4294967264 }
 0x178   : > { %3581 = dma.done.wait [#allocation7 + $0x7], 32 }
 0x179   : > { %3582 = vsyncadd [#allocation7 + $0x7], 4294967264  ;;  %v573_v2 = vld [vmem:[#allocation2] sm:$0xff]  ;;  %v574_v3 = vld [vmem:[#allocation2 + $0x8] sm:$0xff] }
 0x17a   : > { %v575_v4 = vld [vmem:[#allocation2 + $0x10] sm:$0xff]  ;;  %v2781_v5 = vpack.c.bf16 %v574_v3, %v573_v2  ;;  %v576_v6 = vld [vmem:[#allocation2 + $0x18] sm:$0xff]  ;;  %v577_v7 = vld [vmem:[#allocation2 + $0x20] sm:$0xff] }
 0x17b   : > { %v578_v8 = vld [vmem:[#allocation2 + $0x28] sm:$0xff]  ;;  %v2782_v9 = vpack.c.bf16 %v576_v6, %v575_v4  ;;  %v579_v11 = vld [vmem:[#allocation2 + $0x30] sm:$0xff]  ;;  %v580_v12 = vld [vmem:[#allocation2 + $0x38] sm:$0xff] }
 0x17c   : > { %v2783_v10 = vpack.c.bf16 %v578_v8, %v577_v7  ;;  %v581_v13 = vld [vmem:[#allocation2 + $0x40] sm:$0xff]  ;;  %701 = vst [vmem:[#allocation3 + $0x30] sm:$0xff] %v2781_v5  ;;  %v2784_v14 = vpack.c.bf16 %v580_v12, %v579_v11  ;;  %v582_v15 = vld [vmem:[#allocation2 + $0x48] sm:$0xff]  ;;  %v583_v16 = vld [vmem:[#allocation2 + $0x50] sm:$0xff] }
 0x17d   : > { %v584_v17 = vld [vmem:[#allocation2 + $0x58] sm:$0xff]  ;;  %702 = vst [vmem:[#allocation3] sm:$0xff] %v2782_v9  ;;  %v2785_v18 = vpack.c.bf16 %v582_v15, %v581_v13  ;;  %v585_v20 = vld [vmem:[#allocation2 + $0x60] sm:$0xff]  ;;  %v586_v21 = vld [vmem:[#allocation2 + $0x68] sm:$0xff] }
 0x17e   : > { %703 = vst [vmem:[#allocation3 + $0x58] sm:$0xff] %v2783_v10  ;;  %v2786_v19 = vpack.c.bf16 %v584_v17, %v583_v16  ;;  %v587_v22 = vld [vmem:[#allocation2 + $0x70] sm:$0xff]  ;;  %704 = vst [vmem:[#allocation3 + $0x18] sm:$0xff] %v2784_v14  ;;  %v2787_v23 = vpack.c.bf16 %v586_v21, %v585_v20  ;;  %v588_v24 = vld [vmem:[#allocation2 + $0x78] sm:$0xff] }
 0x17f   : > { %v589_v25 = vld [vmem:[#allocation2 + $0x80] sm:$0xff]  ;;  %v590_v26 = vld [vmem:[#allocation2 + $0x88] sm:$0xff]  ;;  %705 = vst [vmem:[#allocation3 + $0x50] sm:$0xff] %v2785_v18  ;;  %v2788_v27 = vpack.c.bf16 %v588_v24, %v587_v22  ;;  %v591_v29 = vld [vmem:[#allocation2 + $0x90] sm:$0xff] }
 0x180   : > { %706 = vst [vmem:[#allocation3 + $0x68] sm:$0xff] %v2786_v19  ;;  %v2789_v28 = vpack.c.bf16 %v590_v26, %v589_v25  ;;  %v592_v30 = vld [vmem:[#allocation2 + $0x98] sm:$0xff]  ;;  %v593_v31 = vld [vmem:[#allocation2 + $0xa0] sm:$0xff]  ;;  %707 = vst [vmem:[#allocation3 + $0x8] sm:$0xff] %v2787_v23 }
 0x181   : > { %v2790_v32 = vpack.c.bf16 %v592_v30, %v591_v29  ;;  %v594_v33 = vld [vmem:[#allocation2 + $0xa8] sm:$0xff]  ;;  %v595_v34 = vld [vmem:[#allocation2 + $0xb0] sm:$0xff]  ;;  %v596_v35 = vld [vmem:[#allocation2 + $0xb8] sm:$0xff]  ;;  %708 = vst [vmem:[#allocation3 + $0x48] sm:$0xff] %v2788_v27 }
 0x182   : > { %709 = vst [vmem:[#allocation3 + $0x40] sm:$0xff] %v2789_v28  ;;  %v2791_v36 = vpack.c.bf16 %v594_v33, %v593_v31  ;;  %v2792_v37 = vpack.c.bf16 %v596_v35, %v595_v34  ;;  %v597_v38 = vld [vmem:[#allocation2 + $0xc0] sm:$0xff]  ;;  %v598_v39 = vld [vmem:[#allocation2 + $0xc8] sm:$0xff]  ;;  %v599_v40 = vld [vmem:[#allocation2 + $0xd0] sm:$0xff] }
 0x183   : > { %710 = vst [vmem:[#allocation3 + $0x20] sm:$0xff] %v2790_v32  ;;  %v2793_v41 = vpack.c.bf16 %v598_v39, %v597_v38  ;;  %v600_v42 = vld [vmem:[#allocation2 + $0xd8] sm:$0xff]  ;;  %v601_v43 = vld [vmem:[#allocation2 + $0xe0] sm:$0xff]  ;;  %v602_v44 = vld [vmem:[#allocation2 + $0xe8] sm:$0xff] }
 0x184   : > { %711 = vst [vmem:[#allocation3 + $0x10] sm:$0xff] %v2791_v36  ;;  %712 = vst [vmem:[#allocation3 + $0x38] sm:$0xff] %v2792_v37  ;;  %v2794_v45 = vpack.c.bf16 %v600_v42, %v599_v40  ;;  %v2795_v46 = vpack.c.bf16 %v602_v44, %v601_v43  ;;  %v603_v47 = vld [vmem:[#allocation2 + $0xf0] sm:$0xff]  ;;  %v604_v48 = vld [vmem:[#allocation2 + $0xf8] sm:$0xff] }
 0x185   : > { %713 = vst [vmem:[#allocation3 + $0x60] sm:$0xff] %v2793_v41  ;;  %v2796_v49 = vpack.c.bf16 %v604_v48, %v603_v47 }
 0x186   : > { %714 = vst [vmem:[#allocation3 + $0x70] sm:$0xff] %v2794_v45  ;;  %715 = vst [vmem:[#allocation3 + $0x78] sm:$0xff] %v2795_v46 }
 0x187   : > { %716 = vst [vmem:[#allocation3 + $0x28] sm:$0xff] %v2796_v49 }
 0x188 PF: > { %v2920_v50 = vld [vmem:[%s3856_s8 + $0xe4] ss:$16 sps:$4 sm:$0xff]   ;;  %v2922_v51 = vld [vmem:[%s3856_s8 + $0xec] ss:$16 sps:$4 sm:$0xff]   ;;  %v2924_v52 = vld [vmem:[%s3856_s8 + $0xe0] ss:$16 sps:$4 sm:$0xff]  }
 0x189   : > { %1219 = vmatprep.subr.bf16.mxu0 %v2920_v50  ;;  %v2925_v53 = vld [vmem:[%s3856_s8 + $0xe8] ss:$16 sps:$4 sm:$0xff]   ;;  %1332 = vmatprep.subr.bf16.mxu1 %v2922_v51  ;;  %v2926_v54 = vld [vmem:[%s3856_s8 + $0xc4] ss:$16 sps:$4 sm:$0xff]   ;;  %v2928_v55 = vld [vmem:[%s3856_s8 + $0xcc] ss:$16 sps:$4 sm:$0xff]  }
 0x18a   : > { %1220 = vmatpush1.bf16.msra.mxu0 %v2924_v52  ;;  %1333 = vmatpush1.bf16.msra.mxu1 %v2925_v53  ;;  %v2930_v56 = vld [vmem:[%s3856_s8 + $0xc0] ss:$16 sps:$4 sm:$0xff]   ;;  %v2931_v57 = vld [vmem:[%s3856_s8 + $0xc8] ss:$16 sps:$4 sm:$0xff]   ;;  %v2932_v58 = vld [vmem:[%s3856_s8 + $0xa4] ss:$16 sps:$4 sm:$0xff]  }
 0x18b   : > { %1221 = vmatprep.subr.bf16.mxu0 %v2926_v54  ;;  %1334 = vmatprep.subr.bf16.mxu1 %v2928_v55  ;;  %v2934_v59 = vld [vmem:[%s3856_s8 + $0xac] ss:$16 sps:$4 sm:$0xff]   ;;  %v2936_v60 = vld [vmem:[%s3856_s8 + $0xa0] ss:$16 sps:$4 sm:$0xff]   ;;  %v2937_v61 = vld [vmem:[%s3856_s8 + $0xa8] ss:$16 sps:$4 sm:$0xff]  }
 0x18c   : > { %v2938_v62 = vld [vmem:[%s3856_s8 + $0x84] ss:$16 sps:$4 sm:$0xff]   ;;  %v2940_v63 = vld [vmem:[%s3856_s8 + $0x8c] ss:$16 sps:$4 sm:$0xff]   ;;  %v2942_v0 = vld [vmem:[%s3856_s8 + $0x80] ss:$16 sps:$4 sm:$0xff]  }
 0x18d   : > { %v2943_v1 = vld [vmem:[%s3856_s8 + $0x88] ss:$16 sps:$4 sm:$0xff]   ;;  %v2944_v2 = vld [vmem:[%s3856_s8 + $0x64] ss:$16 sps:$4 sm:$0xff]   ;;  %v2946_v3 = vld [vmem:[%s3856_s8 + $0x6c] ss:$16 sps:$4 sm:$0xff]  }
 0x18e   : > { %1222 = vmatpush1.bf16.msra.mxu0 %v2930_v56  ;;  %1335 = vmatpush1.bf16.msra.mxu1 %v2931_v57  ;;  %v2948_v4 = vld [vmem:[%s3856_s8 + $0x60] ss:$16 sps:$4 sm:$0xff]   ;;  %v2949_v5 = vld [vmem:[%s3856_s8 + $0x68] ss:$16 sps:$4 sm:$0xff]   ;;  %v2950_v6 = vld [vmem:[%s3856_s8 + $0x44] ss:$16 sps:$4 sm:$0xff]  }
 0x18f   : > { %1223 = vmatprep.subr.bf16.mxu0 %v2932_v58  ;;  %1336 = vmatprep.subr.bf16.mxu1 %v2934_v59  ;;  %v2952_v7 = vld [vmem:[%s3856_s8 + $0x4c] ss:$16 sps:$4 sm:$0xff]   ;;  %v2954_v8 = vld [vmem:[%s3856_s8 + $0x40] ss:$16 sps:$4 sm:$0xff]   ;;  %v2955_v9 = vld [vmem:[%s3856_s8 + $0x48] ss:$16 sps:$4 sm:$0xff]  }
 0x190   : > { %v2956_v10 = vld [vmem:[%s3856_s8 + $0x24] ss:$16 sps:$4 sm:$0xff]   ;;  %v2958_v11 = vld [vmem:[%s3856_s8 + $0x2c] ss:$16 sps:$4 sm:$0xff]   ;;  %v2960_v12 = vld [vmem:[%s3856_s8 + $0x20] ss:$16 sps:$4 sm:$0xff]  }
 0x191   : > { %v2961_v13 = vld [vmem:[%s3856_s8 + $0x28] ss:$16 sps:$4 sm:$0xff]   ;;  %v2962_v14 = vld [vmem:[%s3856_s8 + $0x4] ss:$16 sps:$4 sm:$0xff]   ;;  %v2964_v15 = vld [vmem:[%s3856_s8 + $0xc] ss:$16 sps:$4 sm:$0xff]  }
 0x192   : > { %1224 = vmatpush1.bf16.msra.mxu0 %v2936_v60  ;;  %1337 = vmatpush1.bf16.msra.mxu1 %v2937_v61  ;;  %v2966_v16 = vld [vmem:[%s3856_s8] ss:$16 sps:$4 sm:$0xff]   ;;  %v2967_v17 = vld [vmem:[%s3856_s8 + $0x8] ss:$16 sps:$4 sm:$0xff]   ;;  %v2968_v18 = vld [vmem:[%s3856_s8 + $0x1e4] ss:$16 sps:$4 sm:$0xff]  }
 0x193   : > { %1225 = vmatprep.subr.bf16.mxu0 %v2938_v62  ;;  %1338 = vmatprep.subr.bf16.mxu1 %v2940_v63  ;;  %v2970_v19 = vld [vmem:[%s3856_s8 + $0x1ec] ss:$16 sps:$4 sm:$0xff]   ;;  %v2972_v20 = vld [vmem:[%s3856_s8 + $0x1e0] ss:$16 sps:$4 sm:$0xff]   ;;  %v2973_v21 = vld [vmem:[%s3856_s8 + $0x1e8] ss:$16 sps:$4 sm:$0xff]  }
 0x194   : > { %v2974_v22 = vld [vmem:[%s3856_s8 + $0x1c4] ss:$16 sps:$4 sm:$0xff]   ;;  %v2976_v23 = vld [vmem:[%s3856_s8 + $0x1cc] ss:$16 sps:$4 sm:$0xff]   ;;  %v2978_v24 = vld [vmem:[%s3856_s8 + $0x1c0] ss:$16 sps:$4 sm:$0xff]  }
 0x195   : > { %v2979_v25 = vld [vmem:[%s3856_s8 + $0x1c8] ss:$16 sps:$4 sm:$0xff]   ;;  %v2980_v26 = vld [vmem:[%s3856_s8 + $0x1a4] ss:$16 sps:$4 sm:$0xff]   ;;  %v2982_v27 = vld [vmem:[%s3856_s8 + $0x1ac] ss:$16 sps:$4 sm:$0xff]  }
 0x196   : > { %1226 = vmatpush1.bf16.msra.mxu0 %v2942_v0  ;;  %1339 = vmatpush1.bf16.msra.mxu1 %v2943_v1  ;;  %v2984_v28 = vld [vmem:[%s3856_s8 + $0x1a0] ss:$16 sps:$4 sm:$0xff]   ;;  %v2985_v29 = vld [vmem:[%s3856_s8 + $0x1a8] ss:$16 sps:$4 sm:$0xff]   ;;  %v2986_v30 = vld [vmem:[%s3856_s8 + $0x184] ss:$16 sps:$4 sm:$0xff]  }
 0x197   : > { %1227 = vmatprep.subr.bf16.mxu0 %v2944_v2  ;;  %1340 = vmatprep.subr.bf16.mxu1 %v2946_v3  ;;  %v2988_v31 = vld [vmem:[%s3856_s8 + $0x18c] ss:$16 sps:$4 sm:$0xff]   ;;  %v3018_v32 = vld [vmem:[#allocation3 + $0x34] ss:$-48 sps:$4 sm:$0xff]   ;;  %v2990_v33 = vld [vmem:[%s3856_s8 + $0x180] ss:$16 sps:$4 sm:$0xff]  }
 0x198   : > { %v2991_v34 = vld [vmem:[%s3856_s8 + $0x188] ss:$16 sps:$4 sm:$0xff]   ;;  %v2992_v35 = vld [vmem:[%s3856_s8 + $0x164] ss:$16 sps:$4 sm:$0xff]   ;;  %v2994_v36 = vld [vmem:[%s3856_s8 + $0x16c] ss:$16 sps:$4 sm:$0xff]   ;;  %1251 = vmatprep.mubr.bf16.mxu0 %v3018_v32  ;;  %1364 = vmatprep.mubr.bf16.mxu1 %v3018_v32 }
 0x199   : > { %v2996_v37 = vld [vmem:[%s3856_s8 + $0x160] ss:$16 sps:$4 sm:$0xff]   ;;  %v2997_v38 = vld [vmem:[%s3856_s8 + $0x168] ss:$16 sps:$4 sm:$0xff]   ;;  %v2998_v39 = vld [vmem:[%s3856_s8 + $0x144] ss:$16 sps:$4 sm:$0xff]  }
 0x19a   : > { %1228 = vmatpush1.bf16.msra.mxu0 %v2948_v4  ;;  %1341 = vmatpush1.bf16.msra.mxu1 %v2949_v5  ;;  %v3000_v40 = vld [vmem:[%s3856_s8 + $0x14c] ss:$16 sps:$4 sm:$0xff]   ;;  %v3002_v41 = vld [vmem:[%s3856_s8 + $0x140] ss:$16 sps:$4 sm:$0xff]   ;;  %v3003_v42 = vld [vmem:[%s3856_s8 + $0x148] ss:$16 sps:$4 sm:$0xff]  }
 0x19b   : > { %1229 = vmatprep.subr.bf16.mxu0 %v2950_v6  ;;  %1342 = vmatprep.subr.bf16.mxu1 %v2952_v7  ;;  %v3004_v43 = vld [vmem:[%s3856_s8 + $0x124] ss:$16 sps:$4 sm:$0xff]   ;;  %v3006_v44 = vld [vmem:[%s3856_s8 + $0x12c] ss:$16 sps:$4 sm:$0xff]   ;;  %v3008_v45 = vld [vmem:[%s3856_s8 + $0x120] ss:$16 sps:$4 sm:$0xff]  }
 0x19c   : > { %v3009_v46 = vld [vmem:[%s3856_s8 + $0x128] ss:$16 sps:$4 sm:$0xff]   ;;  %v3010_v47 = vld [vmem:[%s3856_s8 + $0x104] ss:$16 sps:$4 sm:$0xff]   ;;  %v3012_v48 = vld [vmem:[%s3856_s8 + $0x10c] ss:$16 sps:$4 sm:$0xff]  }
 0x19d   : > { %v3014_v49 = vld [vmem:[%s3856_s8 + $0x100] ss:$16 sps:$4 sm:$0xff]   ;;  %v3015_v50 = vld [vmem:[%s3856_s8 + $0x108] ss:$16 sps:$4 sm:$0xff]   ;;  %v3019_v56 = vld [vmem:[#allocation3 + $0x54] ss:$24 sps:$4 sm:$0xff]  }
 0x19e   : > { %1230 = vmatpush1.bf16.msra.mxu0 %v2954_v8  ;;  %1343 = vmatpush1.bf16.msra.mxu1 %v2955_v9  ;;  %v719_v51 = vld [vmem:[#allocation3 + $0x58] sm:$0xff]  ;;  %v3016_v53 = vld [vmem:[#allocation3 + $0x30] ss:$-48 sps:$4 sm:$0xff]   ;;  %v723_v57 = vld [vmem:[#allocation3 + $0x8] sm:$0xff]  ;;  %v799_v8 = vlaneseq  ;;  %p2762_p1 = scmp.ge.s32.totalorder %s3613_s23, 2 }
 0x19f   : > { %1231 = vmatprep.subr.bf16.mxu0 %v2956_v10  ;;  %1344 = vmatprep.subr.bf16.mxu1 %v2958_v11  ;;  %v720_v52 = vld [vmem:[#allocation3 + $0x18] sm:$0xff]  ;;  %v724_v58 = vld [vmem:[#allocation3 + $0x48] sm:$0xff]  ;;  %v725_v61 = vld [vmem:[#allocation3 + $0x40] sm:$0xff] }
 0x1a0   : > { %v2685_v54 = vcombine.high %v719_v51, %v720_v52  ;;  %v2684_v55 = vcombine.low %v719_v51, %v720_v52  ;;  %v3021_v59 = vld [vmem:[#allocation3 + $0x50] ss:$24 sps:$4 sm:$0xff]   ;;  %v2689_v60 = vcombine.high %v723_v57, %v724_v58  ;;  %v726_v62 = vld [vmem:[#allocation3 + $0x20] sm:$0xff]  ;;  %v2688_v63 = vcombine.low %v723_v57, %v724_v58  ;;  %v3022_v2 = vld [vmem:[#allocation3 + $0x14] ss:$40 sps:$4 sm:$0xff]  }
 0x1a1   : > { %v2691_v0 = vcombine.high %v725_v61, %v726_v62  ;;  %v2690_v1 = vcombine.low %v725_v61, %v726_v62  ;;  %v3024_v3 = vld [vmem:[#allocation3 + $0x10] ss:$40 sps:$4 sm:$0xff]   ;;  %v3025_v4 = vld [vmem:[#allocation3 + $0x64] ss:$16 sps:$4 sm:$0xff]   ;;  %v3028_v6 = vld [vmem:[#allocation3 + $0x7c] ss:$-80 sps:$4 sm:$0xff]  }
 0x1a2   : > { %1232 = vmatpush1.bf16.msra.mxu0 %v2960_v12  ;;  %1345 = vmatpush1.bf16.msra.mxu1 %v2961_v13  ;;  %v3027_v5 = vld [vmem:[#allocation3 + $0x60] ss:$16 sps:$4 sm:$0xff]   ;;  %v3030_v7 = vld [vmem:[#allocation3 + $0x78] ss:$-80 sps:$4 sm:$0xff]   ;;  %v800_v9 = vshrl.u32 %v799_v8, 7 }
 0x1a3   : > { %1233 = vmatprep.subr.bf16.mxu0 %v2962_v14  ;;  %1346 = vmatprep.subr.bf16.mxu1 %v2964_v15  ;;  %v797_v12 = vld [vmem:[%s3862_s29] sm:$0xf] }
 0x1a4   : > { %v801_v10 = vsub.s32 0, %v800_v9  ;;  %v809_v11 = vsub.s32 2, %v800_v9  ;;  %v805_v13 = vsub.s32 1, %v800_v9  ;;  %v813_v14 = vsub.s32 3, %v800_v9 }
 0x1a6   : > { %1234 = vmatpush1.bf16.msra.mxu0 %v2966_v16  ;;  %1347 = vmatpush1.bf16.msra.mxu1 %v2967_v17  ;;  %v4162_v15 = vrot.slane %v797_v12, %v801_v10  ;;  %v4164_v16 = vrot.slane %v797_v12, %v809_v11  ;;  %v4166_v17 = vrot.slane %v797_v12, %v805_v13 }
 0x1a7   : > { %1235 = vmatprep.subr.bf16.mxu0 %v2968_v18  ;;  %1348 = vmatprep.subr.bf16.mxu1 %v2970_v19  ;;  %v4168_v18 = vrot.slane %v797_v12, %v813_v14 }
 0x1aa   : > { %1236 = vmatpush2.bf16.msra.mxu0 %v2972_v20  ;;  %1349 = vmatpush2.bf16.msra.mxu1 %v2973_v21 }
 0x1ab   : > { %1237 = vmatprep.subr.bf16.mxu0 %v2974_v22  ;;  %1350 = vmatprep.subr.bf16.mxu1 %v2976_v23 }
 0x1ae   : > { %1238 = vmatpush2.bf16.msra.mxu0 %v2978_v24  ;;  %1351 = vmatpush2.bf16.msra.mxu1 %v2979_v25 }
 0x1af   : > { %1239 = vmatprep.subr.bf16.mxu0 %v2980_v26  ;;  %1352 = vmatprep.subr.bf16.mxu1 %v2982_v27 }
 0x1b2   : > { %1240 = vmatpush2.bf16.msra.mxu0 %v2984_v28  ;;  %1353 = vmatpush2.bf16.msra.mxu1 %v2985_v29 }
 0x1b3   : > { %1241 = vmatprep.subr.bf16.mxu0 %v2986_v30  ;;  %1354 = vmatprep.subr.bf16.mxu1 %v2988_v31 }
 0x1b6   : > { %1242 = vmatpush2.bf16.msra.mxu0 %v2990_v33  ;;  %1355 = vmatpush2.bf16.msra.mxu1 %v2991_v34 }
 0x1b7   : > { %1243 = vmatprep.subr.bf16.mxu0 %v2992_v35  ;;  %1356 = vmatprep.subr.bf16.mxu1 %v2994_v36 }
 0x1ba   : > { %1244 = vmatpush2.bf16.msra.mxu0 %v2996_v37  ;;  %1357 = vmatpush2.bf16.msra.mxu1 %v2997_v38 }
 0x1bb   : > { %1245 = vmatprep.subr.bf16.mxu0 %v2998_v39  ;;  %1358 = vmatprep.subr.bf16.mxu1 %v3000_v40 }
 0x1be   : > { %1246 = vmatpush2.bf16.msra.mxu0 %v3002_v41  ;;  %1359 = vmatpush2.bf16.msra.mxu1 %v3003_v42 }
 0x1bf   : > { %1247 = vmatprep.subr.bf16.mxu0 %v3004_v43  ;;  %1360 = vmatprep.subr.bf16.mxu1 %v3006_v44 }
 0x1c2   : > { %1248 = vmatpush2.bf16.msra.mxu0 %v3008_v45  ;;  %1361 = vmatpush2.bf16.msra.mxu1 %v3009_v46 }
 0x1c3   : > { %1249 = vmatprep.subr.bf16.mxu0 %v3010_v47  ;;  %1362 = vmatprep.subr.bf16.mxu1 %v3012_v48 }
 0x1c6   : > { %1250 = vmatpush2.bf16.msra.mxu0 %v3014_v49  ;;  %1363 = vmatpush2.bf16.msra.mxu1 %v3015_v50 }
 0x1c9   : > { %1252 = vmatmul.mubr.bf16.vlgmr.msra.gmra.mxu0 %v3016_v53  ;;  %1365 = vmatmul.mubr.bf16.vlgmr.msra.gmra.mxu1 %v3016_v53 }
 0x1ca   : > { %1261 = vmatprep.mubr.bf16.mxu0 %v2685_v54  ;;  %1374 = vmatprep.mubr.bf16.mxu1 %v2685_v54 }
 0x1d1   : > { %1262 = vmatmul.mubr.bf16.gmra.mxu0 %v2684_v55  ;;  %1375 = vmatmul.mubr.bf16.gmra.mxu1 %v2684_v55 }
 0x1d2   : > { %1271 = vmatprep.mubr.bf16.mxu0 %v3019_v56  ;;  %1384 = vmatprep.mubr.bf16.mxu1 %v3019_v56 }
 0x1d9   : > { %1272 = vmatmul.mubr.bf16.gmra.mxu0 %v3021_v59  ;;  %1385 = vmatmul.mubr.bf16.gmra.mxu1 %v3021_v59 }
 0x1da   : > { %1281 = vmatprep.mubr.bf16.mxu0 %v2689_v60  ;;  %1394 = vmatprep.mubr.bf16.mxu1 %v2689_v60 }
 0x1e1   : > { %1282 = vmatmul.mubr.bf16.gmra.mxu0 %v2688_v63  ;;  %1395 = vmatmul.mubr.bf16.gmra.mxu1 %v2688_v63 }
 0x1e2   : > { %1291 = vmatprep.mubr.bf16.mxu0 %v2691_v0  ;;  %1404 = vmatprep.mubr.bf16.mxu1 %v2691_v0 }
 0x1e9   : > { %1292 = vmatmul.mubr.bf16.gmra.mxu0 %v2690_v1  ;;  %1405 = vmatmul.mubr.bf16.gmra.mxu1 %v2690_v1 }
 0x1ea   : > { %1301 = vmatprep.mubr.bf16.mxu0 %v3022_v2  ;;  %1414 = vmatprep.mubr.bf16.mxu1 %v3022_v2 }
 0x1f1   : > { %1302 = vmatmul.mubr.bf16.gmra.mxu0 %v3024_v3  ;;  %1415 = vmatmul.mubr.bf16.gmra.mxu1 %v3024_v3 }
 0x1f2   : > { %1311 = vmatprep.mubr.bf16.mxu0 %v3025_v4  ;;  %1424 = vmatprep.mubr.bf16.mxu1 %v3025_v4 }
 0x1f9   : > { %1312 = vmatmul.mubr.bf16.gmra.mxu0 %v3027_v5  ;;  %1425 = vmatmul.mubr.bf16.gmra.mxu1 %v3027_v5 }
 0x1fa   : > { %1321 = vmatprep.mubr.bf16.mxu0 %v3028_v6  ;;  %1434 = vmatprep.mubr.bf16.mxu1 %v3028_v6 }
 0x201   : > { %1322 = vmatmul.mubr.bf16.gmra.mxu0 %v3030_v7  ;;  %1435 = vmatmul.mubr.bf16.gmra.mxu1 %v3030_v7 }
 0x289   : > { %v1253_v19 = vpop.f32.mrf.mxu0  ;;  %v1366_v20 = vpop.f32.mrf.mxu1 }
 0x28a   : > { %v4171_v21 = vadd.f32 %v1253_v19, %v4162_v15  ;;  %v4174_v22 = vadd.f32 %v1366_v20, %v4164_v16 }
 0x28b   : > { %v1255_v23 = vpop.f32.mrf.mxu0  ;;  %v1368_v24 = vpop.f32.mrf.mxu1 }
 0x28c   : > { %5151 = vst [vmem:[#allocation48_spill] sm:$0xff] %v4171_v21  ;;  %5152 = vst [vmem:[#allocation49_spill] sm:$0xff] %v4174_v22  ;;  %v4177_v25 = vadd.f32 %v1255_v23, %v4166_v17  ;;  %v4180_v26 = vadd.f32 %v1368_v24, %v4168_v18 }
 0x28d   : > { %v1257_v27 = vpop.f32.mrf.mxu0  ;;  %v1370_v28 = vpop.f32.mrf.mxu1 }
 0x28e   : > { %5153 = vst [vmem:[#allocation50_spill] sm:$0xff] %v4177_v25  ;;  %v4183_v29 = vadd.f32 %v1257_v27, %v4162_v15  ;;  %v4186_v30 = vadd.f32 %v1370_v28, %v4164_v16 }
 0x28f   : > { %v1259_v31 = vpop.f32.mrf.mxu0  ;;  %v1372_v32 = vpop.f32.mrf.mxu1 }
 0x290   : > { %5154 = vst [vmem:[#allocation51_spill] sm:$0xff] %v4186_v30  ;;  %v4189_v33 = vadd.f32 %v1259_v31, %v4166_v17  ;;  %v4192_v34 = vadd.f32 %v1372_v32, %v4168_v18 }
 0x291   : > { %v1263_v35 = vpop.f32.mrf.mxu0  ;;  %v1376_v36 = vpop.f32.mrf.mxu1 }
 0x292   : > { %5155 = vst [vmem:[#allocation52_spill] sm:$0xff] %v4192_v34  ;;  %v4195_v37 = vadd.f32 %v1263_v35, %v4162_v15  ;;  %v4198_v38 = vadd.f32 %v1376_v36, %v4164_v16 }
 0x293   : > { %v1265_v39 = vpop.f32.mrf.mxu0  ;;  %v1378_v40 = vpop.f32.mrf.mxu1 }
 0x294   : > { %v4201_v41 = vadd.f32 %v1265_v39, %v4166_v17  ;;  %v4204_v42 = vadd.f32 %v1378_v40, %v4168_v18 }
 0x295   : > { %v1267_v43 = vpop.f32.mrf.mxu0  ;;  %v1380_v44 = vpop.f32.mrf.mxu1 }
 0x296   : > { %5156 = vst [vmem:[#allocation53_spill] sm:$0xff] %v4201_v41  ;;  %v4207_v45 = vadd.f32 %v1267_v43, %v4162_v15  ;;  %v4210_v46 = vadd.f32 %v1380_v44, %v4164_v16 }
 0x297   : > { %v1269_v47 = vpop.f32.mrf.mxu0  ;;  %v1382_v48 = vpop.f32.mrf.mxu1 }
 0x298   : > { %5157 = vst [vmem:[#allocation54_spill] sm:$0xff] %v4207_v45  ;;  %v4213_v49 = vadd.f32 %v1269_v47, %v4166_v17  ;;  %v4216_v50 = vadd.f32 %v1382_v48, %v4168_v18 }
 0x299   : > { %v1273_v51 = vpop.f32.mrf.mxu0  ;;  %v1386_v52 = vpop.f32.mrf.mxu1 }
 0x29a   : > { %5158 = vst [vmem:[#allocation55_spill] sm:$0xff] %v4213_v49  ;;  %v4219_v53 = vadd.f32 %v1273_v51, %v4162_v15  ;;  %v4222_v54 = vadd.f32 %v1386_v52, %v4164_v16 }
 0x29b   : > { %v1275_v55 = vpop.f32.mrf.mxu0  ;;  %v1388_v56 = vpop.f32.mrf.mxu1 }
 0x29c   : > { %5159 = vst [vmem:[#allocation56_spill] sm:$0xff] %v4219_v53  ;;  %5160 = vst [vmem:[#allocation57_spill] sm:$0xff] %v4222_v54  ;;  %v4225_v57 = vadd.f32 %v1275_v55, %v4166_v17  ;;  %v4228_v58 = vadd.f32 %v1388_v56, %v4168_v18 }
 0x29d   : > { %v1277_v59 = vpop.f32.mrf.mxu0  ;;  %v1390_v60 = vpop.f32.mrf.mxu1 }
 0x29e   : > { %5161 = vst [vmem:[#allocation58_spill] sm:$0xff] %v4225_v57  ;;  %5162 = vst [vmem:[#allocation59_spill] sm:$0xff] %v4228_v58  ;;  %v4231_v61 = vadd.f32 %v1277_v59, %v4162_v15  ;;  %v4234_v62 = vadd.f32 %v1390_v60, %v4164_v16 }
 0x29f   : > { %v1279_v63 = vpop.f32.mrf.mxu0  ;;  %v1392_v0 = vpop.f32.mrf.mxu1 }
 0x2a0   : > { %5163 = vst [vmem:[#allocation60_spill] sm:$0xff] %v4231_v61  ;;  %5164 = vst [vmem:[#allocation61_spill] sm:$0xff] %v4234_v62  ;;  %v4237_v1 = vadd.f32 %v1279_v63, %v4166_v17  ;;  %v4240_v2 = vadd.f32 %v1392_v0, %v4168_v18 }
 0x2a1   : > { %v1283_v3 = vpop.f32.mrf.mxu0  ;;  %v1396_v4 = vpop.f32.mrf.mxu1 }
 0x2a2   : > { %5165 = vst [vmem:[#allocation62_spill] sm:$0xff] %v4237_v1  ;;  %5166 = vst [vmem:[#allocation63_spill] sm:$0xff] %v4240_v2  ;;  %v4243_v5 = vadd.f32 %v1283_v3, %v4162_v15  ;;  %v4246_v6 = vadd.f32 %v1396_v4, %v4164_v16 }
 0x2a3   : > { %v1285_v7 = vpop.f32.mrf.mxu0  ;;  %v1398_v8 = vpop.f32.mrf.mxu1 }
 0x2a4   : > { %5167 = vst [vmem:[#allocation64_spill] sm:$0xff] %v4243_v5  ;;  %v4249_v9 = vadd.f32 %v1285_v7, %v4166_v17  ;;  %v4252_v10 = vadd.f32 %v1398_v8, %v4168_v18 }
 0x2a5   : > { %v1287_v11 = vpop.f32.mrf.mxu0  ;;  %v1400_v12 = vpop.f32.mrf.mxu1 }
 0x2a6   : > { %5168 = vst [vmem:[#allocation65_spill] sm:$0xff] %v4249_v9  ;;  %v4255_v13 = vadd.f32 %v1287_v11, %v4162_v15  ;;  %v4258_v14 = vadd.f32 %v1400_v12, %v4164_v16 }
 0x2a7   : > { %v1289_v19 = vpop.f32.mrf.mxu0  ;;  %v1402_v20 = vpop.f32.mrf.mxu1 }
 0x2a8   : > { %v4261_v23 = vadd.f32 %v1289_v19, %v4166_v17  ;;  %v4264_v24 = vadd.f32 %v1402_v20, %v4168_v18 }
 0x2a9   : > { %v1293_v27 = vpop.f32.mrf.mxu0  ;;  %v1406_v28 = vpop.f32.mrf.mxu1 }
 0x2aa   : > { %v4267_v31 = vadd.f32 %v1293_v27, %v4162_v15  ;;  %v4270_v32 = vadd.f32 %v1406_v28, %v4164_v16 }
 0x2ab   : > { %v1295_v35 = vpop.f32.mrf.mxu0  ;;  %v1408_v36 = vpop.f32.mrf.mxu1 }
 0x2ac   : > { %5169 = vst [vmem:[#allocation66_spill] sm:$0xff] %v4267_v31  ;;  %5170 = vst [vmem:[#allocation67_spill] sm:$0xff] %v4270_v32  ;;  %v4273_v39 = vadd.f32 %v1295_v35, %v4166_v17  ;;  %v4276_v40 = vadd.f32 %v1408_v36, %v4168_v18 }
 0x2ad   : > { %v1297_v43 = vpop.f32.mrf.mxu0  ;;  %v1410_v44 = vpop.f32.mrf.mxu1 }
 0x2ae   : > { %5171 = vst [vmem:[#allocation68_spill] sm:$0xff] %v4273_v39  ;;  %5172 = vst [vmem:[#allocation69_spill] sm:$0xff] %v4276_v40  ;;  %v4279_v47 = vadd.f32 %v1297_v43, %v4162_v15  ;;  %v4282_v48 = vadd.f32 %v1410_v44, %v4164_v16 }
 0x2af   : > { %v1299_v51 = vpop.f32.mrf.mxu0  ;;  %v1412_v52 = vpop.f32.mrf.mxu1 }
 0x2b0   : > { %5173 = vst [vmem:[#allocation70_spill] sm:$0xff] %v4279_v47  ;;  %5174 = vst [vmem:[#allocation71_spill] sm:$0xff] %v4282_v48  ;;  %v4285_v55 = vadd.f32 %v1299_v51, %v4166_v17  ;;  %v4288_v56 = vadd.f32 %v1412_v52, %v4168_v18 }
 0x2b1   : > { %v1303_v59 = vpop.f32.mrf.mxu0  ;;  %v1416_v60 = vpop.f32.mrf.mxu1 }
 0x2b2   : > { %5175 = vst [vmem:[#allocation72_spill] sm:$0xff] %v4285_v55  ;;  %5176 = vst [vmem:[#allocation73_spill] sm:$0xff] %v4288_v56  ;;  %v4291_v63 = vadd.f32 %v1303_v59, %v4162_v15  ;;  %v4294_v0 = vadd.f32 %v1416_v60, %v4164_v16 }
 0x2b3   : > { %v1305_v3 = vpop.f32.mrf.mxu0  ;;  %v1418_v4 = vpop.f32.mrf.mxu1 }
 0x2b4   : > { %5177 = vst [vmem:[#allocation74_spill] sm:$0xff] %v4291_v63  ;;  %5178 = vst [vmem:[#allocation75_spill] sm:$0xff] %v4294_v0  ;;  %v4297_v7 = vadd.f32 %v1305_v3, %v4166_v17  ;;  %v4300_v8 = vadd.f32 %v1418_v4, %v4168_v18 }
 0x2b5   : > { %v1307_v11 = vpop.f32.mrf.mxu0  ;;  %v1420_v12 = vpop.f32.mrf.mxu1 }
 0x2b6   : > { %5179 = vst [vmem:[#allocation76_spill] sm:$0xff] %v4297_v7  ;;  %5180 = vst [vmem:[#allocation77_spill] sm:$0xff] %v4300_v8  ;;  %v4303_v19 = vadd.f32 %v1307_v11, %v4162_v15  ;;  %v4306_v20 = vadd.f32 %v1420_v12, %v4164_v16 }
 0x2b7   : > { %v1309_v27 = vpop.f32.mrf.mxu0  ;;  %v1422_v28 = vpop.f32.mrf.mxu1 }
 0x2b8   : > { %5181 = vst [vmem:[#allocation78_spill] sm:$0xff] %v4303_v19  ;;  %5182 = vst [vmem:[#allocation79_spill] sm:$0xff] %v4306_v20  ;;  %v4309_v35 = vadd.f32 %v1309_v27, %v4166_v17  ;;  %v4312_v36 = vadd.f32 %v1422_v28, %v4168_v18 }
 0x2b9   : > { %v1313_v43 = vpop.f32.mrf.mxu0  ;;  %v1426_v44 = vpop.f32.mrf.mxu1 }
 0x2ba   : > { %5183 = vst [vmem:[#allocation80_spill] sm:$0xff] %v4309_v35  ;;  %5184 = vst [vmem:[#allocation81_spill] sm:$0xff] %v4312_v36  ;;  %v4315_v51 = vadd.f32 %v1313_v43, %v4162_v15  ;;  %v4318_v52 = vadd.f32 %v1426_v44, %v4164_v16 }
 0x2bb   : > { %v1315_v59 = vpop.f32.mrf.mxu0  ;;  %v1428_v60 = vpop.f32.mrf.mxu1 }
 0x2bc   : > { %5185 = vst [vmem:[#allocation82_spill] sm:$0xff] %v4315_v51  ;;  %5186 = vst [vmem:[#allocation83_spill] sm:$0xff] %v4318_v52  ;;  %v4321_v3 = vadd.f32 %v1315_v59, %v4166_v17  ;;  %v4324_v4 = vadd.f32 %v1428_v60, %v4168_v18 }
 0x2bd   : > { %v1317_v11 = vpop.f32.mrf.mxu0  ;;  %v1430_v12 = vpop.f32.mrf.mxu1 }
 0x2be   : > { %5187 = vst [vmem:[#allocation84_spill] sm:$0xff] %v4321_v3  ;;  %5188 = vst [vmem:[#allocation85_spill] sm:$0xff] %v4324_v4  ;;  %v4327_v27 = vadd.f32 %v1317_v11, %v4162_v15  ;;  %v4330_v28 = vadd.f32 %v1430_v12, %v4164_v16 }
 0x2bf   : > { %v1319_v43 = vpop.f32.mrf.mxu0  ;;  %v1432_v8 = vpop.f32.mrf.mxu1 }
 0x2c0   : > { %5189 = vst [vmem:[#allocation86_spill] sm:$0xff] %v4327_v27  ;;  %5190 = vst [vmem:[#allocation87_spill] sm:$0xff] %v4330_v28  ;;  %v4333_v44 = vadd.f32 %v1319_v43, %v4166_v17  ;;  %v4336_v52 = vadd.f32 %v1432_v8, %v4168_v18 }
 0x2c1   : > { %v1323_v59 = vpop.f32.mrf.mxu0  ;;  %v1436_v36 = vpop.f32.mrf.mxu1 }
 0x2c2   : > { %5191 = vst [vmem:[#allocation88_spill] sm:$0xff] %v4333_v44  ;;  %5192 = vst [vmem:[#allocation89_spill] sm:$0xff] %v4336_v52  ;;  %v4339_v60 = vadd.f32 %v1323_v59, %v4162_v15  ;;  %v4342_v4 = vadd.f32 %v1436_v36, %v4164_v16 }
 0x2c3   : > { %v1325_v11 = vpop.f32.mrf.mxu0  ;;  %v1438_v0 = vpop.f32.mrf.mxu1 }
 0x2c4   : > { %5193 = vst [vmem:[#allocation90_spill] sm:$0xff] %v4339_v60  ;;  %5194 = vst [vmem:[#allocation91_spill] sm:$0xff] %v4342_v4  ;;  %v4345_v12 = vadd.f32 %v1325_v11, %v4166_v17  ;;  %v4348_v28 = vadd.f32 %v1438_v0, %v4168_v18 }
 0x2c5   : > { %v1327_v43 = vpop.f32.mrf.mxu0  ;;  %v1440_v40 = vpop.f32.mrf.mxu1 }
 0x2c6   : > { %5195 = vst [vmem:[#allocation92_spill] sm:$0xff] %v4348_v28  ;;  %v4351_v8 = vadd.f32 %v1327_v43, %v4162_v15  ;;  %v4354_v52 = vadd.f32 %v1440_v40, %v4164_v16  ;;  %1448 = sbr.rel (%p2762_p1) target bundleno = 1211 (0x4bb), region = 51 }
 0x2c7   : > { %v1329_v59 = vpop.f32.mrf.mxu0  ;;  %v1442_v60 = vpop.f32.mrf.mxu1 }
 0x2c8   : > { %5196 = vst [vmem:[#allocation93_spill] sm:$0xff] %v4351_v8  ;;  %5197 = vst [vmem:[#allocation94_spill] sm:$0xff] %v4354_v52  ;;  %v4357_v36 = vadd.f32 %v1329_v59, %v4166_v17  ;;  %v4360_v4 = vadd.f32 %v1442_v60, %v4168_v18 }
 0x2ca   : > { %5198 = vst [vmem:[#allocation95_spill] sm:$0xff] %v4357_v36 }
 0x2cb   : > { %v1475_v0 = vmax.f32 %v4195_v37, %v4201_v41  ;;  %v1465_v15 = vmax.f32 %v4171_v21, %v4177_v25  ;;  %v1480_v16 = vmax.f32 %v4207_v45, %v4213_v49  ;;  %v1470_v40 = vmax.f32 %v4183_v29, %v4189_v33 }
 0x2cc   : > { %v1490_v17 = vmax.f32 %v4231_v61, %v4237_v1  ;;  %v1485_v18 = vmax.f32 %v4219_v53, %v4225_v57  ;;  %v1500_v1 = vmax.f32 %v4255_v13, %v4261_v23  ;;  %vm2009_vm1 = vcmask 7168  }
 0x2cd   : > { %v1476_v60 = vmax.f32 %v1475_v0, %v4198_v38  ;;  %v1466_v11 = vmax.f32 %v1465_v15, %v4174_v22  ;;  %v1481_v43 = vmax.f32 %v1480_v16, %v4210_v46  ;;  %v1471_v59 = vmax.f32 %v1470_v40, %v4186_v30 }
 0x2ce   : > { %v1491_v45 = vmax.f32 %v1490_v17, %v4234_v62  ;;  %v1486_v61 = vmax.f32 %v1485_v18, %v4222_v54  ;;  %v1495_v16 = vmax.f32 %v4243_v5, %v4249_v9  ;;  %v1510_v17 = vmax.f32 %v4279_v47, %v4285_v55 }
 0x2cf   : > { %v1477_v41 = vmax.f32 %v1476_v60, %v4204_v42  ;;  %v1467_v49 = vmax.f32 %v1466_v11, %v4180_v26  ;;  %v1482_v0 = vmax.f32 %v1481_v43, %v4216_v50  ;;  %v1472_v15 = vmax.f32 %v1471_v59, %v4192_v34 }
 0x2d0   : > { %v1492_v40 = vmax.f32 %v1491_v45, %v4240_v2  ;;  %v1501_v60 = vmax.f32 %v1500_v1, %v4258_v14  ;;  %v1487_v18 = vmax.f32 %v1486_v61, %v4228_v58  ;;  %v1511_v43 = vmax.f32 %v1510_v17, %v4282_v48 }
 0x2d1   : > { %1478 = vmax.xlane.f32.xlu1 %v1477_v41  ;;  %1468 = vmax.xlane.f32.xlu0 %v1467_v49  ;;  %v1496_v41 = vmax.f32 %v1495_v16, %v4246_v6  ;;  %v1505_v49 = vmax.f32 %v4267_v31, %v4273_v39  ;;  %v1520_v45 = vmax.f32 %v4303_v19, %v4309_v35  ;;  %v5208_v31 = vld [vmem:[#allocation91_spill] sm:$0xff] }
 0x2d2   : > { %v1502_v11 = vmax.f32 %v1501_v60, %v4264_v24  ;;  %v1515_v61 = vmax.f32 %v4291_v63, %v4297_v7  ;;  %v1525_v16 = vmax.f32 %v4315_v51, %v4321_v3  ;;  %v5201_v7 = vld [vmem:[#allocation87_spill] sm:$0xff] }
 0x2d3   : > { %v1497_v1 = vmax.f32 %v1496_v41, %v4252_v10  ;;  %v1506_v59 = vmax.f32 %v1505_v49, %v4270_v32  ;;  %v1521_v60 = vmax.f32 %v1520_v45, %v4306_v20  ;;  %v3647_v49 = vmov 0   ;;  %v5202_v32 = vld [vmem:[#allocation90_spill] sm:$0xff]  ;;  %v5204_v45 = vld [vmem:[#allocation77_spill] sm:$0xff] }
 0x2d4   : > { %3031 = vset.pattern.permute.xlu0 %v3647_v49  ;;  %3032 = vset.pattern.permute.xlu1 %v3647_v49  ;;  %v1535_v39 = vmax.f32 %v5202_v32, %v4345_v12  ;;  %v5206_v49 = vld [vmem:[#allocation89_spill] sm:$0xff] }
 0x2d5   : > { %1483 = vmax.xlane.f32.xlu1 %v1482_v0  ;;  %1473 = vmax.xlane.f32.xlu0 %v1472_v15  ;;  %v1512_v0 = vmax.f32 %v1511_v43, %v4288_v56  ;;  %v1530_v15 = vmax.f32 %v4327_v27, %v4333_v44  ;;  %v1540_v43 = vmax.f32 %v4351_v8, %v4357_v36 }
 0x2d6   : > { %v1536_v36 = vmax.f32 %v1535_v39, %v5208_v31 }
 0x2d7   : > { %v1531_v63 = vmax.f32 %v1530_v15, %v5201_v7  ;;  %v5207_v15 = vld [vmem:[#allocation85_spill] sm:$0xff] }
 0x2d9   : > { %1493 = vmax.xlane.f32.xlu1 %v1492_v40  ;;  %1488 = vmax.xlane.f32.xlu0 %v1487_v18  ;;  %v5199_v40 = vld [vmem:[#allocation69_spill] sm:$0xff]  ;;  %v5200_v18 = vld [vmem:[#allocation75_spill] sm:$0xff] }
 0x2da   : > { %v1507_v17 = vmax.f32 %v1506_v59, %v5199_v40  ;;  %v1516_v41 = vmax.f32 %v1515_v61, %v5200_v18  ;;  %v5205_v59 = vld [vmem:[#allocation83_spill] sm:$0xff]  ;;  %v1541_v61 = vmax.f32 %v1540_v43, %v4354_v52  ;;  %v1532_v18 = vmax.f32 %v1531_v63, %v5206_v49 }
 0x2db   : > { %v1526_v51 = vmax.f32 %v1525_v16, %v5205_v59  ;;  %v4429_v16 = vld [vmem:[#allocation4] sm:$0xff] }
 0x2dc   : > { %5210 = vst [vmem:[#allocation97_spill] sm:$0xff] %v4429_v16 }
 0x2dd   : > { %1503 = vmax.xlane.f32.xlu1 %v1502_v11  ;;  %1498 = vmax.xlane.f32.xlu0 %v1497_v1  ;;  %v5203_v11 = vld [vmem:[#allocation81_spill] sm:$0xff]  ;;  %v1517_v1 = vmax.f32 %v1516_v41, %v5204_v45  ;;  %v1527_v40 = vmax.f32 %v1526_v51, %v5207_v15  ;;  %v4437_v51 = vld [vmem:[#allocation4 + $0x18] sm:$0xff] }
 0x2de   : > { %v1522_v3 = vmax.f32 %v1521_v60, %v5203_v11  ;;  %v1537_v60 = vmax.f32 %v1536_v36, %v4348_v28  ;;  %5213 = vst [vmem:[#allocation100_spill] sm:$0xff] %v4437_v51  ;;  %v4494_v36 = vld [vmem:[#allocation4 + $0x48] sm:$0xff]  ;;  %v4535_v28 = vld [vmem:[#allocation4 + $0x60] sm:$0xff] }
 0x2df   : > { %5223 = vst [vmem:[#allocation110_spill] sm:$0xff] %v4494_v36  ;;  %5232 = vst [vmem:[#allocation119_spill] sm:$0xff] %v4535_v28 }
 0x2e1   : > { %1513 = vmax.xlane.f32.xlu1 %v1512_v0  ;;  %1508 = vmax.xlane.f32.xlu0 %v1507_v17  ;;  %v1542_v0 = vmax.f32 %v1541_v61, %v4360_v4  ;;  %v4427_v17 = vld [vmem:[#allocation4 + $0x10] sm:$0xff] }
 0x2e2   : > { %5209 = vst [vmem:[#allocation96_spill] sm:$0xff] %v4427_v17 }
 0x2e5   : > { %1523 = vmax.xlane.f32.xlu1 %v1522_v3  ;;  %1518 = vmax.xlane.f32.xlu0 %v1517_v1 }
 0x2e9   : > { %1533 = vmax.xlane.f32.xlu1 %v1532_v18  ;;  %1528 = vmax.xlane.f32.xlu0 %v1527_v40  ;;  %v4439_v40 = vld [vmem:[#allocation4 + $0x8] sm:$0xff] }
 0x2ea   : > { %5214 = vst [vmem:[#allocation101_spill] sm:$0xff] %v4439_v40 }
 0x2ed   : > { %1543 = vmax.xlane.f32.xlu1 %v1542_v0  ;;  %1538 = vmax.xlane.f32.xlu0 %v1537_v60  ;;  %v4456_v60 = vld [vmem:[#allocation4 + $0x28] sm:$0xff] }
 0x2ee   : > { %5217 = vst [vmem:[#allocation104_spill] sm:$0xff] %v4456_v60 }
 0x35a   : > { %v1479_v3 = vpop.xlane.xlu1 %1478  ;;  %v1469_v63 = vpop.xlane.xlu0 %1468 }
 0x35b   : > { %v4432_v41 = vmax.f32 %v4427_v17, %v1479_v3  ;;  %v4435_v39 = vmax.f32 %v4429_v16, %v1469_v63  ;;  %v4458_v3 = vld [vmem:[#allocation4 + $0x20] sm:$0xff]  ;;  %v4475_v63 = vld [vmem:[#allocation4 + $0x38] sm:$0xff] }
 0x35c   : > { %5218 = vst [vmem:[#allocation105_spill] sm:$0xff] %v4458_v3  ;;  %5220 = vst [vmem:[#allocation107_spill] sm:$0xff] %v4475_v63 }
 0x35d   : > { %5211 = vst [vmem:[#allocation98_spill] sm:$0xff] %v4432_v41  ;;  %5212 = vst [vmem:[#allocation99_spill] sm:$0xff] %v4435_v39  ;;  %1643 = vperm.xlu0 %3031, %v4435_v39  }
 0x35e   : > { %2028 = vst.msk [vmem:[#allocation4 + $0x10] sm:$0xff] %vm2009_vm1, %v4432_v41  ;;  %2026 = vst.msk [vmem:[#allocation4] sm:$0xff] %vm2009_vm1, %v4435_v39  ;;  %v1484_v43 = vpop.xlane.xlu1 %1483  ;;  %v1474_v1 = vpop.xlane.xlu0 %1473 }
 0x35f   : > { %v4451_v61 = vmax.f32 %v4437_v51, %v1484_v43  ;;  %v4454_v0 = vmax.f32 %v4439_v40, %v1474_v1  ;;  %v4477_v51 = vld [vmem:[#allocation4 + $0x30] sm:$0xff] }
 0x360   : > { %5221 = vst [vmem:[#allocation108_spill] sm:$0xff] %v4477_v51 }
 0x361   : > { %5215 = vst [vmem:[#allocation102_spill] sm:$0xff] %v4451_v61  ;;  %5216 = vst [vmem:[#allocation103_spill] sm:$0xff] %v4454_v0  ;;  %1648 = vperm.xlu1 %3032, %v4454_v0  }
 0x362   : > { %2029 = vst.msk [vmem:[#allocation4 + $0x18] sm:$0xff] %vm2009_vm1, %v4451_v61  ;;  %2027 = vst.msk [vmem:[#allocation4 + $0x8] sm:$0xff] %vm2009_vm1, %v4454_v0  ;;  %v1494_v43 = vpop.xlane.xlu1 %1493  ;;  %v1489_v1 = vpop.xlane.xlu0 %1488 }
 0x363   : > { %v4470_v18 = vmax.f32 %v4456_v60, %v1494_v43  ;;  %v4473_v17 = vmax.f32 %v4458_v3, %v1489_v1  ;;  %v4496_v60 = vld [vmem:[#allocation4 + $0x40] sm:$0xff] }
 0x364   : > { %5224 = vst [vmem:[#allocation111_spill] sm:$0xff] %v4496_v60 }
 0x365   : > { %5219 = vst [vmem:[#allocation106_spill] sm:$0xff] %v4473_v17  ;;  %2031 = vst.msk [vmem:[#allocation4 + $0x28] sm:$0xff] %vm2009_vm1, %v4470_v18  ;;  %1653 = vperm.xlu1 %3032, %v4432_v41   ;;  %v4513_v41 = vld [vmem:[#allocation4 + $0x58] sm:$0xff] }
 0x366   : > { %2030 = vst.msk [vmem:[#allocation4 + $0x20] sm:$0xff] %vm2009_vm1, %v4473_v17  ;;  %v1504_v43 = vpop.xlane.xlu1 %1503  ;;  %v1499_v1 = vpop.xlane.xlu0 %1498  ;;  %5227 = vst [vmem:[#allocation114_spill] sm:$0xff] %v4513_v41 }
 0x367   : > { %v4489_v40 = vmax.f32 %v4475_v63, %v1504_v43  ;;  %v4492_v39 = vmax.f32 %v4477_v51, %v1499_v1  ;;  %v4515_v63 = vld [vmem:[#allocation4 + $0x50] sm:$0xff] }
 0x368   : > { %5228 = vst [vmem:[#allocation115_spill] sm:$0xff] %v4515_v63 }
 0x369   : > { %5222 = vst [vmem:[#allocation109_spill] sm:$0xff] %v4489_v40  ;;  %2033 = vst.msk [vmem:[#allocation4 + $0x38] sm:$0xff] %vm2009_vm1, %v4489_v40  ;;  %1658 = vperm.xlu1 %3032, %v4451_v61  }
 0x36a   : > { %2032 = vst.msk [vmem:[#allocation4 + $0x30] sm:$0xff] %vm2009_vm1, %v4492_v39  ;;  %v1514_v43 = vpop.xlane.xlu1 %1513  ;;  %v1509_v1 = vpop.xlane.xlu0 %1508 }
 0x36b   : > { %v4508_v3 = vmax.f32 %v4494_v36, %v1514_v43  ;;  %v4511_v16 = vmax.f32 %v4496_v60, %v1509_v1  ;;  %v4533_v36 = vld [vmem:[#allocation4 + $0x68] sm:$0xff] }
 0x36c   : > { %5231 = vst [vmem:[#allocation118_spill] sm:$0xff] %v4533_v36 }
 0x36d   : > { %5225 = vst [vmem:[#allocation112_spill] sm:$0xff] %v4508_v3  ;;  %5226 = vst [vmem:[#allocation113_spill] sm:$0xff] %v4511_v16  ;;  %1663 = vperm.xlu1 %3032, %v4473_v17   ;;  %1688 = vperm.xlu0 %3031, %v4508_v3   ;;  %v4555_v17 = vld [vmem:[#allocation4 + $0x70] sm:$0xff] }
 0x36e   : > { %2035 = vst.msk [vmem:[#allocation4 + $0x48] sm:$0xff] %vm2009_vm1, %v4508_v3  ;;  %2034 = vst.msk [vmem:[#allocation4 + $0x40] sm:$0xff] %vm2009_vm1, %v4511_v16  ;;  %v1524_v1 = vpop.xlane.xlu1 %1523  ;;  %v1519_v0 = vpop.xlane.xlu0 %1518 }
 0x36f   : > { %v4528_v51 = vmax.f32 %v4513_v41, %v1524_v1  ;;  %v4531_v61 = vmax.f32 %v4515_v63, %v1519_v0  ;;  %v4553_v41 = vld [vmem:[#allocation4 + $0x78] sm:$0xff]  ;;  %5236 = vst [vmem:[#allocation123_spill] sm:$0xff] %v4555_v17 }
 0x370   : > { %5235 = vst [vmem:[#allocation122_spill] sm:$0xff] %v4553_v41 }
 0x371   : > { %5229 = vst [vmem:[#allocation116_spill] sm:$0xff] %v4528_v51  ;;  %5230 = vst [vmem:[#allocation117_spill] sm:$0xff] %v4531_v61  ;;  %1668 = vperm.xlu1 %3032, %v4470_v18   ;;  %1698 = vperm.xlu0 %3031, %v4528_v51  }
 0x372   : > { %2037 = vst.msk [vmem:[#allocation4 + $0x58] sm:$0xff] %vm2009_vm1, %v4528_v51  ;;  %2036 = vst.msk [vmem:[#allocation4 + $0x50] sm:$0xff] %vm2009_vm1, %v4531_v61  ;;  %v1534_v0 = vpop.xlane.xlu1 %1533  ;;  %v1529_v43 = vpop.xlane.xlu0 %1528 }
 0x373   : > { %v4548_v60 = vmax.f32 %v4533_v36, %v1534_v0  ;;  %v4551_v3 = vmax.f32 %v4535_v28, %v1529_v43 }
 0x375   : > { %5233 = vst [vmem:[#allocation120_spill] sm:$0xff] %v4548_v60  ;;  %5234 = vst [vmem:[#allocation121_spill] sm:$0xff] %v4551_v3  ;;  %1673 = vperm.xlu1 %3032, %v4492_v39   ;;  %1708 = vperm.xlu0 %3031, %v4548_v60  }
 0x376   : > { %2039 = vst.msk [vmem:[#allocation4 + $0x68] sm:$0xff] %vm2009_vm1, %v4548_v60  ;;  %2038 = vst.msk [vmem:[#allocation4 + $0x60] sm:$0xff] %vm2009_vm1, %v4551_v3  ;;  %v1544_v43 = vpop.xlane.xlu1 %1543  ;;  %v1539_v1 = vpop.xlane.xlu0 %1538 }
 0x377   : > { %v4568_v63 = vmax.f32 %v4553_v41, %v1544_v43  ;;  %v4571_v51 = vmax.f32 %v4555_v17, %v1539_v1 }
 0x379   : > { %5237 = vst [vmem:[#allocation124_spill] sm:$0xff] %v4568_v63  ;;  %5238 = vst [vmem:[#allocation125_spill] sm:$0xff] %v4571_v51  ;;  %1678 = vperm.xlu1 %3032, %v4489_v40   ;;  %1718 = vperm.xlu0 %3031, %v4568_v63  }
 0x37a   : > { %2041 = vst.msk [vmem:[#allocation4 + $0x78] sm:$0xff] %vm2009_vm1, %v4568_v63  ;;  %2040 = vst.msk [vmem:[#allocation4 + $0x70] sm:$0xff] %vm2009_vm1, %v4571_v51 }
 0x37d   : > { %1683 = vperm.xlu1 %3032, %v4511_v16  }
 0x381   : > { %1693 = vperm.xlu1 %3032, %v4531_v61  }
 0x385   : > { %1703 = vperm.xlu1 %3032, %v4551_v3  }
 0x389   : > { %1713 = vperm.xlu1 %3032, %v4571_v51  }
 0x3d8   : > { %v1644_v1 = vpop.permute.xlu0 %1643 }
 0x3d9   : > { %v1721_v43 = vsub.f32 %v4171_v21, %v1644_v1  ;;  %v1722_v36 = vsub.f32 %v4177_v25, %v1644_v1  ;;  %v1723_v63 = vsub.f32 %v4174_v22, %v1644_v1  ;;  %v1724_v0 = vsub.f32 %v4180_v26, %v1644_v1 }
 0x3db   : > { %v1785_v17 = vmul.f32 1.442695, %v1721_v43  ;;  %v1787_v41 = vmul.f32 1.442695, %v1722_v36  ;;  %v1789_v28 = vmul.f32 1.442695, %v1723_v63 }
 0x3dc   : > { %v1791_v60 = vmul.f32 1.442695, %v1724_v0  ;;  %v1649_v16 = vpop.permute.xlu1 %1648 }
 0x3dd   : > { %3033 = vpow2.f32 %v1785_v17  ;;  %v1725_v61 = vsub.f32 %v4183_v29, %v1649_v16  ;;  %v1726_v3 = vsub.f32 %v4189_v33, %v1649_v16  ;;  %v1727_v51 = vsub.f32 %v4186_v30, %v1649_v16  ;;  %v5239_v17 = vld [vmem:[#allocation53_spill] sm:$0xff] }
 0x3de   : > { %3035 = vpow2.f32 %v1787_v41  ;;  %v1728_v21 = vsub.f32 %v4192_v34, %v1649_v16 }
 0x3df   : > { %3037 = vpow2.f32 %v1789_v28  ;;  %v1793_v25 = vmul.f32 1.442695, %v1725_v61  ;;  %v1795_v22 = vmul.f32 1.442695, %v1726_v3  ;;  %v1797_v40 = vmul.f32 1.442695, %v1727_v51 }
 0x3e0   : > { %3039 = vpow2.f32 %v1791_v60  ;;  %v1799_v1 = vmul.f32 1.442695, %v1728_v21  ;;  %v1654_v36 = vpop.permute.xlu1 %1653  ;;  %v5240_v21 = vld [vmem:[#allocation54_spill] sm:$0xff] }
 0x3e1   : > { %3041 = vpow2.f32 %v1793_v25  ;;  %v1729_v63 = vsub.f32 %v4195_v37, %v1654_v36  ;;  %v1730_v0 = vsub.f32 %v5239_v17, %v1654_v36  ;;  %v1731_v43 = vsub.f32 %v4198_v38, %v1654_v36  ;;  %v5241_v25 = vld [vmem:[#allocation55_spill] sm:$0xff] }
 0x3e2   : > { %3043 = vpow2.f32 %v1795_v22  ;;  %v1732_v30 = vsub.f32 %v4204_v42, %v1654_v36 }
 0x3e3   : > { %3045 = vpow2.f32 %v1797_v40  ;;  %v1801_v41 = vmul.f32 1.442695, %v1729_v63  ;;  %v1803_v16 = vmul.f32 1.442695, %v1730_v0  ;;  %v1805_v28 = vmul.f32 1.442695, %v1731_v43 }
 0x3e4   : > { %3047 = vpow2.f32 %v1799_v1  ;;  %v1807_v61 = vmul.f32 1.442695, %v1732_v30  ;;  %v1659_v51 = vpop.permute.xlu1 %1658 }
 0x3e5   : > { %3049 = vpow2.f32 %v1801_v41  ;;  %v1733_v60 = vsub.f32 %v5240_v21, %v1659_v51  ;;  %v1734_v3 = vsub.f32 %v5241_v25, %v1659_v51  ;;  %v1735_v34 = vsub.f32 %v4210_v46, %v1659_v51 }
 0x3e6   : > { %3051 = vpow2.f32 %v1803_v16  ;;  %v1736_v17 = vsub.f32 %v4216_v50, %v1659_v51 }
 0x3e7   : > { %3053 = vpow2.f32 %v1805_v28  ;;  %v1809_v22 = vmul.f32 1.442695, %v1733_v60  ;;  %v1811_v36 = vmul.f32 1.442695, %v1734_v3  ;;  %v1813_v40 = vmul.f32 1.442695, %v1735_v34 }
 0x3e8   : > { %3055 = vpow2.f32 %v1807_v61  ;;  %v1815_v63 = vmul.f32 1.442695, %v1736_v17  ;;  %v1664_v0 = vpop.permute.xlu1 %1663  ;;  %v1689_v1 = vpop.permute.xlu0 %1688 }
 0x3e9   : > { %3057 = vpow2.f32 %v1809_v22  ;;  %v1737_v30 = vsub.f32 %v4219_v53, %v1664_v0  ;;  %v1738_v43 = vsub.f32 %v4225_v57, %v1664_v0  ;;  %v1739_v41 = vsub.f32 %v4222_v54, %v1664_v0 }
 0x3ea   : > { %v4606_v21 = vpop.eup %3033  ;;  %3059 = vpow2.f32 %v1811_v36  ;;  %v1740_v16 = vsub.f32 %v4228_v58, %v1664_v0  ;;  %v1757_v28 = vsub.f32 %v4279_v47, %v1689_v1  ;;  %v1758_v34 = vsub.f32 %v4285_v55, %v1689_v1  ;;  %v5242_v55 = vld [vmem:[#allocation60_spill] sm:$0xff] }
 0x3eb   : > { %v4611_v61 = vpop.eup %3035  ;;  %3061 = vpow2.f32 %v1813_v40  ;;  %v1817_v51 = vmul.f32 1.442695, %v1737_v30  ;;  %v1819_v60 = vmul.f32 1.442695, %v1738_v43  ;;  %v1821_v25 = vmul.f32 1.442695, %v1739_v41 }
 0x3ec   : > { %v4613_v3 = vpop.eup %3037  ;;  %3063 = vpow2.f32 %v1815_v63  ;;  %v1823_v17 = vmul.f32 1.442695, %v1740_v16  ;;  %v1759_v22 = vsub.f32 %v4282_v48, %v1689_v1  ;;  %v1760_v36 = vsub.f32 %v4288_v56, %v1689_v1  ;;  %v1669_v54 = vpop.permute.xlu1 %1668  ;;  %v5243_v30 = vld [vmem:[#allocation62_spill] sm:$0xff] }
 0x3ed   : > { %v4617_v0 = vpop.eup %3039  ;;  %3065 = vpow2.f32 %v1817_v51  ;;  %v1857_v47 = vmul.f32 1.442695, %v1757_v28  ;;  %v1741_v58 = vsub.f32 %v5242_v55, %v1669_v54  ;;  %v1859_v40 = vmul.f32 1.442695, %v1758_v34  ;;  %v1699_v41 = vpop.permute.xlu0 %1698 }
 0x3ee   : > { %v4620_v57 = vpop.eup %3041  ;;  %3067 = vpow2.f32 %v1819_v60  ;;  %v1742_v43 = vsub.f32 %v5243_v30, %v1669_v54  ;;  %v1861_v16 = vmul.f32 1.442695, %v1759_v22  ;;  %v1743_v1 = vsub.f32 %v4234_v62, %v1669_v54 }
 0x3ef   : > { %v4623_v63 = vpop.eup %3043  ;;  %3069 = vpow2.f32 %v1821_v25  ;;  %v1863_v51 = vmul.f32 1.442695, %v1760_v36  ;;  %v1744_v28 = vsub.f32 %v4240_v2, %v1669_v54  ;;  %v1825_v34 = vmul.f32 1.442695, %v1741_v58 }
 0x3f0   : > { %v4626_v56 = vpop.eup %3045  ;;  %3071 = vpow2.f32 %v1823_v17  ;;  %v1674_v55 = vpop.permute.xlu1 %1673  ;;  %v1765_v60 = vsub.f32 %v4303_v19, %v1699_v41  ;;  %v1827_v25 = vmul.f32 1.442695, %v1742_v43  ;;  %v1766_v22 = vsub.f32 %v4309_v35, %v1699_v41 }
 0x3f1   : > { %v4629_v48 = vpop.eup %3047  ;;  %3073 = vpow2.f32 %v1857_v47  ;;  %v1829_v17 = vmul.f32 1.442695, %v1743_v1  ;;  %v1767_v36 = vsub.f32 %v4306_v20, %v1699_v41  ;;  %v1831_v2 = vmul.f32 1.442695, %v1744_v28  ;;  %v1709_v1 = vpop.permute.xlu0 %1708 }
 0x3f2   : > { %v4632_v30 = vpop.eup %3049  ;;  %3075 = vpow2.f32 %v1859_v40  ;;  %v1768_v58 = vsub.f32 %v5203_v11, %v1699_v41  ;;  %v1873_v19 = vmul.f32 1.442695, %v1765_v60  ;;  %v1745_v40 = vsub.f32 %v4243_v5, %v1674_v55 }
 0x3f3   : > { %v4635_v53 = vpop.eup %3051  ;;  %3077 = vpow2.f32 %v1861_v16  ;;  %v1875_v35 = vmul.f32 1.442695, %v1766_v22  ;;  %v1746_v16 = vsub.f32 %v4249_v9, %v1674_v55  ;;  %v1747_v11 = vsub.f32 %v4246_v6, %v1674_v55 }
 0x3f4   : > { %v4638_v54 = vpop.eup %3053  ;;  %3079 = vpow2.f32 %v1863_v51  ;;  %v4647_v20 = vpop.permute.xlu1 %1678  ;;  %v1877_v51 = vmul.f32 1.442695, %v1767_v36  ;;  %v1879_v28 = vmul.f32 1.442695, %v1768_v58  ;;  %v1913_v60 = vadd.f32 %v4611_v61, %v4606_v21 }
 0x3f5   : > { %v4641_v47 = vpop.eup %3055  ;;  %3081 = vpow2.f32 %v1825_v34  ;;  %v1748_v34 = vsub.f32 %v4252_v10, %v1674_v55  ;;  %v1833_v22 = vmul.f32 1.442695, %v1745_v40  ;;  %v1773_v9 = vsub.f32 %v4327_v27, %v1709_v1 }
 0x3f6   : > { %v4644_v43 = vpop.eup %3057  ;;  %3083 = vpow2.f32 %v1827_v25  ;;  %v1774_v36 = vsub.f32 %v4333_v44, %v1709_v1  ;;  %v1837_v55 = vmul.f32 1.442695, %v1747_v11  ;;  %v1775_v21 = vsub.f32 %v5201_v7, %v1709_v1 }
 0x3f7   : > { %v4649_v62 = vpop.eup %3059  ;;  %3085 = vpow2.f32 %v1829_v17  ;;  %v1835_v17 = vmul.f32 1.442695, %v1746_v16  ;;  %v1776_v61 = vsub.f32 %v5206_v49, %v1709_v1  ;;  %v1839_v40 = vmul.f32 1.442695, %v1748_v34  ;;  %v1719_v1 = vpop.permute.xlu0 %1718 }
 0x3f8   : > { %v4652_v41 = vpop.eup %3061  ;;  %3087 = vpow2.f32 %v1831_v2  ;;  %v1914_v2 = vadd.f32 %v4613_v3, %v1913_v60  ;;  %v4673_v16 = vpop.permute.xlu1 %1683  ;;  %v1750_v7 = vsub.f32 %v4261_v23, %v4647_v20  ;;  %v1891_v49 = vmul.f32 1.442695, %v1774_v36 }
 0x3f9   : > { %v4657_v25 = vpop.eup %3063  ;;  %3089 = vpow2.f32 %v1873_v19  ;;  %v1893_v34 = vmul.f32 1.442695, %v1775_v21  ;;  %v1895_v60 = vmul.f32 1.442695, %v1776_v61  ;;  %v5244_v61 = vld [vmem:[#allocation95_spill] sm:$0xff] }
 0x3fa   : > { %v4660_v5 = vpop.eup %3065  ;;  %3091 = vpow2.f32 %v1875_v35  ;;  %v1915_v27 = vadd.f32 %v4617_v0, %v1914_v2  ;;  %v1749_v35 = vsub.f32 %v4255_v13, %v4647_v20  ;;  %v1918_v0 = vadd.f32 %v4623_v63, %v4620_v57 }
 0x3fb   : > { %v4664_v58 = vpop.eup %3067  ;;  %3093 = vpow2.f32 %v1877_v51  ;;  %v1889_v51 = vmul.f32 1.442695, %v1773_v9  ;;  %v1751_v9 = vsub.f32 %v4258_v14, %v4647_v20  ;;  %v1843_v57 = vmul.f32 1.442695, %v1750_v7 }
 0x3fc   : > { %v4668_v19 = vpop.eup %3069  ;;  %3095 = vpow2.f32 %v1879_v28  ;;  %1916 = vadd.xlane.f32.xlu1 %v1915_v27  ;;  %v1841_v36 = vmul.f32 1.442695, %v1749_v35  ;;  %v1919_v27 = vadd.f32 %v4626_v56, %v1918_v0  ;;  %v1781_v63 = vsub.f32 %v4351_v8, %v1719_v1  ;;  %v4700_v35 = vpop.permute.xlu1 %1693 }
 0x3fd   : > { %v4675_v3 = vpop.eup %3071  ;;  %3097 = vpow2.f32 %v1833_v22  ;;  %v1782_v44 = vsub.f32 %v5244_v61, %v1719_v1  ;;  %v1845_v0 = vmul.f32 1.442695, %v1751_v9 }
 0x3fe   : > { %v4679_v11 = vpop.eup %3073  ;;  %3099 = vpow2.f32 %v1835_v17  ;;  %v1752_v17 = vsub.f32 %v4264_v24, %v4647_v20  ;;  %v1920_v20 = vadd.f32 %v4629_v48, %v1919_v27 }
 0x3ff   : > { %v4683_v28 = vpop.eup %3075  ;;  %3101 = vpow2.f32 %v1837_v55  ;;  %v1923_v55 = vadd.f32 %v4635_v53, %v4632_v30  ;;  %v5245_v30 = vld [vmem:[#allocation66_spill] sm:$0xff] }
 0x400   : > { %v4687_v22 = vpop.eup %3077  ;;  %3103 = vpow2.f32 %v1839_v40  ;;  %v1783_v40 = vsub.f32 %v4354_v52, %v1719_v1  ;;  %v1847_v53 = vmul.f32 1.442695, %v1752_v17  ;;  %1921 = vadd.xlane.f32.xlu0 %v1920_v20  ;;  %v1905_v52 = vmul.f32 1.442695, %v1781_v63 }
 0x401   : > { %v4692_v2 = vpop.eup %3079  ;;  %3105 = vpow2.f32 %v1889_v51  ;;  %v1784_v51 = vsub.f32 %v4360_v4, %v1719_v1  ;;  %v1924_v7 = vadd.f32 %v4638_v54, %v1923_v55  ;;  %v1907_v1 = vmul.f32 1.442695, %v1782_v44 }
 0x402   : > { %v3082_v21 = vpop.eup %3081  ;;  %3107 = vpow2.f32 %v1891_v49  ;;  %v1753_v49 = vsub.f32 %v5245_v30, %v4673_v16  ;;  %v1909_v54 = vmul.f32 1.442695, %v1783_v40  ;;  %v1933_v40 = vadd.f32 %v4664_v58, %v4660_v5  ;;  %v5251_v5 = vld [vmem:[#allocation75_spill] sm:$0xff] }
 0x403   : > { %v3084_v56 = vpop.eup %3083  ;;  %3109 = vpow2.f32 %v1893_v34  ;;  %v1925_v48 = vadd.f32 %v4641_v47, %v1924_v7  ;;  %v1928_v34 = vadd.f32 %v4649_v62, %v4644_v43  ;;  %v1911_v55 = vmul.f32 1.442695, %v1784_v51  ;;  %v5248_v62 = vld [vmem:[#allocation69_spill] sm:$0xff] }
 0x404   : > { %v3086_v8 = vpop.eup %3085  ;;  %3111 = vpow2.f32 %v1895_v60  ;;  %v5246_v60 = vld [vmem:[#allocation68_spill] sm:$0xff]  ;;  %v1756_v43 = vsub.f32 %v5248_v62, %v4673_v16  ;;  %v1849_v44 = vmul.f32 1.442695, %v1753_v49  ;;  %v1934_v49 = vadd.f32 %v4668_v19, %v1933_v40  ;;  %v5252_v40 = vld [vmem:[#allocation82_spill] sm:$0xff] }
 0x405   : > { %v3088_v61 = vpop.eup %3087  ;;  %3113 = vpow2.f32 %v1841_v36  ;;  %v1754_v17 = vsub.f32 %v5246_v60, %v4673_v16  ;;  %v5247_v36 = vld [vmem:[#allocation67_spill] sm:$0xff]  ;;  %v1929_v47 = vadd.f32 %v4652_v41, %v1928_v34  ;;  %1926 = vadd.xlane.f32.xlu0 %v1925_v48  ;;  %v5250_v41 = vld [vmem:[#allocation76_spill] sm:$0xff]  ;;  %v1763_v58 = vsub.f32 %v5251_v5, %v4700_v35 }
 0x406   : > { %v4709_v9 = vpop.eup %3089  ;;  %3115 = vpow2.f32 %v1843_v57  ;;  %v1755_v63 = vsub.f32 %v5247_v36, %v4673_v16  ;;  %v1704_v57 = vpop.permute.xlu1 %1703  ;;  %v1762_v30 = vsub.f32 %v5250_v41, %v4700_v35  ;;  %v1855_v62 = vmul.f32 1.442695, %v1756_v43 }
 0x407   : > { %v4713_v27 = vpop.eup %3091  ;;  %3117 = vpow2.f32 %v1845_v0  ;;  %v5249_v0 = vld [vmem:[#allocation74_spill] sm:$0xff]  ;;  %v1851_v16 = vmul.f32 1.442695, %v1754_v17 }
 0x408   : > { %v4718_v20 = vpop.eup %3093  ;;  %3119 = vpow2.f32 %v1847_v53  ;;  %v1761_v51 = vsub.f32 %v5249_v0, %v4700_v35  ;;  %v1930_v53 = vadd.f32 %v4657_v25, %v1929_v47  ;;  %v1853_v60 = vmul.f32 1.442695, %v1755_v63  ;;  %v5253_v0 = vld [vmem:[#allocation84_spill] sm:$0xff] }
 0x409   : > { %v4724_v7 = vpop.eup %3095  ;;  %3121 = vpow2.f32 %v1905_v52  ;;  %v1764_v52 = vsub.f32 %v5204_v45, %v4700_v35  ;;  %v1935_v25 = vadd.f32 %v4675_v3, %v1934_v49  ;;  %v1938_v47 = vadd.f32 %v3084_v56, %v3082_v21 }
 0x40a   : > { %v3098_v34 = vpop.eup %3097  ;;  %3123 = vpow2.f32 %v1907_v1  ;;  %1931 = vadd.xlane.f32.xlu1 %v1930_v53  ;;  %v1865_v17 = vmul.f32 1.442695, %v1761_v51  ;;  %v1867_v19 = vmul.f32 1.442695, %v1762_v30  ;;  %v1770_v41 = vsub.f32 %v5253_v0, %v1704_v57  ;;  %v1714_v5 = vpop.permute.xlu1 %1713 }
 0x40b   : > { %v3100_v48 = vpop.eup %3099  ;;  %3125 = vpow2.f32 %v1909_v54  ;;  %v1769_v54 = vsub.f32 %v5252_v40, %v1704_v57  ;;  %1936 = vadd.xlane.f32.xlu0 %v1935_v25  ;;  %v1939_v45 = vadd.f32 %v3086_v8, %v1938_v47  ;;  %v1871_v43 = vmul.f32 1.442695, %v1764_v52  ;;  %v5254_v47 = vld [vmem:[#allocation92_spill] sm:$0xff] }
 0x40c   : > { %v3102_v36 = vpop.eup %3101  ;;  %3127 = vpow2.f32 %v1911_v55  ;;  %v1943_v35 = vadd.f32 %v3100_v48, %v3098_v34  ;;  %v1869_v55 = vmul.f32 1.442695, %v1763_v58  ;;  %v1771_v3 = vsub.f32 %v5205_v59, %v1704_v57 }
 0x40d   : > { %v3104_v1 = vpop.eup %3103  ;;  %3129 = vpow2.f32 %v1849_v44  ;;  %v1772_v56 = vsub.f32 %v5207_v15, %v1704_v57  ;;  %v1940_v44 = vadd.f32 %v3088_v61, %v1939_v45  ;;  %v1777_v49 = vsub.f32 %v5202_v32, %v1714_v5 }
 0x40e   : > { %v3106_v63 = vpop.eup %3105  ;;  %3131 = vpow2.f32 %v1851_v16  ;;  %v1944_v51 = vadd.f32 %v3102_v36, %v1943_v35  ;;  %v1881_v16 = vmul.f32 1.442695, %v1769_v54  ;;  %v1883_v34 = vmul.f32 1.442695, %v1770_v41 }
 0x40f   : > { %v3108_v53 = vpop.eup %3107  ;;  %3133 = vpow2.f32 %v1853_v60  ;;  %v1778_v48 = vsub.f32 %v4345_v12, %v1714_v5  ;;  %1941 = vadd.xlane.f32.xlu1 %v1940_v44  ;;  %v1885_v58 = vmul.f32 1.442695, %v1771_v3  ;;  %v1779_v15 = vsub.f32 %v5208_v31, %v1714_v5 }
 0x410   : > { %v3110_v21 = vpop.eup %3109  ;;  %3135 = vpow2.f32 %v1855_v62  ;;  %v1945_v60 = vadd.f32 %v3104_v1, %v1944_v51  ;;  %v1887_v57 = vmul.f32 1.442695, %v1772_v56  ;;  %v1958_v32 = vadd.f32 %v4683_v28, %v4679_v11 }
 0x411   : > { %v4741_v30 = vpop.eup %3111  ;;  %3137 = vpow2.f32 %v1865_v17  ;;  %v1897_v62 = vmul.f32 1.442695, %v1777_v49  ;;  %v1780_v1 = vsub.f32 %v5254_v47, %v1714_v5  ;;  %v1899_v17 = vmul.f32 1.442695, %v1778_v48 }
 0x412   : > { %v3114_v8 = vpop.eup %3113  ;;  %3139 = vpow2.f32 %v1867_v19  ;;  %1946 = vadd.xlane.f32.xlu0 %v1945_v60  ;;  %v1901_v31 = vmul.f32 1.442695, %v1779_v15  ;;  %v1959_v41 = vadd.f32 %v4687_v22, %v1958_v32  ;;  %v1968_v11 = vadd.f32 %v4713_v27, %v4709_v9 }
 0x413   : > { %v3116_v59 = vpop.eup %3115  ;;  %3141 = vpow2.f32 %v1869_v55  ;;  %v1903_v35 = vmul.f32 1.442695, %v1780_v1  ;;  %v1978_v55 = vadd.f32 %v3108_v53, %v3106_v63 }
 0x414   : > { %v3118_v61 = vpop.eup %3117  ;;  %3143 = vpow2.f32 %v1871_v43  ;;  %v1948_v52 = vadd.f32 %v3116_v59, %v3114_v8  ;;  %v1960_v56 = vadd.f32 %v4692_v2, %v1959_v41  ;;  %v1969_v44 = vadd.f32 %v4718_v20, %v1968_v11  ;;  %v5259_v41 = vld [vmem:[#allocation103_spill] sm:$0xff] }
 0x415   : > { %v3120_v36 = vpop.eup %3119  ;;  %3145 = vpow2.f32 %v1881_v16  ;;  %v1979_v27 = vadd.f32 %v3110_v21, %v1978_v55 }
 0x416   : > { %v3122_v25 = vpop.eup %3121  ;;  %3147 = vpow2.f32 %v1883_v34  ;;  %v1949_v19 = vadd.f32 %v3118_v61, %v1948_v52  ;;  %v1970_v48 = vadd.f32 %v4724_v7, %v1969_v44 }
 0x417   : > { %v3124_v40 = vpop.eup %3123  ;;  %3149 = vpow2.f32 %v1885_v58  ;;  %v1980_v61 = vadd.f32 %v4741_v30, %v1979_v27 }
 0x418   : > { %v3126_v54 = vpop.eup %3125  ;;  %3151 = vpow2.f32 %v1887_v57  ;;  %v1950_v0 = vadd.f32 %v3120_v36, %v1949_v19  ;;  %v1988_v63 = vadd.f32 %v3124_v40, %v3122_v25  ;;  %v5255_v40 = vld [vmem:[#allocation97_spill] sm:$0xff] }
 0x419   : > { %v3128_v28 = vpop.eup %3127  ;;  %3153 = vpow2.f32 %v1897_v62 }
 0x41a   : > { %v3130_v45 = vpop.eup %3129  ;;  %3155 = vpow2.f32 %v1899_v17  ;;  %1951 = vadd.xlane.f32.xlu1 %v1950_v0  ;;  %v1989_v57 = vadd.f32 %v3126_v54, %v1988_v63  ;;  %v5258_v0 = vld [vmem:[#allocation101_spill] sm:$0xff] }
 0x41b   : > { %v3132_v5 = vpop.eup %3131  ;;  %3157 = vpow2.f32 %v1901_v31  ;;  %v5256_v31 = vld [vmem:[#allocation99_spill] sm:$0xff]  ;;  %v5260_v11 = vsub.f32 %v5258_v0, %v5259_v41 }
 0x41c   : > { %v3134_v43 = vpop.eup %3133  ;;  %v1953_v3 = vadd.f32 %v3132_v5, %v3130_v45  ;;  %3159 = vpow2.f32 %v1903_v35  ;;  %v1990_v25 = vadd.f32 %v3128_v28, %v1989_v57  ;;  %v5257_v30 = vsub.f32 %v5255_v40, %v5256_v31  ;;  %v5261_v35 = vld [vmem:[#allocation96_spill] sm:$0xff]  ;;  %v5262_v5 = vld [vmem:[#allocation98_spill] sm:$0xff]  ;;  %v1613_v41 = vld [vmem:[#allocation5 + $0x20] sm:$0xff] }
 0x41d   : > { %v3136_v51 = vpop.eup %3135  ;;  %v1579_v45 = vmul.f32 1.442695, %v5260_v11  ;;  %v5263_v55 = vsub.f32 %v5261_v35, %v5262_v5  ;;  %v5281_v35 = vld [vmem:[#allocation113_spill] sm:$0xff] }
 0x41e   : > { %v3138_v22 = vpop.eup %3137  ;;  %v1954_v16 = vadd.f32 %v3134_v43, %v1953_v3  ;;  %1961 = vadd.xlane.f32.xlu1 %v1960_v56  ;;  %v1577_v54 = vmul.f32 1.442695, %v5257_v30  ;;  %v5264_v43 = vld [vmem:[#allocation100_spill] sm:$0xff]  ;;  %v5265_v3 = vld [vmem:[#allocation102_spill] sm:$0xff] }
 0x41f   : > { %v3140_v9 = vpop.eup %3139  ;;  %v1581_v28 = vmul.f32 1.442695, %v5263_v55  ;;  %v5266_v56 = vsub.f32 %v5264_v43, %v5265_v3  ;;  %v5283_v43 = vld [vmem:[#allocation114_spill] sm:$0xff]  ;;  %v5284_v3 = vld [vmem:[#allocation116_spill] sm:$0xff] }
 0x420   : > { %v3142_v49 = vpop.eup %3141  ;;  %v1955_v8 = vadd.f32 %v3136_v51, %v1954_v16  ;;  %v1963_v34 = vadd.f32 %v3140_v9, %v3138_v22  ;;  %3161 = vpow2.f32 %v1577_v54  ;;  %v5267_v51 = vld [vmem:[#allocation105_spill] sm:$0xff]  ;;  %v5268_v22 = vld [vmem:[#allocation106_spill] sm:$0xff] }
 0x421   : > { %v3144_v53 = vpop.eup %3143  ;;  %3163 = vpow2.f32 %v1579_v45  ;;  %v1583_v44 = vmul.f32 1.442695, %v5266_v56  ;;  %v5269_v16 = vsub.f32 %v5267_v51, %v5268_v22  ;;  %v5280_v45 = vld [vmem:[#allocation111_spill] sm:$0xff]  ;;  %v5285_v56 = vsub.f32 %v5283_v43, %v5284_v3  ;;  %v1620_v3 = vld [vmem:[#allocation5 + $0x58] sm:$0xff] }
 0x422   : > { %v3146_v60 = vpop.eup %3145  ;;  %1956 = vadd.xlane.f32.xlu0 %v1955_v8  ;;  %v1964_v59 = vadd.f32 %v3142_v49, %v1963_v34  ;;  %1971 = vadd.xlane.f32.xlu1 %v1970_v48  ;;  %3165 = vpow2.f32 %v1581_v28  ;;  %v1609_v49 = vld [vmem:[#allocation5] sm:$0xff]  ;;  %v5270_v8 = vld [vmem:[#allocation104_spill] sm:$0xff]  ;;  %v5282_v5 = vsub.f32 %v5280_v45, %v5281_v35 }
 0x423   : > { %v3148_v2 = vpop.eup %3147  ;;  %v1585_v9 = vmul.f32 1.442695, %v5269_v16  ;;  %3167 = vpow2.f32 %v1583_v44  ;;  %v5271_v34 = vsub.f32 %v5270_v8, %v4470_v18  ;;  %v5274_v18 = vld [vmem:[#allocation107_spill] sm:$0xff]  ;;  %v1599_v44 = vmul.f32 1.442695, %v5285_v56 }
 0x424   : > { %v3150_v20 = vpop.eup %3149  ;;  %v1965_v58 = vadd.f32 %v3144_v53, %v1964_v59  ;;  %v1973_v15 = vadd.f32 %v3148_v2, %v3146_v60  ;;  %v5272_v60 = vld [vmem:[#allocation108_spill] sm:$0xff]  ;;  %v1593_v55 = vmul.f32 1.442695, %v5282_v5  ;;  %v5286_v8 = vld [vmem:[#allocation115_spill] sm:$0xff] }
 0x425   : > { %v3152_v52 = vpop.eup %3151  ;;  %v1587_v48 = vmul.f32 1.442695, %v5271_v34  ;;  %3169 = vpow2.f32 %v1585_v9  ;;  %v5273_v59 = vsub.f32 %v5272_v60, %v4492_v39  ;;  %v1614_v9 = vld [vmem:[#allocation5 + $0x28] sm:$0xff]  ;;  %v5287_v34 = vld [vmem:[#allocation117_spill] sm:$0xff]  ;;  %v5289_v60 = vld [vmem:[#allocation118_spill] sm:$0xff] }
 0x426   : > { %v3154_v21 = vpop.eup %3153  ;;  %1966 = vadd.xlane.f32.xlu0 %v1965_v58  ;;  %v1974_v32 = vadd.f32 %v3150_v20, %v1973_v15  ;;  %1981 = vadd.xlane.f32.xlu1 %v1980_v61  ;;  %v1610_v15 = vld [vmem:[#allocation5 + $0x8] sm:$0xff]  ;;  %v1617_v43 = vld [vmem:[#allocation5 + $0x40] sm:$0xff] }
 0x427   : > { %v3156_v36 = vpop.eup %3155  ;;  %v1589_v2 = vmul.f32 1.442695, %v5273_v59  ;;  %3171 = vpow2.f32 %v1587_v48  ;;  %v5288_v48 = vsub.f32 %v5286_v8, %v5287_v34  ;;  %v5290_v59 = vld [vmem:[#allocation120_spill] sm:$0xff] }
 0x428   : > { %v1975_v7 = vadd.f32 %v3152_v52, %v1974_v32  ;;  %v1983_v62 = vadd.f32 %v3156_v36, %v3154_v21  ;;  %v3158_v47 = vpop.eup %3157  ;;  %v1611_v21 = vld [vmem:[#allocation5 + $0x10] sm:$0xff]  ;;  %v1622_v8 = vld [vmem:[#allocation5 + $0x68] sm:$0xff] }
 0x429   : > { %v3160_v17 = vpop.eup %3159  ;;  %3173 = vpow2.f32 %v1589_v2  ;;  %v5275_v32 = vld [vmem:[#allocation109_spill] sm:$0xff]  ;;  %v5291_v2 = vsub.f32 %v5289_v60, %v5290_v59 }
 0x42a   : > { %1976 = vadd.xlane.f32.xlu0 %v1975_v7  ;;  %v1984_v1 = vadd.f32 %v3158_v47, %v1983_v62  ;;  %1991 = vadd.xlane.f32.xlu1 %v1990_v25  ;;  %v5276_v36 = vsub.f32 %v5274_v18, %v5275_v32  ;;  %v1612_v47 = vld [vmem:[#allocation5 + $0x18] sm:$0xff] }
 0x42c   : > { %v1985_v19 = vadd.f32 %v3160_v17, %v1984_v1  ;;  %v1591_v7 = vmul.f32 1.442695, %v5276_v36  ;;  %v5277_v17 = vld [vmem:[#allocation110_spill] sm:$0xff] }
 0x42d   : > { %v3162_v27 = vpop.eup %3161 }
 0x42e   : > { %1986 = vadd.xlane.f32.xlu0 %v1985_v19  ;;  %v1625_v63 = vmul.f32 %v3162_v27, %v1609_v49  ;;  %v3164_v58 = vpop.eup %3163  ;;  %3175 = vpow2.f32 %v1591_v7  ;;  %v5278_v19 = vld [vmem:[#allocation112_spill] sm:$0xff]  ;;  %v5295_v7 = vld [vmem:[#allocation122_spill] sm:$0xff] }
 0x42f   : > { %v1626_v61 = vmul.f32 %v3164_v58, %v1610_v15  ;;  %v3166_v57 = vpop.eup %3165  ;;  %v5279_v40 = vsub.f32 %v5277_v17, %v5278_v19  ;;  %v1616_v17 = vld [vmem:[#allocation5 + $0x38] sm:$0xff]  ;;  %v5298_v19 = vld [vmem:[#allocation123_spill] sm:$0xff] }
 0x430   : > { %v3168_v25 = vpop.eup %3167  ;;  %v1627_v39 = vmul.f32 %v3166_v57, %v1611_v21  ;;  %v5293_v21 = vld [vmem:[#allocation121_spill] sm:$0xff] }
 0x431   : > { %v1595_v31 = vmul.f32 1.442695, %v5279_v40  ;;  %v1628_v0 = vmul.f32 %v3168_v25, %v1612_v47  ;;  %v5299_v40 = vld [vmem:[#allocation125_spill] sm:$0xff] }
 0x432   : > { %v3170_v54 = vpop.eup %3169 }
 0x433   : > { %3177 = vpow2.f32 %v1595_v31  ;;  %v1629_v51 = vmul.f32 %v3170_v54, %v1613_v41  ;;  %v5300_v31 = vsub.f32 %v5298_v19, %v5299_v40 }
 0x434   : > { %v3172_v22 = vpop.eup %3171  ;;  %3179 = vpow2.f32 %v1593_v55 }
 0x435   : > { %3181 = vpow2.f32 %v1599_v44  ;;  %v1630_v58 = vmul.f32 %v3172_v22, %v1614_v9 }
 0x436   : > { %v3174_v49 = vpop.eup %3173 }
 0x485   : > { %v1917_v53 = vpop.xlane.xlu1 %1916 }
 0x486   : > { %v1993_v20 = vadd.f32 %v1917_v53, %v1625_v63  ;;  %v1597_v63 = vmul.f32 1.442695, %v5288_v48  ;;  %v1615_v53 = vld [vmem:[#allocation5 + $0x30] sm:$0xff] }
 0x487   : > { %v1631_v57 = vmul.f32 %v3174_v49, %v1615_v53  ;;  %v1619_v49 = vld [vmem:[#allocation5 + $0x50] sm:$0xff] }
 0x488   : > { %2010 = vst.msk [vmem:[#allocation5] sm:$0xff] %vm2009_vm1, %v1993_v20  ;;  %v1603_v20 = vmul.f32 1.442695, %v5291_v2  ;;  %3183 = vpow2.f32 %v1597_v63 }
 0x489   : > { %v1922_v52 = vpop.xlane.xlu0 %1921 }
 0x48a   : > { %v1994_v62 = vadd.f32 %v1922_v52, %v1626_v61  ;;  %v5292_v52 = vld [vmem:[#allocation119_spill] sm:$0xff]  ;;  %3185 = vpow2.f32 %v1603_v20 }
 0x48b   : > { %v5294_v18 = vsub.f32 %v5292_v52, %v5293_v21 }
 0x48c   : > { %2011 = vst.msk [vmem:[#allocation5 + $0x8] sm:$0xff] %vm2009_vm1, %v1994_v62  ;;  %v5296_v62 = vld [vmem:[#allocation124_spill] sm:$0xff] }
 0x48d   : > { %v1601_v32 = vmul.f32 1.442695, %v5294_v18  ;;  %v5297_v25 = vsub.f32 %v5295_v7, %v5296_v62  ;;  %v1623_v7 = vld [vmem:[#allocation5 + $0x70] sm:$0xff] }
 0x48e   : > { %v1927_v1 = vpop.xlane.xlu0 %1926 }
 0x48f   : > { %v1995_v30 = vadd.f32 %v1927_v1, %v1627_v39  ;;  %v1607_v39 = vmul.f32 1.442695, %v5297_v25  ;;  %v3176_v1 = vpop.eup %3175  ;;  %3187 = vpow2.f32 %v1601_v32 }
 0x490   : > { %v1632_v54 = vmul.f32 %v3176_v1, %v1616_v17 }
 0x491   : > { %2012 = vst.msk [vmem:[#allocation5 + $0x10] sm:$0xff] %vm2009_vm1, %v1995_v30  ;;  %3189 = vpow2.f32 %v1607_v39  ;;  %v1605_v30 = vmul.f32 1.442695, %v5300_v31 }
 0x493   : > { %v1932_v11 = vpop.xlane.xlu1 %1931  ;;  %3191 = vpow2.f32 %v1605_v30 }
 0x494   : > { %v1996_v28 = vadd.f32 %v1932_v11, %v1628_v0  ;;  %v1937_v16 = vpop.xlane.xlu0 %1936  ;;  %v3178_v0 = vpop.eup %3177  ;;  %v1618_v11 = vld [vmem:[#allocation5 + $0x48] sm:$0xff] }
 0x495   : > { %v1997_v27 = vadd.f32 %v1937_v16, %v1629_v51  ;;  %v3180_v35 = vpop.eup %3179  ;;  %v1634_v5 = vmul.f32 %v3178_v0, %v1618_v11 }
 0x496   : > { %2013 = vst.msk [vmem:[#allocation5 + $0x18] sm:$0xff] %vm2009_vm1, %v1996_v28  ;;  %v3182_v55 = vpop.eup %3181  ;;  %v1633_v51 = vmul.f32 %v3180_v35, %v1617_v43 }
 0x497   : > { %2014 = vst.msk [vmem:[#allocation5 + $0x20] sm:$0xff] %vm2009_vm1, %v1997_v27  ;;  %v3184_v44 = vpop.eup %3183  ;;  %v1636_v22 = vmul.f32 %v3182_v55, %v1620_v3 }
 0x498   : > { %v1942_v15 = vpop.xlane.xlu1 %1941  ;;  %v3186_v16 = vpop.eup %3185  ;;  %v1635_v53 = vmul.f32 %v3184_v44, %v1619_v49 }
 0x499   : > { %v1998_v61 = vadd.f32 %v1942_v15, %v1630_v58  ;;  %v1638_v60 = vmul.f32 %v3186_v16, %v1622_v8  ;;  %v1621_v58 = vld [vmem:[#allocation5 + $0x60] sm:$0xff]  ;;  %v1624_v15 = vld [vmem:[#allocation5 + $0x78] sm:$0xff] }
 0x49b   : > { %v1947_v36 = vpop.xlane.xlu0 %1946  ;;  %2015 = vst.msk [vmem:[#allocation5 + $0x28] sm:$0xff] %vm2009_vm1, %v1998_v61 }
 0x49c   : > { %v1999_v47 = vadd.f32 %v1947_v36, %v1631_v57  ;;  %v3188_v63 = vpop.eup %3187 }
 0x49d   : > { %v1637_v52 = vmul.f32 %v3188_v63, %v1621_v58 }
 0x49e   : > { %2016 = vst.msk [vmem:[#allocation5 + $0x30] sm:$0xff] %vm2009_vm1, %v1999_v47  ;;  %v3190_v59 = vpop.eup %3189 }
 0x49f   : > { %v1640_v21 = vmul.f32 %v3190_v59, %v1624_v15 }
 0x4a0   : > { %v3192_v18 = vpop.eup %3191 }
 0x4a1   : > { %v1639_v39 = vmul.f32 %v3192_v18, %v1623_v7 }
 0x4a3   : > { %v1952_v41 = vpop.xlane.xlu1 %1951 }
 0x4a4   : > { %v2000_v45 = vadd.f32 %v1952_v41, %v1632_v54 }
 0x4a6   : > { %2017 = vst.msk [vmem:[#allocation5 + $0x38] sm:$0xff] %vm2009_vm1, %v2000_v45 }
 0x4a7   : > { %v1962_v28 = vpop.xlane.xlu1 %1961 }
 0x4a8   : > { %v2002_v56 = vadd.f32 %v1962_v28, %v1634_v5 }
 0x4aa   : > { %2019 = vst.msk [vmem:[#allocation5 + $0x48] sm:$0xff] %vm2009_vm1, %v2002_v56 }
 0x4ab   : > { %v1957_v9 = vpop.xlane.xlu0 %1956  ;;  %v1972_v27 = vpop.xlane.xlu1 %1971 }
 0x4ac   : > { %v2001_v34 = vadd.f32 %v1957_v9, %v1633_v51  ;;  %v2004_v48 = vadd.f32 %v1972_v27, %v1636_v22 }
 0x4ae   : > { %2018 = vst.msk [vmem:[#allocation5 + $0x40] sm:$0xff] %vm2009_vm1, %v2001_v34  ;;  %2021 = vst.msk [vmem:[#allocation5 + $0x58] sm:$0xff] %vm2009_vm1, %v2004_v48 }
 0x4af   : > { %v1967_v2 = vpop.xlane.xlu0 %1966  ;;  %v1982_v20 = vpop.xlane.xlu1 %1981 }
 0x4b0   : > { %v2003_v61 = vadd.f32 %v1967_v2, %v1635_v53  ;;  %v2006_v57 = vadd.f32 %v1982_v20, %v1638_v60 }
 0x4b2   : > { %2020 = vst.msk [vmem:[#allocation5 + $0x50] sm:$0xff] %vm2009_vm1, %v2003_v61  ;;  %2023 = vst.msk [vmem:[#allocation5 + $0x68] sm:$0xff] %vm2009_vm1, %v2006_v57 }
 0x4b3   : > { %v1977_v32 = vpop.xlane.xlu0 %1976  ;;  %v1992_v36 = vpop.xlane.xlu1 %1991 }
 0x4b4   : > { %v2005_v62 = vadd.f32 %v1977_v32, %v1637_v52  ;;  %v2008_v25 = vadd.f32 %v1992_v36, %v1640_v21 }
 0x4b6   : > { %2022 = vst.msk [vmem:[#allocation5 + $0x60] sm:$0xff] %vm2009_vm1, %v2005_v62  ;;  %2025 = vst.msk [vmem:[#allocation5 + $0x78] sm:$0xff] %vm2009_vm1, %v2008_v25 }
 0x4b7   : > { %v1987_v47 = vpop.xlane.xlu0 %1986 }
 0x4b8   : > { %v2007_v1 = vadd.f32 %v1987_v47, %v1639_v39 }
 0x4ba   : > { %2024 = vst.msk [vmem:[#allocation5 + $0x70] sm:$0xff] %vm2009_vm1, %v2007_v1 }
 0x4bb PF: > { %p2763_p11 = scmp.ne.s32.totalorder %s3613_s23, 1 }
 0x4bd   : > { %2045 = sbr.rel (%p2763_p11) target bundleno = 1253 (0x4e5), region = 55 }
 0x4c2   : > { %v2062_v17 = vld [vmem:[#allocation5] sm:$0xff]  ;;  %v2063_v19 = vld [vmem:[#allocation5 + $0x8] sm:$0xff]  ;;  %v2064_v40 = vld [vmem:[#allocation5 + $0x10] sm:$0xff]  ;;  %vm2126_vm2 = vcmask 7168  }
 0x4c3   : > { %3193 = vlog2.f32 %v2062_v17  ;;  %v2065_v31 = vld [vmem:[#allocation5 + $0x18] sm:$0xff]  ;;  %v2066_v30 = vld [vmem:[#allocation5 + $0x20] sm:$0xff]  ;;  %v2067_v54 = vld [vmem:[#allocation5 + $0x28] sm:$0xff] }
 0x4c4   : > { %3195 = vlog2.f32 %v2063_v19  ;;  %v2068_v0 = vld [vmem:[#allocation5 + $0x30] sm:$0xff]  ;;  %v2069_v41 = vld [vmem:[#allocation5 + $0x38] sm:$0xff]  ;;  %v2070_v11 = vld [vmem:[#allocation5 + $0x40] sm:$0xff] }
 0x4c5   : > { %3197 = vlog2.f32 %v2064_v40  ;;  %v2071_v45 = vld [vmem:[#allocation5 + $0x48] sm:$0xff]  ;;  %v2072_v35 = vld [vmem:[#allocation5 + $0x50] sm:$0xff]  ;;  %v2073_v5 = vld [vmem:[#allocation5 + $0x58] sm:$0xff] }
 0x4c6   : > { %3199 = vlog2.f32 %v2065_v31  ;;  %v2074_v55 = vld [vmem:[#allocation5 + $0x60] sm:$0xff]  ;;  %v2075_v28 = vld [vmem:[#allocation5 + $0x68] sm:$0xff]  ;;  %v2076_v43 = vld [vmem:[#allocation5 + $0x70] sm:$0xff] }
 0x4c7   : > { %3201 = vlog2.f32 %v2066_v30  ;;  %v2077_v3 = vld [vmem:[#allocation5 + $0x78] sm:$0xff]  ;;  %v2046_v44 = vld [vmem:[#allocation4] sm:$0xff]  ;;  %v2047_v16 = vld [vmem:[#allocation4 + $0x8] sm:$0xff] }
 0x4c8   : > { %3203 = vlog2.f32 %v2067_v54  ;;  %v2048_v49 = vld [vmem:[#allocation4 + $0x10] sm:$0xff]  ;;  %v2049_v63 = vld [vmem:[#allocation4 + $0x18] sm:$0xff]  ;;  %v2050_v2 = vld [vmem:[#allocation4 + $0x20] sm:$0xff] }
 0x4c9   : > { %3205 = vlog2.f32 %v2068_v0  ;;  %v2051_v61 = vld [vmem:[#allocation4 + $0x28] sm:$0xff]  ;;  %v2052_v18 = vld [vmem:[#allocation4 + $0x30] sm:$0xff]  ;;  %v2053_v62 = vld [vmem:[#allocation4 + $0x38] sm:$0xff] }
 0x4ca   : > { %3207 = vlog2.f32 %v2069_v41  ;;  %v2054_v1 = vld [vmem:[#allocation4 + $0x40] sm:$0xff]  ;;  %v2055_v31 = vld [vmem:[#allocation4 + $0x48] sm:$0xff]  ;;  %v2056_v41 = vld [vmem:[#allocation4 + $0x50] sm:$0xff] }
 0x4cb   : > { %3209 = vlog2.f32 %v2070_v11 }
 0x4cc   : > { %3211 = vlog2.f32 %v2071_v45 }
 0x4cd   : > { %3213 = vlog2.f32 %v2072_v35 }
 0x4ce   : > { %3215 = vlog2.f32 %v2073_v5  ;;  %v2057_v5 = vld [vmem:[#allocation4 + $0x58] sm:$0xff] }
 0x4cf   : > { %3217 = vlog2.f32 %v2074_v55 }
 0x4d0   : > { %v3194_v56 = vpop.eup %3193  ;;  %3219 = vlog2.f32 %v2075_v28 }
 0x4d1   : > { %v3196_v51 = vpop.eup %3195  ;;  %v2079_v22 = vmul.f32 0.6931472, %v3194_v56  ;;  %3221 = vlog2.f32 %v2076_v43 }
 0x4d2   : > { %v3198_v9 = vpop.eup %3197  ;;  %v2081_v27 = vmul.f32 0.6931472, %v3196_v51  ;;  %3223 = vlog2.f32 %v2077_v3  ;;  %v2058_v3 = vld [vmem:[#allocation4 + $0x60] sm:$0xff] }
 0x4d3   : > { %v3200_v8 = vpop.eup %3199  ;;  %v2110_v34 = vadd.f32 %v2079_v22, %v2046_v44  ;;  %v2083_v48 = vmul.f32 0.6931472, %v3198_v9  ;;  %v2059_v22 = vld [vmem:[#allocation4 + $0x68] sm:$0xff] }
 0x4d4   : > { %v3202_v53 = vpop.eup %3201  ;;  %v2111_v60 = vadd.f32 %v2081_v27, %v2047_v16  ;;  %v2085_v59 = vmul.f32 0.6931472, %v3200_v8 }
 0x4d5   : > { %v3204_v20 = vpop.eup %3203  ;;  %2127 = vst.msk [vmem:[#allocation6] sm:$0xff] %vm2126_vm2, %v2110_v34  ;;  %v2112_v58 = vadd.f32 %v2083_v48, %v2048_v49  ;;  %v2087_v15 = vmul.f32 0.6931472, %v3202_v53  ;;  %v2060_v49 = vld [vmem:[#allocation4 + $0x70] sm:$0xff] }
 0x4d6   : > { %v3206_v57 = vpop.eup %3205  ;;  %2128 = vst.msk [vmem:[#allocation6 + $0x8] sm:$0xff] %vm2126_vm2, %v2111_v60  ;;  %v2113_v52 = vadd.f32 %v2085_v59, %v2049_v63  ;;  %v2089_v21 = vmul.f32 0.6931472, %v3204_v20  ;;  %v2061_v63 = vld [vmem:[#allocation4 + $0x78] sm:$0xff] }
 0x4d7   : > { %v3208_v32 = vpop.eup %3207  ;;  %2129 = vst.msk [vmem:[#allocation6 + $0x10] sm:$0xff] %vm2126_vm2, %v2112_v58  ;;  %v2114_v36 = vadd.f32 %v2087_v15, %v2050_v2  ;;  %v2091_v7 = vmul.f32 0.6931472, %v3206_v57 }
 0x4d8   : > { %v3210_v25 = vpop.eup %3209  ;;  %2130 = vst.msk [vmem:[#allocation6 + $0x18] sm:$0xff] %vm2126_vm2, %v2113_v52  ;;  %v2115_v39 = vadd.f32 %v2089_v21, %v2051_v61  ;;  %v2093_v47 = vmul.f32 0.6931472, %v3208_v32 }
 0x4d9   : > { %v3212_v17 = vpop.eup %3211  ;;  %2131 = vst.msk [vmem:[#allocation6 + $0x20] sm:$0xff] %vm2126_vm2, %v2114_v36  ;;  %v2116_v19 = vadd.f32 %v2091_v7, %v2052_v18  ;;  %v2095_v40 = vmul.f32 0.6931472, %v3210_v25 }
 0x4da   : > { %v3214_v30 = vpop.eup %3213  ;;  %2132 = vst.msk [vmem:[#allocation6 + $0x28] sm:$0xff] %vm2126_vm2, %v2115_v39  ;;  %v2117_v54 = vadd.f32 %v2093_v47, %v2053_v62  ;;  %v2097_v0 = vmul.f32 0.6931472, %v3212_v17 }
 0x4db   : > { %v3216_v11 = vpop.eup %3215  ;;  %2133 = vst.msk [vmem:[#allocation6 + $0x30] sm:$0xff] %vm2126_vm2, %v2116_v19  ;;  %v2118_v45 = vadd.f32 %v2095_v40, %v2054_v1  ;;  %v2099_v35 = vmul.f32 0.6931472, %v3214_v30 }
 0x4dc   : > { %v3218_v55 = vpop.eup %3217  ;;  %2134 = vst.msk [vmem:[#allocation6 + $0x38] sm:$0xff] %vm2126_vm2, %v2117_v54  ;;  %v2119_v28 = vadd.f32 %v2097_v0, %v2055_v31  ;;  %v2101_v43 = vmul.f32 0.6931472, %v3216_v11 }
 0x4dd   : > { %v3220_v56 = vpop.eup %3219  ;;  %2135 = vst.msk [vmem:[#allocation6 + $0x40] sm:$0xff] %vm2126_vm2, %v2118_v45  ;;  %v2120_v44 = vadd.f32 %v2099_v35, %v2056_v41  ;;  %v2103_v51 = vmul.f32 0.6931472, %v3218_v55 }
 0x4de   : > { %v3222_v16 = vpop.eup %3221  ;;  %2136 = vst.msk [vmem:[#allocation6 + $0x48] sm:$0xff] %vm2126_vm2, %v2119_v28  ;;  %v2121_v9 = vadd.f32 %v2101_v43, %v2057_v5  ;;  %v2105_v27 = vmul.f32 0.6931472, %v3220_v56 }
 0x4df   : > { %v3224_v8 = vpop.eup %3223  ;;  %2137 = vst.msk [vmem:[#allocation6 + $0x50] sm:$0xff] %vm2126_vm2, %v2120_v44  ;;  %v2122_v34 = vadd.f32 %v2103_v51, %v2058_v3  ;;  %v2107_v48 = vmul.f32 0.6931472, %v3222_v16 }
 0x4e0   : > { %2138 = vst.msk [vmem:[#allocation6 + $0x58] sm:$0xff] %vm2126_vm2, %v2121_v9  ;;  %v2123_v53 = vadd.f32 %v2105_v27, %v2059_v22  ;;  %v2109_v60 = vmul.f32 0.6931472, %v3224_v8 }
 0x4e1   : > { %2139 = vst.msk [vmem:[#allocation6 + $0x60] sm:$0xff] %vm2126_vm2, %v2122_v34  ;;  %v2124_v59 = vadd.f32 %v2107_v48, %v2060_v49 }
 0x4e2   : > { %2140 = vst.msk [vmem:[#allocation6 + $0x68] sm:$0xff] %vm2126_vm2, %v2123_v53  ;;  %v2125_v2 = vadd.f32 %v2109_v60, %v2061_v63 }
 0x4e3   : > { %2141 = vst.msk [vmem:[#allocation6 + $0x70] sm:$0xff] %vm2126_vm2, %v2124_v59 }
 0x4e4   : > { %2142 = vst.msk [vmem:[#allocation6 + $0x78] sm:$0xff] %vm2126_vm2, %v2125_v2 }
 0x4e5 PF: > { %p2764_p7 = scmp.lt.s32.totalorder %s3613_s23, 2 }
 0x4e7   : > { %2146 = sbr.rel (%p2764_p7) target bundleno = 1420 (0x58c), region = 59 }
 0x4ec   : > { %v2149_v20 = vld [vmem:[#allocation6 + $0x10] sm:$0xff]  ;;  %v2147_v58 = vld [vmem:[#allocation6] sm:$0xff]  ;;  %v3648_v15 = vmov 0   ;;  %v2150_v61 = vld [vmem:[#allocation6 + $0x18] sm:$0xff] }
 0x4ed   : > { %3226 = vset.pattern.permute.xlu1 %v3648_v15  ;;  %3225 = vset.pattern.permute.xlu0 %v3648_v15  ;;  %v2148_v57 = vld [vmem:[#allocation6 + $0x8] sm:$0xff]  ;;  %v2151_v21 = vld [vmem:[#allocation6 + $0x20] sm:$0xff]  ;;  %v2154_v18 = vld [vmem:[#allocation6 + $0x38] sm:$0xff] }
 0x4ee   : > { %2175 = vperm.xlu1 %3226, %v2149_v20   ;;  %2165 = vperm.xlu0 %3225, %v2147_v58   ;;  %v2152_v52 = vld [vmem:[#allocation6 + $0x28] sm:$0xff]  ;;  %v2153_v32 = vld [vmem:[#allocation6 + $0x30] sm:$0xff]  ;;  %v2155_v7 = vld [vmem:[#allocation6 + $0x40] sm:$0xff] }
 0x4ef   : > { %v2156_v36 = vld [vmem:[#allocation6 + $0x48] sm:$0xff]  ;;  %v2158_v62 = vld [vmem:[#allocation6 + $0x58] sm:$0xff]  ;;  %v2157_v25 = vld [vmem:[#allocation6 + $0x50] sm:$0xff] }
 0x4f0   : > { %v2160_v39 = vld [vmem:[#allocation6 + $0x68] sm:$0xff]  ;;  %v2159_v47 = vld [vmem:[#allocation6 + $0x60] sm:$0xff]  ;;  %v2162_v1 = vld [vmem:[#allocation6 + $0x78] sm:$0xff] }
 0x4f1   : > { %v2161_v17 = vld [vmem:[#allocation6 + $0x70] sm:$0xff]  ;;  %v5302_v11 = vld [vmem:[#allocation48_spill] sm:$0xff]  ;;  %v5303_v35 = vld [vmem:[#allocation50_spill] sm:$0xff] }
 0x4f2   : > { %2180 = vperm.xlu1 %3226, %v2150_v61   ;;  %2170 = vperm.xlu0 %3225, %v2148_v57   ;;  %v5301_v30 = vld [vmem:[#allocation53_spill] sm:$0xff]  ;;  %v5306_v3 = vld [vmem:[#allocation55_spill] sm:$0xff]  ;;  %v5308_v49 = vld [vmem:[#allocation52_spill] sm:$0xff] }
 0x4f3   : > { %v5304_v55 = vld [vmem:[#allocation49_spill] sm:$0xff]  ;;  %v5307_v9 = vld [vmem:[#allocation51_spill] sm:$0xff]  ;;  %v5310_v34 = vld [vmem:[#allocation62_spill] sm:$0xff] }
 0x4f4   : > { %v5311_v63 = vld [vmem:[#allocation61_spill] sm:$0xff]  ;;  %v5312_v60 = vld [vmem:[#allocation63_spill] sm:$0xff]  ;;  %v5313_v2 = vld [vmem:[#allocation56_spill] sm:$0xff] }
 0x4f5   : > { %v5314_v58 = vld [vmem:[#allocation58_spill] sm:$0xff]  ;;  %v5315_v61 = vld [vmem:[#allocation57_spill] sm:$0xff] }
 0x4f6   : > { %2190 = vperm.xlu1 %3226, %v2152_v52   ;;  %2185 = vperm.xlu0 %3225, %v2151_v21   ;;  %v5316_v52 = vld [vmem:[#allocation59_spill] sm:$0xff] }
 0x4fa   : > { %2200 = vperm.xlu1 %3226, %v2154_v18   ;;  %2195 = vperm.xlu0 %3225, %v2153_v32  }
 0x4fe   : > { %2210 = vperm.xlu1 %3226, %v2156_v36   ;;  %2205 = vperm.xlu0 %3225, %v2155_v7  }
 0x502   : > { %2220 = vperm.xlu1 %3226, %v2158_v62   ;;  %2215 = vperm.xlu0 %3225, %v2157_v25  }
 0x506   : > { %2230 = vperm.xlu1 %3226, %v2160_v39   ;;  %2225 = vperm.xlu0 %3225, %v2159_v47   ;;  %v5317_v39 = vld [vmem:[#allocation64_spill] sm:$0xff] }
 0x50a   : > { %2240 = vperm.xlu1 %3226, %v2162_v1   ;;  %2235 = vperm.xlu0 %3225, %v2161_v17   ;;  %v5318_v1 = vld [vmem:[#allocation65_spill] sm:$0xff] }
 0x569   : > { %v2176_v19 = vpop.permute.xlu1 %2175  ;;  %v2166_v40 = vpop.permute.xlu0 %2165 }
 0x56a   : > { %v2251_v31 = vsub.f32 %v4195_v37, %v2176_v19  ;;  %v2252_v54 = vsub.f32 %v5301_v30, %v2176_v19  ;;  %v2253_v0 = vsub.f32 %v4198_v38, %v2176_v19  ;;  %v2254_v41 = vsub.f32 %v4204_v42, %v2176_v19  ;;  %v5305_v42 = vld [vmem:[#allocation54_spill] sm:$0xff] }
 0x56b   : > { %v2243_v45 = vsub.f32 %v5302_v11, %v2166_v40  ;;  %v2244_v5 = vsub.f32 %v5303_v35, %v2166_v40  ;;  %v2245_v28 = vsub.f32 %v5304_v55, %v2166_v40  ;;  %v2246_v43 = vsub.f32 %v4180_v26, %v2166_v40 }
 0x56c   : > { %2315 = vst [vmem:[%s3871_s13 + $0x40] sm:$0xff] %v2251_v31  ;;  %2316 = vst [vmem:[%s3871_s13 + $0x48] sm:$0xff] %v2252_v54  ;;  %v5321_v31 = vld [vmem:[#allocation71_spill] sm:$0xff]  ;;  %v5322_v54 = vld [vmem:[#allocation73_spill] sm:$0xff] }
 0x56d   : > { %2317 = vst [vmem:[%s3871_s13 + $0x50] sm:$0xff] %v2253_v0  ;;  %2318 = vst [vmem:[%s3871_s13 + $0x58] sm:$0xff] %v2254_v41  ;;  %v2181_v37 = vpop.permute.xlu1 %2180  ;;  %v2171_v38 = vpop.permute.xlu0 %2170  ;;  %v5323_v41 = vld [vmem:[#allocation66_spill] sm:$0xff] }
 0x56e   : > { %2307 = vst [vmem:[%s3871_s13] sm:$0xff] %v2243_v45  ;;  %2308 = vst [vmem:[%s3871_s13 + $0x8] sm:$0xff] %v2244_v5  ;;  %v2255_v26 = vsub.f32 %v5305_v42, %v2181_v37  ;;  %v2256_v56 = vsub.f32 %v5306_v3, %v2181_v37  ;;  %v2257_v44 = vsub.f32 %v4210_v46, %v2181_v37  ;;  %v5309_v46 = vld [vmem:[#allocation60_spill] sm:$0xff]  ;;  %v5325_v5 = vld [vmem:[#allocation67_spill] sm:$0xff] }
 0x56f   : > { %2309 = vst [vmem:[%s3871_s13 + $0x10] sm:$0xff] %v2245_v28  ;;  %2310 = vst [vmem:[%s3871_s13 + $0x18] sm:$0xff] %v2246_v43  ;;  %v2258_v51 = vsub.f32 %v4216_v50, %v2181_v37  ;;  %v2247_v22 = vsub.f32 %v4183_v29, %v2171_v38  ;;  %v2248_v16 = vsub.f32 %v4189_v33, %v2171_v38  ;;  %v5324_v45 = vld [vmem:[#allocation68_spill] sm:$0xff]  ;;  %v5326_v28 = vld [vmem:[#allocation69_spill] sm:$0xff] }
 0x570   : > { %v2249_v27 = vsub.f32 %v5307_v9, %v2171_v38  ;;  %v2250_v8 = vsub.f32 %v5308_v49, %v2171_v38  ;;  %2319 = vst [vmem:[%s3871_s13 + $0x60] sm:$0xff] %v2255_v26  ;;  %2320 = vst [vmem:[%s3871_s13 + $0x68] sm:$0xff] %v2256_v56  ;;  %v5327_v42 = vld [vmem:[#allocation78_spill] sm:$0xff]  ;;  %v5328_v3 = vld [vmem:[#allocation80_spill] sm:$0xff] }
 0x571   : > { %2321 = vst [vmem:[%s3871_s13 + $0x70] sm:$0xff] %v2257_v44  ;;  %2322 = vst [vmem:[%s3871_s13 + $0x78] sm:$0xff] %v2258_v51  ;;  %v2191_v29 = vpop.permute.xlu1 %2190  ;;  %v2186_v33 = vpop.permute.xlu0 %2185  ;;  %v5329_v44 = vld [vmem:[#allocation79_spill] sm:$0xff]  ;;  %v5331_v9 = vld [vmem:[#allocation74_spill] sm:$0xff] }
 0x572   : > { %2311 = vst [vmem:[%s3871_s13 + $0x20] sm:$0xff] %v2247_v22  ;;  %2312 = vst [vmem:[%s3871_s13 + $0x28] sm:$0xff] %v2248_v16  ;;  %v2263_v50 = vsub.f32 %v5309_v46, %v2191_v29  ;;  %v2264_v48 = vsub.f32 %v5310_v34, %v2191_v29  ;;  %v2265_v53 = vsub.f32 %v5311_v63, %v2191_v29  ;;  %v5330_v22 = vld [vmem:[#allocation81_spill] sm:$0xff]  ;;  %v5332_v49 = vld [vmem:[#allocation76_spill] sm:$0xff] }
 0x573   : > { %2313 = vst [vmem:[%s3871_s13 + $0x30] sm:$0xff] %v2249_v27  ;;  %2314 = vst [vmem:[%s3871_s13 + $0x38] sm:$0xff] %v2250_v8  ;;  %v2266_v59 = vsub.f32 %v5312_v60, %v2191_v29  ;;  %v2259_v20 = vsub.f32 %v5313_v2, %v2186_v33  ;;  %v2260_v15 = vsub.f32 %v5314_v58, %v2186_v33  ;;  %v5333_v29 = vld [vmem:[#allocation75_spill] sm:$0xff]  ;;  %v5334_v46 = vld [vmem:[#allocation77_spill] sm:$0xff] }
 0x574   : > { %v2261_v57 = vsub.f32 %v5315_v61, %v2186_v33  ;;  %v2262_v21 = vsub.f32 %v5316_v52, %v2186_v33  ;;  %2327 = vst [vmem:[%s3871_s13 + $0xa0] sm:$0xff] %v2263_v50  ;;  %2328 = vst [vmem:[%s3871_s13 + $0xa8] sm:$0xff] %v2264_v48  ;;  %v5335_v63 = vld [vmem:[#allocation86_spill] sm:$0xff]  ;;  %v5336_v60 = vld [vmem:[#allocation88_spill] sm:$0xff] }
 0x575   : > { %2329 = vst [vmem:[%s3871_s13 + $0xb0] sm:$0xff] %v2265_v53  ;;  %2330 = vst [vmem:[%s3871_s13 + $0xb8] sm:$0xff] %v2266_v59  ;;  %v2201_v18 = vpop.permute.xlu1 %2200  ;;  %v2196_v32 = vpop.permute.xlu0 %2195  ;;  %v5337_v2 = vld [vmem:[#allocation87_spill] sm:$0xff]  ;;  %v5338_v58 = vld [vmem:[#allocation89_spill] sm:$0xff] }
 0x576   : > { %2323 = vst [vmem:[%s3871_s13 + $0x80] sm:$0xff] %v2259_v20  ;;  %2324 = vst [vmem:[%s3871_s13 + $0x88] sm:$0xff] %v2260_v15  ;;  %v2271_v36 = vsub.f32 %v4255_v13, %v2201_v18  ;;  %v2272_v7 = vsub.f32 %v4261_v23, %v2201_v18  ;;  %v2273_v62 = vsub.f32 %v4258_v14, %v2201_v18  ;;  %v5320_v23 = vld [vmem:[#allocation72_spill] sm:$0xff]  ;;  %v5339_v61 = vld [vmem:[#allocation82_spill] sm:$0xff] }
 0x577   : > { %2325 = vst [vmem:[%s3871_s13 + $0x90] sm:$0xff] %v2261_v57  ;;  %2326 = vst [vmem:[%s3871_s13 + $0x98] sm:$0xff] %v2262_v21  ;;  %v2274_v25 = vsub.f32 %v4264_v24, %v2201_v18  ;;  %v2267_v47 = vsub.f32 %v5317_v39, %v2196_v32  ;;  %v2268_v17 = vsub.f32 %v5318_v1, %v2196_v32  ;;  %v5340_v52 = vld [vmem:[#allocation84_spill] sm:$0xff]  ;;  %v5341_v18 = vld [vmem:[#allocation83_spill] sm:$0xff] }
 0x578   : > { %v2269_v19 = vsub.f32 %v4246_v6, %v2196_v32  ;;  %v2270_v40 = vsub.f32 %v4252_v10, %v2196_v32  ;;  %2335 = vst [vmem:[%s3871_s13 + $0xe0] sm:$0xff] %v2271_v36  ;;  %2336 = vst [vmem:[%s3871_s13 + $0xe8] sm:$0xff] %v2272_v7  ;;  %v5319_v6 = vld [vmem:[#allocation70_spill] sm:$0xff]  ;;  %v5342_v36 = vld [vmem:[#allocation85_spill] sm:$0xff] }
 0x579   : > { %2337 = vst [vmem:[%s3871_s13 + $0xf0] sm:$0xff] %v2273_v62  ;;  %2338 = vst [vmem:[%s3871_s13 + $0xf8] sm:$0xff] %v2274_v25  ;;  %v2211_v13 = vpop.permute.xlu1 %2210  ;;  %v2206_v14 = vpop.permute.xlu0 %2205  ;;  %v5343_v39 = vld [vmem:[#allocation93_spill] sm:$0xff]  ;;  %v5344_v1 = vld [vmem:[#allocation95_spill] sm:$0xff] }
 0x57a   : > { %2331 = vst [vmem:[%s3871_s13 + $0xc0] sm:$0xff] %v2267_v47  ;;  %2332 = vst [vmem:[%s3871_s13 + $0xc8] sm:$0xff] %v2268_v17  ;;  %v2279_v10 = vsub.f32 %v5319_v6, %v2211_v13  ;;  %v2280_v24 = vsub.f32 %v5320_v23, %v2211_v13  ;;  %v2281_v30 = vsub.f32 %v5321_v31, %v2211_v13  ;;  %v5347_v23 = vld [vmem:[#allocation91_spill] sm:$0xff]  ;;  %v5348_v31 = vld [vmem:[#allocation92_spill] sm:$0xff] }
 0x57b   : > { %2333 = vst [vmem:[%s3871_s13 + $0xd0] sm:$0xff] %v2269_v19  ;;  %2334 = vst [vmem:[%s3871_s13 + $0xd8] sm:$0xff] %v2270_v40  ;;  %v2282_v0 = vsub.f32 %v5322_v54, %v2211_v13  ;;  %v2275_v11 = vsub.f32 %v5323_v41, %v2206_v14  ;;  %v2276_v35 = vsub.f32 %v5324_v45, %v2206_v14  ;;  %v5345_v19 = vld [vmem:[#allocation94_spill] sm:$0xff] }
 0x57c   : > { %v2277_v55 = vsub.f32 %v5325_v5, %v2206_v14  ;;  %v2278_v43 = vsub.f32 %v5326_v28, %v2206_v14  ;;  %2343 = vst [vmem:[%s3871_s13 + $0x120] sm:$0xff] %v2279_v10  ;;  %2344 = vst [vmem:[%s3871_s13 + $0x128] sm:$0xff] %v2280_v24  ;;  %v5346_v14 = vld [vmem:[#allocation90_spill] sm:$0xff] }
 0x57d   : > { %2345 = vst [vmem:[%s3871_s13 + $0x130] sm:$0xff] %v2281_v30  ;;  %2346 = vst [vmem:[%s3871_s13 + $0x138] sm:$0xff] %v2282_v0  ;;  %v2221_v37 = vpop.permute.xlu1 %2220  ;;  %v2216_v38 = vpop.permute.xlu0 %2215 }
 0x57e   : > { %2339 = vst [vmem:[%s3871_s13 + $0x100] sm:$0xff] %v2275_v11  ;;  %2340 = vst [vmem:[%s3871_s13 + $0x108] sm:$0xff] %v2276_v35  ;;  %v2287_v26 = vsub.f32 %v5327_v42, %v2221_v37  ;;  %v2288_v56 = vsub.f32 %v5328_v3, %v2221_v37  ;;  %v2289_v51 = vsub.f32 %v5329_v44, %v2221_v37 }
 0x57f   : > { %2341 = vst [vmem:[%s3871_s13 + $0x110] sm:$0xff] %v2277_v55  ;;  %2342 = vst [vmem:[%s3871_s13 + $0x118] sm:$0xff] %v2278_v43  ;;  %v2290_v16 = vsub.f32 %v5330_v22, %v2221_v37  ;;  %v2283_v27 = vsub.f32 %v5331_v9, %v2216_v38  ;;  %v2284_v8 = vsub.f32 %v5332_v49, %v2216_v38 }
 0x580   : > { %v2285_v33 = vsub.f32 %v5333_v29, %v2216_v38  ;;  %v2286_v50 = vsub.f32 %v5334_v46, %v2216_v38  ;;  %2351 = vst [vmem:[%s3871_s13 + $0x160] sm:$0xff] %v2287_v26  ;;  %2352 = vst [vmem:[%s3871_s13 + $0x168] sm:$0xff] %v2288_v56 }
 0x581   : > { %2353 = vst [vmem:[%s3871_s13 + $0x170] sm:$0xff] %v2289_v51  ;;  %2354 = vst [vmem:[%s3871_s13 + $0x178] sm:$0xff] %v2290_v16  ;;  %v2231_v34 = vpop.permute.xlu1 %2230  ;;  %v2226_v48 = vpop.permute.xlu0 %2225 }
 0x582   : > { %2347 = vst [vmem:[%s3871_s13 + $0x140] sm:$0xff] %v2283_v27  ;;  %2348 = vst [vmem:[%s3871_s13 + $0x148] sm:$0xff] %v2284_v8  ;;  %v2295_v53 = vsub.f32 %v5335_v63, %v2231_v34  ;;  %v2296_v59 = vsub.f32 %v5336_v60, %v2231_v34  ;;  %v2297_v20 = vsub.f32 %v5337_v2, %v2231_v34 }
 0x583   : > { %2349 = vst [vmem:[%s3871_s13 + $0x150] sm:$0xff] %v2285_v33  ;;  %2350 = vst [vmem:[%s3871_s13 + $0x158] sm:$0xff] %v2286_v50  ;;  %v2298_v15 = vsub.f32 %v5338_v58, %v2231_v34  ;;  %v2291_v57 = vsub.f32 %v5339_v61, %v2226_v48  ;;  %v2292_v21 = vsub.f32 %v5340_v52, %v2226_v48 }
 0x584   : > { %v2293_v32 = vsub.f32 %v5341_v18, %v2226_v48  ;;  %v2294_v7 = vsub.f32 %v5342_v36, %v2226_v48  ;;  %2359 = vst [vmem:[%s3871_s13 + $0x1a0] sm:$0xff] %v2295_v53  ;;  %2360 = vst [vmem:[%s3871_s13 + $0x1a8] sm:$0xff] %v2296_v59 }
 0x585   : > { %2361 = vst [vmem:[%s3871_s13 + $0x1b0] sm:$0xff] %v2297_v20  ;;  %2362 = vst [vmem:[%s3871_s13 + $0x1b8] sm:$0xff] %v2298_v15  ;;  %v2241_v62 = vpop.permute.xlu1 %2240  ;;  %v2236_v25 = vpop.permute.xlu0 %2235 }
 0x586   : > { %2355 = vst [vmem:[%s3871_s13 + $0x180] sm:$0xff] %v2291_v57  ;;  %2356 = vst [vmem:[%s3871_s13 + $0x188] sm:$0xff] %v2292_v21  ;;  %v2303_v47 = vsub.f32 %v5343_v39, %v2241_v62  ;;  %v2304_v17 = vsub.f32 %v5344_v1, %v2241_v62  ;;  %v2305_v40 = vsub.f32 %v5345_v19, %v2241_v62 }
 0x587   : > { %2357 = vst [vmem:[%s3871_s13 + $0x190] sm:$0xff] %v2293_v32  ;;  %2358 = vst [vmem:[%s3871_s13 + $0x198] sm:$0xff] %v2294_v7  ;;  %v2306_v13 = vsub.f32 %v4360_v4, %v2241_v62  ;;  %v2299_v6 = vsub.f32 %v5346_v14, %v2236_v25  ;;  %v2300_v10 = vsub.f32 %v4345_v12, %v2236_v25 }
 0x588   : > { %v2301_v24 = vsub.f32 %v5347_v23, %v2236_v25  ;;  %v2302_v30 = vsub.f32 %v5348_v31, %v2236_v25  ;;  %2367 = vst [vmem:[%s3871_s13 + $0x1e0] sm:$0xff] %v2303_v47  ;;  %2368 = vst [vmem:[%s3871_s13 + $0x1e8] sm:$0xff] %v2304_v17 }
 0x589   : > { %2369 = vst [vmem:[%s3871_s13 + $0x1f0] sm:$0xff] %v2305_v40  ;;  %2370 = vst [vmem:[%s3871_s13 + $0x1f8] sm:$0xff] %v2306_v13 }
 0x58a   : > { %2363 = vst [vmem:[%s3871_s13 + $0x1c0] sm:$0xff] %v2299_v6  ;;  %2364 = vst [vmem:[%s3871_s13 + $0x1c8] sm:$0xff] %v2300_v10 }
 0x58b   : > { %2365 = vst [vmem:[%s3871_s13 + $0x1d0] sm:$0xff] %v2301_v24  ;;  %2366 = vst [vmem:[%s3871_s13 + $0x1d8] sm:$0xff] %v2302_v30 }
 0x58c PF: > { %s2766_s7 = sadd.s32 4294967294, %s3613_s23  ;;  %s2391_s8 = sshll.u32 %s3871_s13, 4  ;;  %s4968_s8 = int_to_ptr.vmem [resolvable:$true] %s2391_s8 }
 0x58d   : > { %p2380_p3 = scmp.gt.s32.totalorder %s2766_s7, 0  ;;  %s5349_s16 = sld [smem:[#allocation128_spill]] }
 0x58e   : > { %s5350_s15 = sand.u32 1, %s3593_s19   ;;  %s3489_s0 = scalar_lea.vmem %s4968_s8, 8192 }
 0x58f   : > { %s5384_s7 = smov (!%p2380_p3, %s2766_s7), 0  ;;  %s4977_s27 = scalar_lea.sflag [#allocation12], %s5350_s15 }
 0x590   : > { %s2797_s29 = sshll.u32 %s5384_s7, 9  ;;  %p3490_p8 = scmp.ne.s32.totalorder %s4968_s8, %s3489_s0 }
 0x591   : > { %p5351_p9 = scmp.ne.s32.totalorder %s5141_s6, 0  ;;  %s3649_s23 = smov [#allocation15]  }
 0x592   : > { %s3493_s13 = sshll.u32 %s3649_s23, 4  ;;  %s3494_s13 = int_to_ptr.vmem [resolvable:$false] %s3493_s13 }
 0x593   : > { %s4973_s18 = scalar_lea.hbm %s5349_s16, %s2797_s29  ;;  %p3491_p2 = pnand %p3490_p8, %p5351_p9 }
 0x594   : > { %s3495_s12 = scalar_lea.vmem %s3494_s13, 16384  ;;  %p3496_p10 = scmp.lt.s32.totalorder %s4968_s8, %s3494_s13 }
 0x595   : > { %p3492_p6 = pneg %p3491_p2  ;;  %p3497_p12 = scmp.lt.s32.totalorder %s3495_s12, %s3489_s0 }
 0x597   : > { %p3498_p13 = por %p3497_p12, %p3496_p10 }
 0x599   : > { %p3499_p5 = pnand %p3498_p13, %p3492_p6 }
 0x59b   : > { %3502 = shalt.err (!%p3499_p5)
}
 0x59c   : > { %s3503_s10 = scalar_lea.hbm %s4973_s18, 8192  ;;  %s3507_s21 = scalar_lea.hbm %s5349_s16, 16384 }
 0x59d   : > { %p3504_p4 = scmp.ne.s32.totalorder %s4973_s18, %s3503_s10  ;;  %p3508_p11 = scmp.lt.s32.totalorder %s4973_s18, %s5349_s16 }
 0x59e   : > { %p3509_p7 = scmp.lt.s32.totalorder %s3507_s21, %s3503_s10 }
 0x59f   : > { %p3505_p0 = pnand %p3504_p4, %p5351_p9 }
 0x5a0   : > { %p3510_p3 = por %p3509_p7, %p3508_p11 }
 0x5a1   : > { %p3506_p1 = pneg %p3505_p0 }
 0x5a3   : > { %p3511_p8 = pnand %p3510_p3, %p3506_p1 }
 0x5a5   : > { %3514 = shalt.err (!%p3511_p8)
}
 0x5a6   : > { %s3650_s20 = smov 512   ;;  %s3651_s4 = smov 1024  }
 0x5a7   : > { %s3652_s30 = smov 32  }
 0x5a8   : > { %2802 = dma.vmem_to_hbm [thread:$0]  (%p5351_p9), %s4968_s8, 8192, %s4973_s18, %s4977_s27, %s3650_s20, %s3651_s4, %s3652_s30  }
 0x5a9 PF: > { %s5352_s25 = sld [smem:[#allocation43_spill]] }
 0x5aa   : > { %s5353_s11 = sld [smem:[#allocation38_spill]] }
 0x5ab   : > { %s5354_s24 = sld [smem:[#allocation47_spill]] }
 0x5af   : > { %p2816_p2 = scmp.ge.s32.totalorder %s5352_s25, 2 }
 0x5b0   : > { %s2406_s5 = sand.u32 1, %s5353_s11  }
 0x5b1   : > { %p5355_p6 = scmp.ne.s32.totalorder %s5354_s24, 0  ;;  %s2407_s17 = scalar_lea.sflag [#allocation12], %s2406_s5 }
 0x5b3   : > { %p2812_p10 = pnand %p2816_p2, %p5355_p6 }
 0x5b5   : > { %p2813_p12 = pneg %p2812_p10 }
 0x5b7   : > { %3584 = dma.done.wait (%p2813_p12), %s2407_s17, 8192  }
 0x5b8   : > { %3586 = vsyncadd (%p2813_p12), %s2407_s17, 4294959104  ;;  %s27_s25 = sadd.s32 1, %s5352_s25   ;;  %s5356_s14 = sld [smem:[#allocation39_spill]] }
 0x5b9   : > { %p24_p13 = scmp.ge.s32.totalorder %s27_s25, 6   ;;  %s5357_s20 = sld [smem:[#allocation46_spill]] }
 0x5ba   : > { %s5358_s21 = sld [smem:[#allocation40_spill]]  ;;  %s5363_s18 = smov %s3593_s19 }
 0x5bb   : > { %s5359_s22 = sld [smem:[#allocation41_spill]]  ;;  %26 = sbr.rel (!%p24_p13) target bundleno = 18 (0x12), region = 153 }
 0x5bc   : > { %s5360_s0 = sld [smem:[#allocation45_spill]] }
 0x5bd   : > { %s5361_s23 = sld [smem:[#allocation42_spill]] }
 0x5be   : > { %s5362_s24 = sld [smem:[#allocation44_spill]]  ;;  %s5364_s19 = smov %s5356_s14 }
 0x5c0   :  { %2412 = vsyncpa [#allocation11], 1 }
 0x5c1   :  { %2414 = vsyncpa [#allocation11 + $0x1], 1 }
 0x5c2   :  { %2415 = vsyncpa [#allocation14], 1 }
 0x5c3   :  { %2417 = vsyncpa [#allocation14 + $0x1], 1 }
 0x5c4   :  { %2418 = vsyncpa [#allocation12], 1 }
 0x5c5   :  { %2420 = vsyncpa [#allocation12 + $0x1], 1 }
 0x5c6   :  { %2421 = vsyncmov [#allocation7] }
 0x5c9   :  { %s2422_s6 = vpop.sfrf %2421 }
 0x5ca   :  { %p2771_p9 = scmp.ne.s32.totalorder %s2422_s6, 0 }
 0x5cc   :  { %2426 = shalt.err (%p2771_p9)  }
 0x5cd   :  { %2428 = vsyncmov [#allocation7 + $0x1] }
 0x5d0   :  { %s2429_s7 = vpop.sfrf %2428 }
 0x5d1   :  { %p2772_p5 = scmp.ne.s32.totalorder %s2429_s7, 0 }
 0x5d3   :  { %2433 = shalt.err (%p2772_p5)  }
 0x5d4   :  { %2435 = vsyncmov [#allocation7 + $0x2] }
 0x5d7   :  { %s2436_s8 = vpop.sfrf %2435 }
 0x5d8   :  { %p2773_p4 = scmp.ne.s32.totalorder %s2436_s8, 0 }
 0x5da   :  { %2440 = shalt.err (%p2773_p4)  }
 0x5db   :  { %2442 = vsyncmov [#allocation7 + $0x3] }
 0x5de   :  { %s2443_s29 = vpop.sfrf %2442 }
 0x5df   :  { %p2774_p0 = scmp.ne.s32.totalorder %s2443_s29, 0 }
 0x5e1   :  { %2447 = shalt.err (%p2774_p0)  }
 0x5e2   :  { %2449 = vsyncmov [#allocation7 + $0x4] }
 0x5e5   :  { %s2450_s1 = vpop.sfrf %2449 }
 0x5e6   :  { %p2775_p1 = scmp.ne.s32.totalorder %s2450_s1, 0 }
 0x5e8   :  { %2454 = shalt.err (%p2775_p1)  }
 0x5e9   :  { %2456 = vsyncmov [#allocation7 + $0x5] }
 0x5ec   :  { %s2457_s19 = vpop.sfrf %2456 }
 0x5ed   :  { %p2776_p11 = scmp.ne.s32.totalorder %s2457_s19, 0 }
 0x5ef   :  { %2461 = shalt.err (%p2776_p11)  }
 0x5f0   :  { %2463 = vsyncmov [#allocation7 + $0x6] }
 0x5f3   :  { %s2464_s9 = vpop.sfrf %2463 }
 0x5f4   :  { %p2777_p7 = scmp.ne.s32.totalorder %s2464_s9, 0 }
 0x5f6   :  { %2468 = shalt.err (%p2777_p7)  }
 0x5f7   :  { %2470 = vsyncmov [#allocation7 + $0x7] }
 0x5fa   :  { %s2471_s28 = vpop.sfrf %2470 }
 0x5fb   :  { %p2778_p3 = scmp.ne.s32.totalorder %s2471_s28, 0 }
 0x5fd   :  { %2475 = shalt.err (%p2778_p3)  }

</bundles_post_ra>
